<compile_context>
chip_gen: v5e
topology: v5e:2x2
jax: 0.10.0
libtpu: 0.0.40
codegen_flags: <defaults>
</compile_context>

<pallas_src>
import jax
import jax.numpy as jnp
from jax.experimental import pallas as pl
from jax.experimental.pallas import tpu as pltpu


# ----------------------------------------------------------------------------
# Fused Pallas kernel: all 6 convs (+bias+LeakyReLU) for BT samples per grid step.
#
# Layouts inside the kernel (BT = samples / step, a multiple of 16):
#   h_hw : (4*BT, 256)  rows = (h, b), lanes = (w, c)
#   h_wh : (4*BT, 256)  rows = (w, b), lanes = (h, c)
#   c1   : (4*BT, 384)  rows = (h, b), lanes = (w, c)   conv1 spatial (4, 3)
#   c2   : (4*BT, 384)  rows = (w, b), lanes = (h, c)   conv2 spatial (3, 4)
#   c3   : (4*BT, 256)  rows = (h, b), lanes = (w, c)   conv3 spatial (4, 2)
#   c4   : (3*BT, 384)  rows = (h, b), lanes = (w, c)   conv4 spatial (3, 3)
#   c5   : (3*BT, 384)  rows = (w, b), lanes = (h, c)   conv5 spatial (3, 3)
#   c6   : (4*BT, 256)  rows = (w, b), lanes = (h, c)   conv6 spatial (2, 4)
# ----------------------------------------------------------------------------
def _conv2layer_kernel(h_hw_ref, h_wh_ref,
                       w1_ref, w2_ref, w3_ref, w4a_ref, w4b_ref,
                       w5a_ref, w5b_ref, w6_ref,
                       b1_ref, b2_ref, b3_ref, b4_ref, b5_ref, b6_ref,
                       c1_ref, c2_ref, c3_ref, c4_ref, c5_ref, c6_ref):
    f32 = jnp.float32
    bf16 = jnp.bfloat16
    bt = h_hw_ref.shape[1]                       # static samples-per-step

    def leaky(a):                                # LeakyReLU(0.01) in f32
        return jnp.where(a >= 0, a, 0.01 * a)

    # (4, BT, 256) -> (4*BT, 256): BT is a multiple of 16 so this collapse is
    # sublane-tile aligned; M = 4*BT fills the MXU sublane dimension.
    h_hw = h_hw_ref[...].reshape(4 * bt, 256)
    h_wh = h_wh_ref[...].reshape(4 * bt, 256)

    # ---- level 1: conv1 (1,2), conv2 (2,1); shift folded into packed weights.
    c1 = leaky(jnp.dot(h_hw, w1_ref[...], preferred_element_type=f32) + b1_ref[...])
    c2 = leaky(jnp.dot(h_wh, w2_ref[...], preferred_element_type=f32) + b2_ref[...])
    c1b = c1.astype(bf16)                        # cast once, reused by c3/c4 and the store
    c2b = c2.astype(bf16)
    c1_ref[...] = c1b.reshape(4, bt, 384)
    c2_ref[...] = c2b.reshape(4, bt, 384)

    # ---- conv3 (1,2) on c1: w-shift lives on the lane axis -> one dot.
    c3 = leaky(jnp.dot(c1b, w3_ref[...], preferred_element_type=f32) + b3_ref[...])
    c3_ref[...] = c3.astype(bf16).reshape(4, bt, 256)

    # ---- conv6 (2,1) on c2: h-shift lives on the lane axis -> one dot.
    c6 = leaky(jnp.dot(c2b, w6_ref[...], preferred_element_type=f32) + b6_ref[...])
    c6_ref[...] = c6.astype(bf16).reshape(4, bt, 256)

    # ---- conv4 (2,1) on c1: h-shift on the (h-major) row axis -> two contiguous,
    #      tile-aligned row slices + two accumulating dots (no concat, no re-cast).
    c4 = leaky(jnp.dot(c1b[0:3 * bt, :], w4a_ref[...], preferred_element_type=f32)
               + jnp.dot(c1b[bt:4 * bt, :], w4b_ref[...], preferred_element_type=f32)
               + b4_ref[...])
    c4_ref[...] = c4.astype(bf16).reshape(3, bt, 384)

    # ---- conv5 (1,2) on c2: w-shift on the (w-major) row axis.
    c5 = leaky(jnp.dot(c2b[0:3 * bt, :], w5a_ref[...], preferred_element_type=f32)
               + jnp.dot(c2b[bt:4 * bt, :], w5b_ref[...], preferred_element_type=f32)
               + b5_ref[...])
    c5_ref[...] = c5.astype(bf16).reshape(3, bt, 384)


def _fused_convs(h_hw, h_wh, pk, bt):
    """Single pallas_call computing all six conv outputs for the (padded) batch."""
    b_pad = h_hw.shape[1]
    grid = (b_pad // bt,)

    def act(rows, lanes):                        # batch-tiled activation / output blocks
        return pl.BlockSpec((rows, bt, lanes), lambda i: (0, i, 0))

    def res(shape):                              # grid-resident packed weights / biases:
        return pl.BlockSpec(shape, lambda i: (0, 0),          # constant index -> DMA once
                            pipeline_mode=pl.Buffered(1))      # single-buffered in VMEM

    out_shapes = (
        jax.ShapeDtypeStruct((4, b_pad, 384), jnp.bfloat16),   # c1 rows=(h,b) lanes=(w,c)
        jax.ShapeDtypeStruct((4, b_pad, 384), jnp.bfloat16),   # c2 rows=(w,b) lanes=(h,c)
        jax.ShapeDtypeStruct((4, b_pad, 256), jnp.bfloat16),   # c3 rows=(h,b) lanes=(w,c)
        jax.ShapeDtypeStruct((3, b_pad, 384), jnp.bfloat16),   # c4 rows=(h,b) lanes=(w,c)
        jax.ShapeDtypeStruct((3, b_pad, 384), jnp.bfloat16),   # c5 rows=(w,b) lanes=(h,c)
        jax.ShapeDtypeStruct((4, b_pad, 256), jnp.bfloat16),   # c6 rows=(w,b) lanes=(h,c)
    )
    out_specs = tuple(act(s.shape[0], s.shape[2]) for s in out_shapes)

    in_specs = [
        act(4, 256), act(4, 256),
        res((256, 384)), res((256, 384)), res((384, 256)),
        res((384, 384)), res((384, 384)), res((384, 384)), res((384, 384)),
        res((384, 256)),
        res((1, 384)), res((1, 384)), res((1, 256)),
        res((1, 384)), res((1, 384)), res((1, 256)),
    ]

    return pl.pallas_call(
        _conv2layer_kernel,
        out_shape=out_shapes,
        grid=grid,
        in_specs=in_specs,
        out_specs=out_specs,
        compiler_params=pltpu.CompilerParams(
            dimension_semantics=("parallel",)),
    )(h_hw, h_wh,
      pk["w1"], pk["w2"], pk["w3"], pk["w4a"], pk["w4b"],
      pk["w5a"], pk["w5b"], pk["w6"],
      pk["b1"], pk["b2"], pk["b3"], pk["b4"], pk["b5"], pk["b6"])


# ----------------------------------------------------------------------------
# Weight packing (done ONCE at init, not in the forward pass).
# ----------------------------------------------------------------------------
def _shift_weight(w0, w1, n_out):
    """Packed weight for a 2-tap conv whose shift axis lives on the LANE axis."""
    cin, cout = w0.shape
    W = jnp.zeros(((n_out + 1) * cin, n_out * cout), w0.dtype)
    for j in range(n_out):
        W = W.at[j * cin:(j + 1) * cin, j * cout:(j + 1) * cout].set(w0)
        W = W.at[(j + 1) * cin:(j + 2) * cin, j * cout:(j + 1) * cout].set(w1)
    return W


def _block_diag(w, n):
    """Block-diagonal repeat of one tap (for convs whose shift axis is on the rows)."""
    cin, cout = w.shape
    W = jnp.zeros((n * cin, n * cout), w.dtype)
    for j in range(n):
        W = W.at[j * cin:(j + 1) * cin, j * cout:(j + 1) * cout].set(w)
    return W


def pack_params(params):
    def bf(a):
        return a.astype(jnp.bfloat16)

    w10, w11, b1 = params["conv1"]
    w20, w21, b2 = params["conv2"]
    w30, w31, b3 = params["conv3"]
    w40, w41, b4 = params["conv4"]
    w50, w51, b5 = params["conv5"]
    w60, w61, b6 = params["conv6"]
    return {
        "w1": bf(_shift_weight(w10, w11, 3)),      # (256, 384)
        "w2": bf(_shift_weight(w20, w21, 3)),      # (256, 384)
        "w3": bf(_shift_weight(w30, w31, 2)),      # (384, 256)
        "w4a": bf(_block_diag(w40, 3)),            # (384, 384) tap h
        "w4b": bf(_block_diag(w41, 3)),            # (384, 384) tap h+1
        "w5a": bf(_block_diag(w50, 3)),            # (384, 384) tap w
        "w5b": bf(_block_diag(w51, 3)),            # (384, 384) tap w+1
        "w6": bf(_shift_weight(w60, w61, 2)),      # (384, 256)
        "b1": jnp.tile(b1, 3)[None, :],            # (1, 384) f32
        "b2": jnp.tile(b2, 3)[None, :],
        "b3": jnp.tile(b3, 2)[None, :],            # (1, 256)
        "b4": jnp.tile(b4, 3)[None, :],
        "b5": jnp.tile(b5, 3)[None, :],
        "b6": jnp.tile(b6, 2)[None, :],
    }


# ----------------------------------------------------------------------------
# Forward pass (module semantics preserved exactly).
# ----------------------------------------------------------------------------
def _plan_batch(B):
    """Samples per grid step (multiple of 16 -> bf16 sublane-tile aligned blocks)."""
    if B >= 256:
        bt = 128
    elif B >= 32:
        bt = (((B + 1) // 2) + 15) // 16 * 16    # two grid steps (both v7x TCs busy)
    else:
        bt = ((B + 15) // 16) * 16               # tiny batches: one padded step
    b_pad = ((B + bt - 1) // bt) * bt
    return bt, b_pad


def conv2layer_forward(x, embedding, packed):
    B = x.shape[0]
    bt, b_pad = _plan_batch(B)
    if b_pad != B:
        x = jnp.pad(x, ((0, b_pad - B), (0, 0), (0, 0)))

    h = jnp.take(embedding, x, axis=0).astype(jnp.bfloat16)          # (b_pad, 4, 4, 64)
    # h-major rows for the conv1/conv3/conv4 chain, w-major rows for conv2/conv5/conv6.
    h_hw = jnp.transpose(h, (1, 0, 2, 3)).reshape(4, b_pad, 256)     # rows=(h,b) lanes=(w,c)
    h_wh = jnp.transpose(h, (2, 0, 1, 3)).reshape(4, b_pad, 256)     # rows=(w,b) lanes=(h,c)

    c1, c2, c3, c4, c5, c6 = _fused_convs(h_hw, h_wh, packed, bt)

    # Reorder the bf16 results to PyTorch's NCHW .reshape(-1, K*128) element order
    # (c, h, w) and concatenate (exact module output, cast back to f32).
    # TODO(synk): this (c,h,w) permutation could be folded into a downstream consumer's
    # weights (or done in-kernel) to remove this extra fused-transpose pass.
    def flat_hw(t, hh, ww):      # t: (hh, b, ww*128), rows=(h,b), lanes=(w,c)
        return jnp.transpose(t.reshape(hh, b_pad, ww, 128), (1, 3, 0, 2)).reshape(b_pad, -1)

    def flat_wh(t, hh, ww):      # t: (ww, b, hh*128), rows=(w,b), lanes=(h,c)
        return jnp.transpose(t.reshape(ww, b_pad, hh, 128), (1, 3, 2, 0)).reshape(b_pad, -1)

    out = jnp.concatenate([
        flat_hw(c1, 4, 3), flat_wh(c2, 3, 4),
        flat_hw(c3, 4, 2), flat_hw(c4, 3, 3),
        flat_wh(c5, 3, 3), flat_wh(c6, 2, 4),
    ], axis=-1).astype(jnp.float32)                                  # (b_pad, 58*128)
    return out[:B]


# ----------------------------------------------------------------------------
# Deterministic parameter init (shapes match the PyTorch module).
# ----------------------------------------------------------------------------
def init_params(key):
    keys = jax.random.split(key, 19)
    params = {"embedding": 0.1 * jax.random.normal(keys[0], (16, 64), jnp.float32)}
    cins = {"conv1": 64, "conv2": 64, "conv3": 128,
            "conv4": 128, "conv5": 128, "conv6": 128}
    i = 1
    for name, cin in cins.items():
        scale = 1.0 / jnp.sqrt(jnp.float32(2 * cin))
        w0 = scale * jax.random.normal(keys[i], (cin, 128), jnp.float32); i += 1
        w1 = scale * jax.random.normal(keys[i], (cin, 128), jnp.float32); i += 1
        b = 0.01 * jax.random.normal(keys[i], (128,), jnp.float32); i += 1
        params[name] = (w0, w1, b)
    return params


# ----------------------------------------------------------------------------
# Pure-JAX reference (lax.conv, f32) for correctness checking.
# ----------------------------------------------------------------------------
def _nchw_flat(t):
    return jnp.transpose(t, (0, 3, 1, 2)).reshape(t.shape[0], -1)


def _ref_conv(inp, params_conv, kh, kw):
    w0, w1, b = params_conv
    k = jnp.stack([w0, w1], axis=0).reshape(kh, kw, w0.shape[0], w0.shape[1])
    y = jax.lax.conv_general_dilated(
        inp, k, (1, 1), "VALID",
        dimension_numbers=("NHWC", "HWIO", "NHWC")) + b
    return jnp.where(y >= 0, y, 0.01 * y)


def ref_forward(x, params):
    h = jnp.take(params["embedding"], x, axis=0)
    c1 = _ref_conv(h, params["conv1"], 1, 2)
    c2 = _ref_conv(h, params["conv2"], 2, 1)
    c3 = _ref_conv(c1, params["conv3"], 1, 2)
    c4 = _ref_conv(c1, params["conv4"], 2, 1)
    c5 = _ref_conv(c2, params["conv5"], 1, 2)
    c6 = _ref_conv(c2, params["conv6"], 2, 1)
    return jnp.concatenate(
        [_nchw_flat(c1), _nchw_flat(c2), _nchw_flat(c3),
         _nchw_flat(c4), _nchw_flat(c5), _nchw_flat(c6)], axis=-1)


if __name__ == "__main__":
    key = jax.random.PRNGKey(0)
    kx, kp = jax.random.split(key)
    x = jax.random.randint(kx, (2, 4, 4), 0, 16, dtype=jnp.int32)
    params = init_params(kp)
    packed = pack_params(params)        # one-time structured bf16 weight packing

    fwd = jax.jit(lambda xx: conv2layer_forward(xx, params["embedding"], packed))
    out = jax.block_until_ready(fwd(x))
    assert out.shape == (2, 58 * 128), out.shape   # 12+12+8+9+9+8 = 58 blocks

    ref = jax.block_until_ready(jax.jit(lambda xx: ref_forward(xx, params))(x))
    max_err = float(jnp.max(jnp.abs(out - ref)))
    assert bool(jnp.allclose(out, ref, rtol=2e-2, atol=2e-2)), max_err

    print("KERNEL_OK")
</pallas_src>

<mosaic_0001>
module attributes {stable_mosaic.version = 11 : i64} {
  func.func @_conv2layer_kernel(%arg0: i32, %arg1: memref<4x16x256xbf16, #tpu.memory_space<vmem>>, %arg2: memref<4x16x256xbf16, #tpu.memory_space<vmem>>, %arg3: memref<256x384xbf16, #tpu.memory_space<vmem>>, %arg4: memref<256x384xbf16, #tpu.memory_space<vmem>>, %arg5: memref<384x256xbf16, #tpu.memory_space<vmem>>, %arg6: memref<384x384xbf16, #tpu.memory_space<vmem>>, %arg7: memref<384x384xbf16, #tpu.memory_space<vmem>>, %arg8: memref<384x384xbf16, #tpu.memory_space<vmem>>, %arg9: memref<384x384xbf16, #tpu.memory_space<vmem>>, %arg10: memref<384x256xbf16, #tpu.memory_space<vmem>>, %arg11: memref<1x384xf32, #tpu.memory_space<vmem>>, %arg12: memref<1x384xf32, #tpu.memory_space<vmem>>, %arg13: memref<1x256xf32, #tpu.memory_space<vmem>>, %arg14: memref<1x384xf32, #tpu.memory_space<vmem>>, %arg15: memref<1x384xf32, #tpu.memory_space<vmem>>, %arg16: memref<1x256xf32, #tpu.memory_space<vmem>>, %arg17: memref<4x16x384xbf16, #tpu.memory_space<vmem>>, %arg18: memref<4x16x384xbf16, #tpu.memory_space<vmem>>, %arg19: memref<4x16x256xbf16, #tpu.memory_space<vmem>>, %arg20: memref<3x16x384xbf16, #tpu.memory_space<vmem>>, %arg21: memref<3x16x384xbf16, #tpu.memory_space<vmem>>, %arg22: memref<4x16x256xbf16, #tpu.memory_space<vmem>>) attributes {dimension_semantics = [#tpu.dimension_semantics<parallel>], iteration_bounds = array<i64: 1>, scalar_prefetch = 0 : i64, scratch_operands = 0 : i64, tpu.core_type = #tpu.core_type<tc>, window_params = [{transform_indices = @transform_0, window_bounds = array<i64: 4, 16, 256>}, {transform_indices = @transform_1, window_bounds = array<i64: 4, 16, 256>}, {pipeline_mode = #tpu.pipeline_mode<synchronous>, transform_indices = @transform_2, window_bounds = array<i64: 256, 384>}, {pipeline_mode = #tpu.pipeline_mode<synchronous>, transform_indices = @transform_3, window_bounds = array<i64: 256, 384>}, {pipeline_mode = #tpu.pipeline_mode<synchronous>, transform_indices = @transform_4, window_bounds = array<i64: 384, 256>}, {pipeline_mode = #tpu.pipeline_mode<synchronous>, transform_indices = @transform_5, window_bounds = array<i64: 384, 384>}, {pipeline_mode = #tpu.pipeline_mode<synchronous>, transform_indices = @transform_6, window_bounds = array<i64: 384, 384>}, {pipeline_mode = #tpu.pipeline_mode<synchronous>, transform_indices = @transform_7, window_bounds = array<i64: 384, 384>}, {pipeline_mode = #tpu.pipeline_mode<synchronous>, transform_indices = @transform_8, window_bounds = array<i64: 384, 384>}, {pipeline_mode = #tpu.pipeline_mode<synchronous>, transform_indices = @transform_9, window_bounds = array<i64: 384, 256>}, {pipeline_mode = #tpu.pipeline_mode<synchronous>, transform_indices = @transform_10, window_bounds = array<i64: 1, 384>}, {pipeline_mode = #tpu.pipeline_mode<synchronous>, transform_indices = @transform_11, window_bounds = array<i64: 1, 384>}, {pipeline_mode = #tpu.pipeline_mode<synchronous>, transform_indices = @transform_12, window_bounds = array<i64: 1, 256>}, {pipeline_mode = #tpu.pipeline_mode<synchronous>, transform_indices = @transform_13, window_bounds = array<i64: 1, 384>}, {pipeline_mode = #tpu.pipeline_mode<synchronous>, transform_indices = @transform_14, window_bounds = array<i64: 1, 384>}, {pipeline_mode = #tpu.pipeline_mode<synchronous>, transform_indices = @transform_15, window_bounds = array<i64: 1, 256>}, {transform_indices = @transform_16, window_bounds = array<i64: 4, 16, 384>}, {transform_indices = @transform_17, window_bounds = array<i64: 4, 16, 384>}, {transform_indices = @transform_18, window_bounds = array<i64: 4, 16, 256>}, {transform_indices = @transform_19, window_bounds = array<i64: 3, 16, 384>}, {transform_indices = @transform_20, window_bounds = array<i64: 3, 16, 384>}, {transform_indices = @transform_21, window_bounds = array<i64: 4, 16, 256>}]} {
    %c0 = arith.constant 0 : index
    %c0_0 = arith.constant 0 : index
    %c0_1 = arith.constant 0 : index
    %0 = vector.load %arg1[%c0, %c0_0, %c0_1] : memref<4x16x256xbf16, #tpu.memory_space<vmem>>, vector<4x16x256xbf16>
    %1 = vector.shape_cast %0 : vector<4x16x256xbf16> to vector<64x256xbf16>
    %c0_2 = arith.constant 0 : index
    %c0_3 = arith.constant 0 : index
    %c0_4 = arith.constant 0 : index
    %2 = vector.load %arg2[%c0_2, %c0_3, %c0_4] : memref<4x16x256xbf16, #tpu.memory_space<vmem>>, vector<4x16x256xbf16>
    %3 = vector.shape_cast %2 : vector<4x16x256xbf16> to vector<64x256xbf16>
    %c0_5 = arith.constant 0 : index
    %c0_6 = arith.constant 0 : index
    %4 = vector.load %arg3[%c0_5, %c0_6] : memref<256x384xbf16, #tpu.memory_space<vmem>>, vector<256x384xbf16>
    %cst = arith.constant dense<0.000000e+00> : vector<64x384xf32>
    %5 = tpu.matmul %1, %4, %cst {dimension_numbers = #tpu.dot_dimension_numbers<[1], [0], [0], [1], [0, 0, 1, 1], [], []>} : vector<64x256xbf16>, vector<256x384xbf16>, vector<64x384xf32> -> vector<64x384xf32>
    %c0_7 = arith.constant 0 : index
    %c0_8 = arith.constant 0 : index
    %6 = vector.load %arg11[%c0_7, %c0_8] : memref<1x384xf32, #tpu.memory_space<vmem>>, vector<1x384xf32>
    %7 = vector.broadcast %6 : vector<1x384xf32> to vector<64x384xf32>
    %8 = arith.addf %5, %7 : vector<64x384xf32>
    %cst_9 = arith.constant 0.000000e+00 : f32
    %9 = vector.broadcast %cst_9 : f32 to vector<64x384xf32>
    %10 = arith.cmpf oge, %8, %9 : vector<64x384xf32>
    %cst_10 = arith.constant 0.00999999977 : f32
    %11 = vector.broadcast %cst_10 : f32 to vector<64x384xf32>
    %12 = arith.mulf %11, %8 : vector<64x384xf32>
    %13 = arith.select %10, %8, %12 : vector<64x384xi1>, vector<64x384xf32>
    %c0_11 = arith.constant 0 : index
    %c0_12 = arith.constant 0 : index
    %14 = vector.load %arg4[%c0_11, %c0_12] : memref<256x384xbf16, #tpu.memory_space<vmem>>, vector<256x384xbf16>
    %cst_13 = arith.constant dense<0.000000e+00> : vector<64x384xf32>
    %15 = tpu.matmul %3, %14, %cst_13 {dimension_numbers = #tpu.dot_dimension_numbers<[1], [0], [0], [1], [0, 0, 1, 1], [], []>} : vector<64x256xbf16>, vector<256x384xbf16>, vector<64x384xf32> -> vector<64x384xf32>
    %c0_14 = arith.constant 0 : index
    %c0_15 = arith.constant 0 : index
    %16 = vector.load %arg12[%c0_14, %c0_15] : memref<1x384xf32, #tpu.memory_space<vmem>>, vector<1x384xf32>
    %17 = vector.broadcast %16 : vector<1x384xf32> to vector<64x384xf32>
    %18 = arith.addf %15, %17 : vector<64x384xf32>
    %cst_16 = arith.constant 0.000000e+00 : f32
    %19 = vector.broadcast %cst_16 : f32 to vector<64x384xf32>
    %20 = arith.cmpf oge, %18, %19 : vector<64x384xf32>
    %cst_17 = arith.constant 0.00999999977 : f32
    %21 = vector.broadcast %cst_17 : f32 to vector<64x384xf32>
    %22 = arith.mulf %21, %18 : vector<64x384xf32>
    %23 = arith.select %20, %18, %22 : vector<64x384xi1>, vector<64x384xf32>
    %24 = arith.truncf %13 : vector<64x384xf32> to vector<64x384xbf16>
    %25 = arith.truncf %23 : vector<64x384xf32> to vector<64x384xbf16>
    %26 = vector.shape_cast %24 : vector<64x384xbf16> to vector<4x16x384xbf16>
    %c0_18 = arith.constant 0 : index
    %c0_19 = arith.constant 0 : index
    %c0_20 = arith.constant 0 : index
    %27 = vector.load %arg17[%c0_18, %c0_19, %c0_20] : memref<4x16x384xbf16, #tpu.memory_space<vmem>>, vector<4x16x384xbf16>
    tpu.vector_store %arg17[%c0_18, %c0_19, %c0_20], %26 {strides = array<i32>} : memref<4x16x384xbf16, #tpu.memory_space<vmem>>, vector<4x16x384xbf16>,
    %28 = vector.shape_cast %25 : vector<64x384xbf16> to vector<4x16x384xbf16>
    %c0_21 = arith.constant 0 : index
    %c0_22 = arith.constant 0 : index
    %c0_23 = arith.constant 0 : index
    %29 = vector.load %arg18[%c0_21, %c0_22, %c0_23] : memref<4x16x384xbf16, #tpu.memory_space<vmem>>, vector<4x16x384xbf16>
    tpu.vector_store %arg18[%c0_21, %c0_22, %c0_23], %28 {strides = array<i32>} : memref<4x16x384xbf16, #tpu.memory_space<vmem>>, vector<4x16x384xbf16>,
    %c0_24 = arith.constant 0 : index
    %c0_25 = arith.constant 0 : index
    %30 = vector.load %arg5[%c0_24, %c0_25] : memref<384x256xbf16, #tpu.memory_space<vmem>>, vector<384x256xbf16>
    %cst_26 = arith.constant dense<0.000000e+00> : vector<64x256xf32>
    %31 = tpu.matmul %24, %30, %cst_26 {dimension_numbers = #tpu.dot_dimension_numbers<[1], [0], [0], [1], [0, 0, 1, 1], [], []>} : vector<64x384xbf16>, vector<384x256xbf16>, vector<64x256xf32> -> vector<64x256xf32>
    %c0_27 = arith.constant 0 : index
    %c0_28 = arith.constant 0 : index
    %32 = vector.load %arg13[%c0_27, %c0_28] : memref<1x256xf32, #tpu.memory_space<vmem>>, vector<1x256xf32>
    %33 = vector.broadcast %32 : vector<1x256xf32> to vector<64x256xf32>
    %34 = arith.addf %31, %33 : vector<64x256xf32>
    %cst_29 = arith.constant 0.000000e+00 : f32
    %35 = vector.broadcast %cst_29 : f32 to vector<64x256xf32>
    %36 = arith.cmpf oge, %34, %35 : vector<64x256xf32>
    %cst_30 = arith.constant 0.00999999977 : f32
    %37 = vector.broadcast %cst_30 : f32 to vector<64x256xf32>
    %38 = arith.mulf %37, %34 : vector<64x256xf32>
    %39 = arith.select %36, %34, %38 : vector<64x256xi1>, vector<64x256xf32>
    %40 = arith.truncf %39 : vector<64x256xf32> to vector<64x256xbf16>
    %41 = vector.shape_cast %40 : vector<64x256xbf16> to vector<4x16x256xbf16>
    %c0_31 = arith.constant 0 : index
    %c0_32 = arith.constant 0 : index
    %c0_33 = arith.constant 0 : index
    %42 = vector.load %arg19[%c0_31, %c0_32, %c0_33] : memref<4x16x256xbf16, #tpu.memory_space<vmem>>, vector<4x16x256xbf16>
    tpu.vector_store %arg19[%c0_31, %c0_32, %c0_33], %41 {strides = array<i32>} : memref<4x16x256xbf16, #tpu.memory_space<vmem>>, vector<4x16x256xbf16>,
    %c0_34 = arith.constant 0 : index
    %c0_35 = arith.constant 0 : index
    %43 = vector.load %arg10[%c0_34, %c0_35] : memref<384x256xbf16, #tpu.memory_space<vmem>>, vector<384x256xbf16>
    %cst_36 = arith.constant dense<0.000000e+00> : vector<64x256xf32>
    %44 = tpu.matmul %25, %43, %cst_36 {dimension_numbers = #tpu.dot_dimension_numbers<[1], [0], [0], [1], [0, 0, 1, 1], [], []>} : vector<64x384xbf16>, vector<384x256xbf16>, vector<64x256xf32> -> vector<64x256xf32>
    %c0_37 = arith.constant 0 : index
    %c0_38 = arith.constant 0 : index
    %45 = vector.load %arg16[%c0_37, %c0_38] : memref<1x256xf32, #tpu.memory_space<vmem>>, vector<1x256xf32>
    %46 = vector.broadcast %45 : vector<1x256xf32> to vector<64x256xf32>
    %47 = arith.addf %44, %46 : vector<64x256xf32>
    %cst_39 = arith.constant 0.000000e+00 : f32
    %48 = vector.broadcast %cst_39 : f32 to vector<64x256xf32>
    %49 = arith.cmpf oge, %47, %48 : vector<64x256xf32>
    %cst_40 = arith.constant 0.00999999977 : f32
    %50 = vector.broadcast %cst_40 : f32 to vector<64x256xf32>
    %51 = arith.mulf %50, %47 : vector<64x256xf32>
    %52 = arith.select %49, %47, %51 : vector<64x256xi1>, vector<64x256xf32>
    %53 = arith.truncf %52 : vector<64x256xf32> to vector<64x256xbf16>
    %54 = vector.shape_cast %53 : vector<64x256xbf16> to vector<4x16x256xbf16>
    %c0_41 = arith.constant 0 : index
    %c0_42 = arith.constant 0 : index
    %c0_43 = arith.constant 0 : index
    %55 = vector.load %arg22[%c0_41, %c0_42, %c0_43] : memref<4x16x256xbf16, #tpu.memory_space<vmem>>, vector<4x16x256xbf16>
    tpu.vector_store %arg22[%c0_41, %c0_42, %c0_43], %54 {strides = array<i32>} : memref<4x16x256xbf16, #tpu.memory_space<vmem>>, vector<4x16x256xbf16>,
    %56 = vector.extract_strided_slice %24 {offsets = [0, 0], sizes = [48, 384], strides = [1, 1]} : vector<64x384xbf16> to vector<48x384xbf16>
    %c0_44 = arith.constant 0 : index
    %c0_45 = arith.constant 0 : index
    %57 = vector.load %arg6[%c0_44, %c0_45] : memref<384x384xbf16, #tpu.memory_space<vmem>>, vector<384x384xbf16>
    %cst_46 = arith.constant dense<0.000000e+00> : vector<48x384xf32>
    %58 = tpu.matmul %56, %57, %cst_46 {dimension_numbers = #tpu.dot_dimension_numbers<[1], [0], [0], [1], [0, 0, 1, 1], [], []>} : vector<48x384xbf16>, vector<384x384xbf16>, vector<48x384xf32> -> vector<48x384xf32>
    %59 = vector.extract_strided_slice %24 {offsets = [16, 0], sizes = [48, 384], strides = [1, 1]} : vector<64x384xbf16> to vector<48x384xbf16>
    %c0_47 = arith.constant 0 : index
    %c0_48 = arith.constant 0 : index
    %60 = vector.load %arg7[%c0_47, %c0_48] : memref<384x384xbf16, #tpu.memory_space<vmem>>, vector<384x384xbf16>
    %cst_49 = arith.constant dense<0.000000e+00> : vector<48x384xf32>
    %61 = tpu.matmul %59, %60, %cst_49 {dimension_numbers = #tpu.dot_dimension_numbers<[1], [0], [0], [1], [0, 0, 1, 1], [], []>} : vector<48x384xbf16>, vector<384x384xbf16>, vector<48x384xf32> -> vector<48x384xf32>
    %62 = arith.addf %58, %61 : vector<48x384xf32>
    %c0_50 = arith.constant 0 : index
    %c0_51 = arith.constant 0 : index
    %63 = vector.load %arg14[%c0_50, %c0_51] : memref<1x384xf32, #tpu.memory_space<vmem>>, vector<1x384xf32>
    %64 = vector.broadcast %63 : vector<1x384xf32> to vector<48x384xf32>
    %65 = arith.addf %62, %64 : vector<48x384xf32>
    %cst_52 = arith.constant 0.000000e+00 : f32
    %66 = vector.broadcast %cst_52 : f32 to vector<48x384xf32>
    %67 = arith.cmpf oge, %65, %66 : vector<48x384xf32>
    %cst_53 = arith.constant 0.00999999977 : f32
    %68 = vector.broadcast %cst_53 : f32 to vector<48x384xf32>
    %69 = arith.mulf %68, %65 : vector<48x384xf32>
    %70 = arith.select %67, %65, %69 : vector<48x384xi1>, vector<48x384xf32>
    %71 = arith.truncf %70 : vector<48x384xf32> to vector<48x384xbf16>
    %72 = vector.shape_cast %71 : vector<48x384xbf16> to vector<3x16x384xbf16>
    %c0_54 = arith.constant 0 : index
    %c0_55 = arith.constant 0 : index
    %c0_56 = arith.constant 0 : index
    %73 = vector.load %arg20[%c0_54, %c0_55, %c0_56] : memref<3x16x384xbf16, #tpu.memory_space<vmem>>, vector<3x16x384xbf16>
    tpu.vector_store %arg20[%c0_54, %c0_55, %c0_56], %72 {strides = array<i32>} : memref<3x16x384xbf16, #tpu.memory_space<vmem>>, vector<3x16x384xbf16>,
    %74 = vector.extract_strided_slice %25 {offsets = [0, 0], sizes = [48, 384], strides = [1, 1]} : vector<64x384xbf16> to vector<48x384xbf16>
    %c0_57 = arith.constant 0 : index
    %c0_58 = arith.constant 0 : index
    %75 = vector.load %arg8[%c0_57, %c0_58] : memref<384x384xbf16, #tpu.memory_space<vmem>>, vector<384x384xbf16>
    %cst_59 = arith.constant dense<0.000000e+00> : vector<48x384xf32>
    %76 = tpu.matmul %74, %75, %cst_59 {dimension_numbers = #tpu.dot_dimension_numbers<[1], [0], [0], [1], [0, 0, 1, 1], [], []>} : vector<48x384xbf16>, vector<384x384xbf16>, vector<48x384xf32> -> vector<48x384xf32>
    %77 = vector.extract_strided_slice %25 {offsets = [16, 0], sizes = [48, 384], strides = [1, 1]} : vector<64x384xbf16> to vector<48x384xbf16>
    %c0_60 = arith.constant 0 : index
    %c0_61 = arith.constant 0 : index
    %78 = vector.load %arg9[%c0_60, %c0_61] : memref<384x384xbf16, #tpu.memory_space<vmem>>, vector<384x384xbf16>
    %cst_62 = arith.constant dense<0.000000e+00> : vector<48x384xf32>
    %79 = tpu.matmul %77, %78, %cst_62 {dimension_numbers = #tpu.dot_dimension_numbers<[1], [0], [0], [1], [0, 0, 1, 1], [], []>} : vector<48x384xbf16>, vector<384x384xbf16>, vector<48x384xf32> -> vector<48x384xf32>
    %80 = arith.addf %76, %79 : vector<48x384xf32>
    %c0_63 = arith.constant 0 : index
    %c0_64 = arith.constant 0 : index
    %81 = vector.load %arg15[%c0_63, %c0_64] : memref<1x384xf32, #tpu.memory_space<vmem>>, vector<1x384xf32>
    %82 = vector.broadcast %81 : vector<1x384xf32> to vector<48x384xf32>
    %83 = arith.addf %80, %82 : vector<48x384xf32>
    %cst_65 = arith.constant 0.000000e+00 : f32
    %84 = vector.broadcast %cst_65 : f32 to vector<48x384xf32>
    %85 = arith.cmpf oge, %83, %84 : vector<48x384xf32>
    %cst_66 = arith.constant 0.00999999977 : f32
    %86 = vector.broadcast %cst_66 : f32 to vector<48x384xf32>
    %87 = arith.mulf %86, %83 : vector<48x384xf32>
    %88 = arith.select %85, %83, %87 : vector<48x384xi1>, vector<48x384xf32>
    %89 = arith.truncf %88 : vector<48x384xf32> to vector<48x384xbf16>
    %90 = vector.shape_cast %89 : vector<48x384xbf16> to vector<3x16x384xbf16>
    %c0_67 = arith.constant 0 : index
    %c0_68 = arith.constant 0 : index
    %c0_69 = arith.constant 0 : index
    %91 = vector.load %arg21[%c0_67, %c0_68, %c0_69] : memref<3x16x384xbf16, #tpu.memory_space<vmem>>, vector<3x16x384xbf16>
    tpu.vector_store %arg21[%c0_67, %c0_68, %c0_69], %90 {strides = array<i32>} : memref<3x16x384xbf16, #tpu.memory_space<vmem>>, vector<3x16x384xbf16>,
    return
  }
  func.func @transform_0(%arg0: i32) -> (i32, i32, i32) {
    %c0_i32 = arith.constant 0 : i32
    %c0_i32_0 = arith.constant 0 : i32
    %c0_i32_1 = arith.constant 0 : i32
    return %c0_i32, %arg0, %c0_i32_0 : i32, i32, i32
  }
  func.func @transform_1(%arg0: i32) -> (i32, i32, i32) {
    %c0_i32 = arith.constant 0 : i32
    %c0_i32_0 = arith.constant 0 : i32
    %c0_i32_1 = arith.constant 0 : i32
    return %c0_i32, %arg0, %c0_i32_0 : i32, i32, i32
  }
  func.func @transform_2(%arg0: i32) -> (i32, i32) {
    %c0_i32 = arith.constant 0 : i32
    %c0_i32_0 = arith.constant 0 : i32
    %c0_i32_1 = arith.constant 0 : i32
    return %c0_i32, %c0_i32_0 : i32, i32
  }
  func.func @transform_3(%arg0: i32) -> (i32, i32) {
    %c0_i32 = arith.constant 0 : i32
    %c0_i32_0 = arith.constant 0 : i32
    %c0_i32_1 = arith.constant 0 : i32
    return %c0_i32, %c0_i32_0 : i32, i32
  }
  func.func @transform_4(%arg0: i32) -> (i32, i32) {
    %c0_i32 = arith.constant 0 : i32
    %c0_i32_0 = arith.constant 0 : i32
    %c0_i32_1 = arith.constant 0 : i32
    return %c0_i32, %c0_i32_0 : i32, i32
  }
  func.func @transform_5(%arg0: i32) -> (i32, i32) {
    %c0_i32 = arith.constant 0 : i32
    %c0_i32_0 = arith.constant 0 : i32
    %c0_i32_1 = arith.constant 0 : i32
    return %c0_i32, %c0_i32_0 : i32, i32
  }
  func.func @transform_6(%arg0: i32) -> (i32, i32) {
    %c0_i32 = arith.constant 0 : i32
    %c0_i32_0 = arith.constant 0 : i32
    %c0_i32_1 = arith.constant 0 : i32
    return %c0_i32, %c0_i32_0 : i32, i32
  }
  func.func @transform_7(%arg0: i32) -> (i32, i32) {
    %c0_i32 = arith.constant 0 : i32
    %c0_i32_0 = arith.constant 0 : i32
    %c0_i32_1 = arith.constant 0 : i32
    return %c0_i32, %c0_i32_0 : i32, i32
  }
  func.func @transform_8(%arg0: i32) -> (i32, i32) {
    %c0_i32 = arith.constant 0 : i32
    %c0_i32_0 = arith.constant 0 : i32
    %c0_i32_1 = arith.constant 0 : i32
    return %c0_i32, %c0_i32_0 : i32, i32
  }
  func.func @transform_9(%arg0: i32) -> (i32, i32) {
    %c0_i32 = arith.constant 0 : i32
    %c0_i32_0 = arith.constant 0 : i32
    %c0_i32_1 = arith.constant 0 : i32
    return %c0_i32, %c0_i32_0 : i32, i32
  }
  func.func @transform_10(%arg0: i32) -> (i32, i32) {
    %c0_i32 = arith.constant 0 : i32
    %c0_i32_0 = arith.constant 0 : i32
    %c0_i32_1 = arith.constant 0 : i32
    return %c0_i32, %c0_i32_0 : i32, i32
  }
  func.func @transform_11(%arg0: i32) -> (i32, i32) {
    %c0_i32 = arith.constant 0 : i32
    %c0_i32_0 = arith.constant 0 : i32
    %c0_i32_1 = arith.constant 0 : i32
    return %c0_i32, %c0_i32_0 : i32, i32
  }
  func.func @transform_12(%arg0: i32) -> (i32, i32) {
    %c0_i32 = arith.constant 0 : i32
    %c0_i32_0 = arith.constant 0 : i32
    %c0_i32_1 = arith.constant 0 : i32
    return %c0_i32, %c0_i32_0 : i32, i32
  }
  func.func @transform_13(%arg0: i32) -> (i32, i32) {
    %c0_i32 = arith.constant 0 : i32
    %c0_i32_0 = arith.constant 0 : i32
    %c0_i32_1 = arith.constant 0 : i32
    return %c0_i32, %c0_i32_0 : i32, i32
  }
  func.func @transform_14(%arg0: i32) -> (i32, i32) {
    %c0_i32 = arith.constant 0 : i32
    %c0_i32_0 = arith.constant 0 : i32
    %c0_i32_1 = arith.constant 0 : i32
    return %c0_i32, %c0_i32_0 : i32, i32
  }
  func.func @transform_15(%arg0: i32) -> (i32, i32) {
    %c0_i32 = arith.constant 0 : i32
    %c0_i32_0 = arith.constant 0 : i32
    %c0_i32_1 = arith.constant 0 : i32
    return %c0_i32, %c0_i32_0 : i32, i32
  }
  func.func @transform_16(%arg0: i32) -> (i32, i32, i32) {
    %c0_i32 = arith.constant 0 : i32
    %c0_i32_0 = arith.constant 0 : i32
    %c0_i32_1 = arith.constant 0 : i32
    return %c0_i32, %arg0, %c0_i32_0 : i32, i32, i32
  }
  func.func @transform_17(%arg0: i32) -> (i32, i32, i32) {
    %c0_i32 = arith.constant 0 : i32
    %c0_i32_0 = arith.constant 0 : i32
    %c0_i32_1 = arith.constant 0 : i32
    return %c0_i32, %arg0, %c0_i32_0 : i32, i32, i32
  }
  func.func @transform_18(%arg0: i32) -> (i32, i32, i32) {
    %c0_i32 = arith.constant 0 : i32
    %c0_i32_0 = arith.constant 0 : i32
    %c0_i32_1 = arith.constant 0 : i32
    return %c0_i32, %arg0, %c0_i32_0 : i32, i32, i32
  }
  func.func @transform_19(%arg0: i32) -> (i32, i32, i32) {
    %c0_i32 = arith.constant 0 : i32
    %c0_i32_0 = arith.constant 0 : i32
    %c0_i32_1 = arith.constant 0 : i32
    return %c0_i32, %arg0, %c0_i32_0 : i32, i32, i32
  }
  func.func @transform_20(%arg0: i32) -> (i32, i32, i32) {
    %c0_i32 = arith.constant 0 : i32
    %c0_i32_0 = arith.constant 0 : i32
    %c0_i32_1 = arith.constant 0 : i32
    return %c0_i32, %arg0, %c0_i32_0 : i32, i32, i32
  }
  func.func @transform_21(%arg0: i32) -> (i32, i32, i32) {
    %c0_i32 = arith.constant 0 : i32
    %c0_i32_0 = arith.constant 0 : i32
    %c0_i32_1 = arith.constant 0 : i32
    return %c0_i32, %arg0, %c0_i32_0 : i32, i32, i32
  }
}

</mosaic_0001>

<bundles_post_ra>
// kernel: _lambda_.1
= control target key start
LH: loop header
LB: loop body
LE: loop exit
PB: predicated region body
PF: predicated region fallthrough
CT: control target
= control target key end

     0   :  { %s11137_s0 = inlined_call_operand.vmem [shape: bf16[4,16,256], index: 0, kind: input, shape index: {}]   ;;  %s11138_s1 = inlined_call_operand.vmem [shape: bf16[4,16,256], index: 1, kind: input, shape index: {}]   ;;  %s11139_s2 = inlined_call_operand.hbm [shape: bf16[256,384], index: 2, kind: input, shape index: {}]   ;;  %s11140_s3 = inlined_call_operand.hbm [shape: bf16[256,384], index: 3, kind: input, shape index: {}]   ;;  %s11141_s4 = inlined_call_operand.hbm [shape: bf16[384,256], index: 4, kind: input, shape index: {}]   ;;  %s11142_s5 = inlined_call_operand.hbm [shape: bf16[384,384], index: 5, kind: input, shape index: {}]   ;;  %s11143_s6 = inlined_call_operand.vmem [shape: bf16[384,384], index: 6, kind: input, shape index: {}]   ;;  %s11144_s7 = inlined_call_operand.vmem [shape: bf16[384,384], index: 7, kind: input, shape index: {}]   ;;  %s11145_s8 = inlined_call_operand.vmem [shape: bf16[384,384], index: 8, kind: input, shape index: {}]   ;;  %s11146_s9 = inlined_call_operand.hbm [shape: bf16[384,256], index: 9, kind: input, shape index: {}]   ;;  %s11147_s10 = inlined_call_operand.vmem [shape: f32[1,384], index: 10, kind: input, shape index: {}]   ;;  %s11148_s11 = inlined_call_operand.vmem [shape: f32[1,384], index: 11, kind: input, shape index: {}]   ;;  %s11149_s12 = inlined_call_operand.vmem [shape: f32[1,256], index: 12, kind: input, shape index: {}]   ;;  %s11150_s13 = inlined_call_operand.vmem [shape: f32[1,384], index: 13, kind: input, shape index: {}]   ;;  %s11151_s14 = inlined_call_operand.vmem [shape: f32[1,384], index: 14, kind: input, shape index: {}]   ;;  %s11152_s15 = inlined_call_operand.vmem [shape: f32[1,256], index: 15, kind: input, shape index: {}]   ;;  %s11153_s16 = inlined_call_operand.vmem [shape: bf16[4,16,384], index: 16, kind: output, shape index: {0}]   ;;  %s11154_s17 = inlined_call_operand.vmem [shape: bf16[4,16,384], index: 17, kind: output, shape index: {1}]   ;;  %s11155_s18 = inlined_call_operand.vmem [shape: bf16[4,16,256], index: 18, kind: output, shape index: {2}]   ;;  %s11156_s19 = inlined_call_operand.vmem [shape: bf16[3,16,384], index: 19, kind: output, shape index: {3}]   ;;  %s11157_s20 = inlined_call_operand.vmem [shape: bf16[3,16,384], index: 20, kind: output, shape index: {4}]   ;;  %s11158_s21 = inlined_call_operand.vmem [shape: bf16[4,16,256], index: 21, kind: output, shape index: {5}]  }
   0x1   :  { %11171 = sst [smem:[#allocation17_spill]] %s11137_s0 }
   0x2   :  { %11172 = sst [smem:[#allocation18_spill]] %s11138_s1 }
   0x3   :  { %11173 = sst [smem:[#allocation19_spill]] %s11139_s2 }
   0x4   :  { %11174 = sst [smem:[#allocation20_spill]] %s11140_s3 }
   0x5   :  { %11175 = sst [smem:[#allocation21_spill]] %s11141_s4 }
   0x6   :  { %11176 = sst [smem:[#allocation22_spill]] %s11142_s5 }
   0x7   :  { %11177 = sst [smem:[#allocation23_spill]] %s11150_s13 }
   0x8   :  { %11178 = sst [smem:[#allocation24_spill]] %s11151_s14 }
   0x9   :  { %11179 = sst [smem:[#allocation25_spill]] %s11156_s19 }
   0xa   :  { %11180 = sst [smem:[#allocation26_spill]] %s11157_s20 }
   0xb   :  { %27 = vsyncpa [#allocation3], 0 }
   0xc   :  { %28 = vsyncpa [#allocation5], 0 }
   0xd   :  { %29 = vsyncpa [#allocation8], 0  ;;  %s11181_s26 = sld [smem:[#allocation20_spill]]  ;;  %s8271_s3 = smov [#allocation4]  }
   0xe   :  { %s53_s28 = sshll.u32 %s8271_s3, 4  ;;  %s11182_s4 = sld [smem:[#allocation22_spill]]  ;;  %s54_s28 = int_to_ptr.vmem [resolvable:$true] %s53_s28 }
   0xf   :  { %s8272_s5 = smov 192   ;;  %s8273_s22 = smov 12  }
  0x10   :  { %s8274_s23 = smov [#allocation7]   ;;  %s11183_s14 = sld [smem:[#allocation19_spill]] }
  0x11   :  { %s79_s1 = sshll.u32 %s8274_s23, 4  ;;  %s8275_s13 = smov [#allocation2]   ;;  %s80_s1 = int_to_ptr.vmem [resolvable:$true] %s79_s1 }
  0x12   :  { %s40_s29 = sshll.u32 %s8275_s13, 4  ;;  %s8277_s0 = smov 128   ;;  %s41_s29 = int_to_ptr.vmem [resolvable:$true] %s40_s29 }
  0x13   :  { %s51_s27 = sshll.u32 %s11181_s26, 4  ;;  %s11184_s26 = sld [smem:[#allocation21_spill]]  ;;  %s52_s27 = int_to_ptr.hbm [resolvable:$true] %s51_s27 }
  0x14   :  { %s77_s30 = sshll.u32 %s11182_s4, 4  ;;  %s8278_s4 = smov 8   ;;  %s78_s30 = int_to_ptr.hbm [resolvable:$true] %s77_s30 }
  0x15   :  { %59 = dma.hbm_to_vmem [thread:$0]  %s52_s27, 6144, %s54_s28, [#allocation5], %s8272_s5, %s8272_s5, %s8273_s22  }
  0x16   :  { %s38_s19 = sshll.u32 %s11183_s14, 4  ;;  %s8276_s27 = smov [#allocation6]   ;;  %s39_s19 = int_to_ptr.hbm [resolvable:$true] %s38_s19 }
  0x17   :  { %85 = dma.hbm_to_vmem [thread:$0]  %s78_s30, 9216, %s80_s1, [#allocation8], %s8272_s5, %s8272_s5, %s8273_s22  }
  0x18   :  { %46 = dma.hbm_to_vmem [thread:$0]  %s39_s19, 6144, %s41_s29, [#allocation3], %s8272_s5, %s8272_s5, %s8273_s22  }
  0x19   :  { %s64_s3 = sshll.u32 %s11184_s26, 4  ;;  %s66_s28 = sshll.u32 %s8276_s27, 4  ;;  %s65_s3 = int_to_ptr.hbm [resolvable:$true] %s64_s3  ;;  %s67_s28 = int_to_ptr.vmem [resolvable:$true] %s66_s28 }
  0x1a   :  { %72 = dma.hbm_to_vmem [thread:$0]  %s65_s3, 6144, %s67_s28, [#allocation5], %s8277_s0, %s8277_s0, %s8278_s4  }
  0x1b   :  { %s96_s23 = sshll.u32 %s11146_s9, 4  ;;  %s8279_s30 = smov [#allocation9]   ;;  %s97_s23 = int_to_ptr.hbm [resolvable:$true] %s96_s23 }
  0x1c   :  { %s98_s1 = sshll.u32 %s8279_s30, 4  ;;  %s99_s1 = int_to_ptr.vmem [resolvable:$true] %s98_s1 }
  0x1d   :  { %104 = dma.hbm_to_vmem [thread:$0]  %s97_s23, 6144, %s99_s1, [#allocation8], %s8277_s0, %s8277_s0, %s8278_s4  }
  0x1e   :  { %8265 = dma.done.wait [#allocation3], 6144  }
  0x1f   :  { %8266 = vsyncadd [#allocation3], 4294961152 }
  0x20   :  { %8267 = dma.done.wait [#allocation5], 12288  }
  0x21   :  { %8268 = vsyncadd [#allocation5], 4294955008 }
  0x22   :  { %8269 = dma.done.wait [#allocation8], 15360  }
  0x23   :  { %8270 = vsyncadd [#allocation8], 4294951936  ;;  %v5774_v0 = vld [vmem:[#allocation2 + $0xa8] sm:$0xf]  ;;  %v7678_v1 = vld [vmem:[#allocation2 + $0xb0] sm:$0xf0] }
  0x24   :  { %v5870_v2 = vld [vmem:[#allocation2 + $0x168] sm:$0xf]  ;;  %v5775_v3 = vor.u32 %v7678_v1, %v5774_v0  ;;  %v7702_v4 = vld [vmem:[#allocation2 + $0x170] sm:$0xf0]  ;;  %v7677_v5 = vld [vmem:[#allocation2 + $0xac] sm:$0xf] }
  0x25   :  { %v5776_v6 = vld [vmem:[#allocation2 + $0xb4] sm:$0xf0]  ;;  %v5871_v7 = vor.u32 %v7702_v4, %v5870_v2  ;;  %v7701_v9 = vld [vmem:[#allocation2 + $0x16c] sm:$0xf]  ;;  %v5762_v11 = vld [vmem:[#allocation2 + $0x90] sm:$0xf] }
  0x26   :  { %v5779_v8 = vor.u32 %v7677_v5, %v5776_v6  ;;  %v5872_v10 = vld [vmem:[#allocation2 + $0x174] sm:$0xf0]  ;;  %521 = vmatpush.bf16.msra.mxu0 %v5775_v3  ;;  %v7675_v13 = vld [vmem:[#allocation2 + $0x98] sm:$0xf0]  ;;  %v5858_v14 = vld [vmem:[#allocation2 + $0x150] sm:$0xf] }
  0x27   :  { %v5875_v12 = vor.u32 %v7701_v9, %v5872_v10  ;;  %v7699_v15 = vld [vmem:[#allocation2 + $0x158] sm:$0xf0]  ;;  %550 = vmatpush.bf16.msra.mxu1 %v5871_v7  ;;  %v5763_v16 = vor.u32 %v7675_v13, %v5762_v11  ;;  %v7674_v18 = vld [vmem:[#allocation2 + $0x94] sm:$0xf]  ;;  %v5764_v19 = vld [vmem:[#allocation2 + $0x9c] sm:$0xf0] }
  0x28   :  { %579 = vmatpush.bf16.msra.mxu2 %v5779_v8  ;;  %v5859_v17 = vor.u32 %v7699_v15, %v5858_v14  ;;  %v7698_v20 = vld [vmem:[#allocation2 + $0x154] sm:$0xf]  ;;  %v5767_v21 = vor.u32 %v7674_v18, %v5764_v19  ;;  %v5860_v22 = vld [vmem:[#allocation2 + $0x15c] sm:$0xf0]  ;;  %v5750_v23 = vld [vmem:[#allocation2 + $0x78] sm:$0xf] }
  0x29   :  { %608 = vmatpush.bf16.msra.mxu3 %v5875_v12  ;;  %v7672_v24 = vld [vmem:[#allocation2 + $0x80] sm:$0xf0]  ;;  %v5863_v25 = vor.u32 %v7698_v20, %v5860_v22  ;;  %v5846_v26 = vld [vmem:[#allocation2 + $0x138] sm:$0xf]  ;;  %v7671_v28 = vld [vmem:[#allocation2 + $0x7c] sm:$0xf] }
  0x2a   :  { %v7696_v27 = vld [vmem:[#allocation2 + $0x140] sm:$0xf0]  ;;  %522 = vmatpush.bf16.msra.mxu0 %v5763_v16  ;;  %v5751_v29 = vor.u32 %v7672_v24, %v5750_v23  ;;  %v5752_v30 = vld [vmem:[#allocation2 + $0x84] sm:$0xf0]  ;;  %v7695_v31 = vld [vmem:[#allocation2 + $0x13c] sm:$0xf] }
  0x2b   :  { %v5848_v32 = vld [vmem:[#allocation2 + $0x144] sm:$0xf0]  ;;  %551 = vmatpush.bf16.msra.mxu1 %v5859_v17  ;;  %v5847_v33 = vor.u32 %v7696_v27, %v5846_v26  ;;  %v5755_v34 = vor.u32 %v7671_v28, %v5752_v30  ;;  %v5738_v35 = vld [vmem:[#allocation2 + $0x60] sm:$0xf]  ;;  %v7669_v36 = vld [vmem:[#allocation2 + $0x68] sm:$0xf0] }
  0x2c   :  { %580 = vmatpush.bf16.msra.mxu2 %v5767_v21  ;;  %v5834_v37 = vld [vmem:[#allocation2 + $0x120] sm:$0xf]  ;;  %v5851_v38 = vor.u32 %v7695_v31, %v5848_v32  ;;  %v7693_v39 = vld [vmem:[#allocation2 + $0x128] sm:$0xf0]  ;;  %v7668_v40 = vld [vmem:[#allocation2 + $0x64] sm:$0xf]  ;;  %v5739_v44 = vor.u32 %v7669_v36, %v5738_v35 }
  0x2d   :  { %609 = vmatpush.bf16.msra.mxu3 %v5863_v25  ;;  %v5740_v41 = vld [vmem:[#allocation2 + $0x6c] sm:$0xf0]  ;;  %v7692_v42 = vld [vmem:[#allocation2 + $0x124] sm:$0xf]  ;;  %v5835_v45 = vor.u32 %v7693_v39, %v5834_v37  ;;  %v5726_v47 = vld [vmem:[#allocation2 + $0x48] sm:$0xf] }
  0x2e   :  { %v5836_v43 = vld [vmem:[#allocation2 + $0x12c] sm:$0xf0]  ;;  %523 = vmatpush.bf16.msra.mxu0 %v5751_v29  ;;  %v5743_v46 = vor.u32 %v7668_v40, %v5740_v41  ;;  %v7666_v48 = vld [vmem:[#allocation2 + $0x50] sm:$0xf0]  ;;  %v5822_v49 = vld [vmem:[#allocation2 + $0x108] sm:$0xf] }
  0x2f   :  { %552 = vmatpush.bf16.msra.mxu1 %v5847_v33  ;;  %v5839_v50 = vor.u32 %v7692_v42, %v5836_v43  ;;  %v7690_v51 = vld [vmem:[#allocation2 + $0x110] sm:$0xf0]  ;;  %v7665_v52 = vld [vmem:[#allocation2 + $0x4c] sm:$0xf]  ;;  %v5728_v53 = vld [vmem:[#allocation2 + $0x54] sm:$0xf0]  ;;  %v5727_v56 = vor.u32 %v7666_v48, %v5726_v47 }
  0x30   :  { %581 = vmatpush.bf16.msra.mxu2 %v5755_v34  ;;  %v7689_v54 = vld [vmem:[#allocation2 + $0x10c] sm:$0xf]  ;;  %v5824_v55 = vld [vmem:[#allocation2 + $0x114] sm:$0xf0]  ;;  %v5823_v57 = vor.u32 %v7690_v51, %v5822_v49  ;;  %v5731_v58 = vor.u32 %v7665_v52, %v5728_v53  ;;  %v5714_v59 = vld [vmem:[#allocation2 + $0x30] sm:$0xf] }
  0x31   :  { %610 = vmatpush.bf16.msra.mxu3 %v5851_v38  ;;  %v7663_v60 = vld [vmem:[#allocation2 + $0x38] sm:$0xf0]  ;;  %v5810_v61 = vld [vmem:[#allocation2 + $0xf0] sm:$0xf]  ;;  %v5827_v62 = vor.u32 %v7689_v54, %v5824_v55  ;;  %v7662_v0 = vld [vmem:[#allocation2 + $0x34] sm:$0xf] }
  0x32   :  { %524 = vmatpush.bf16.msra.mxu0 %v5739_v44  ;;  %v7687_v63 = vld [vmem:[#allocation2 + $0xf8] sm:$0xf0]  ;;  %v5716_v1 = vld [vmem:[#allocation2 + $0x3c] sm:$0xf0]  ;;  %v7686_v2 = vld [vmem:[#allocation2 + $0xf4] sm:$0xf]  ;;  %v5715_v4 = vor.u32 %v7663_v60, %v5714_v59 }
  0x33   :  { %553 = vmatpush.bf16.msra.mxu1 %v5835_v45  ;;  %v5812_v3 = vld [vmem:[#allocation2 + $0xfc] sm:$0xf0]  ;;  %v5811_v5 = vor.u32 %v7687_v63, %v5810_v61  ;;  %v5719_v6 = vor.u32 %v7662_v0, %v5716_v1  ;;  %v5702_v7 = vld [vmem:[#allocation2 + $0x18] sm:$0xf]  ;;  %v7660_v8 = vld [vmem:[#allocation2 + $0x20] sm:$0xf0] }
  0x34   :  { %582 = vmatpush.bf16.msra.mxu2 %v5743_v46  ;;  %v5798_v9 = vld [vmem:[#allocation2 + $0xd8] sm:$0xf]  ;;  %v5815_v10 = vor.u32 %v7686_v2, %v5812_v3  ;;  %v7684_v11 = vld [vmem:[#allocation2 + $0xe0] sm:$0xf0]  ;;  %v7659_v12 = vld [vmem:[#allocation2 + $0x1c] sm:$0xf]  ;;  %v5703_v16 = vor.u32 %v7660_v8, %v5702_v7 }
  0x35   :  { %611 = vmatpush.bf16.msra.mxu3 %v5839_v50  ;;  %v5704_v13 = vld [vmem:[#allocation2 + $0x24] sm:$0xf0]  ;;  %v7683_v14 = vld [vmem:[#allocation2 + $0xdc] sm:$0xf]  ;;  %v5690_v17 = vld [vmem:[#allocation2] sm:$0xf]  ;;  %v5799_v19 = vor.u32 %v7684_v11, %v5798_v9 }
  0x36   :  { %525 = vmatpush.bf16.msra.mxu0 %v5727_v56  ;;  %v5800_v15 = vld [vmem:[#allocation2 + $0xe4] sm:$0xf0]  ;;  %v7657_v18 = vld [vmem:[#allocation2 + $0x8] sm:$0xf0]  ;;  %v5707_v20 = vor.u32 %v7659_v12, %v5704_v13  ;;  %v5786_v21 = vld [vmem:[#allocation2 + $0xc0] sm:$0xf] }
  0x37   :  { %554 = vmatpush.bf16.msra.mxu1 %v5823_v57  ;;  %v7681_v22 = vld [vmem:[#allocation2 + $0xc8] sm:$0xf0]  ;;  %v7656_v23 = vld [vmem:[#allocation2 + $0x4] sm:$0xf]  ;;  %v5803_v24 = vor.u32 %v7683_v14, %v5800_v15  ;;  %v5692_v25 = vld [vmem:[#allocation2 + $0xc] sm:$0xf0]  ;;  %v5691_v31 = vor.u32 %v7657_v18, %v5690_v17 }
  0x38   :  { %583 = vmatpush.bf16.msra.mxu2 %v5731_v58  ;;  %v7680_v26 = vld [vmem:[#allocation2 + $0xc4] sm:$0xf]  ;;  %v5788_v27 = vld [vmem:[#allocation2 + $0xcc] sm:$0xf0]  ;;  %s11185_s19 = sld [smem:[#allocation17_spill]]  ;;  %v5787_v35 = vor.u32 %v7681_v22, %v5786_v21  ;;  %v5695_v36 = vor.u32 %v7656_v23, %v5692_v25 }
  0x39   :  { %612 = vmatpush.bf16.msra.mxu3 %v5827_v62  ;;  %v5782_v29 = vld [vmem:[#allocation2 + $0xb0] sm:$0xf]  ;;  %v7679_v30 = vld [vmem:[#allocation2 + $0xb8] sm:$0xf0]  ;;  %v5791_v39 = vor.u32 %v7680_v26, %v5788_v27  ;;  %v5770_v41 = vld [vmem:[#allocation2 + $0x98] sm:$0xf] }
  0x3a   :  { %526 = vmatpush.bf16.msra.mxu0 %v5715_v4  ;;  %v5878_v33 = vld [vmem:[#allocation2 + $0x170] sm:$0xf]  ;;  %v7703_v34 = vld [vmem:[#allocation2 + $0x178] sm:$0xf0]  ;;  %v5783_v40 = vor.u32 %v7679_v30, %v5782_v29  ;;  %v5998_v42 = vld [vmem:[#allocation4 + $0xa8] sm:$0xf] }
  0x3b   :  { %555 = vmatpush.bf16.msra.mxu1 %v5811_v5  ;;  %v7726_v43 = vld [vmem:[#allocation4 + $0xb0] sm:$0xf0]  ;;  %v5879_v45 = vor.u32 %v7703_v34, %v5878_v33  ;;  %v7676_v46 = vld [vmem:[#allocation2 + $0xa0] sm:$0xf0]  ;;  %v6094_v47 = vld [vmem:[#allocation4 + $0x168] sm:$0xf] }
  0x3c   :  { %584 = vmatpush.bf16.msra.mxu2 %v5719_v6  ;;  %v7750_v48 = vld [vmem:[#allocation4 + $0x170] sm:$0xf0]  ;;  %v5866_v50 = vld [vmem:[#allocation2 + $0x158] sm:$0xf]  ;;  %v7700_v51 = vld [vmem:[#allocation2 + $0x160] sm:$0xf0]  ;;  %v5999_v52 = vor.u32 %v7726_v43, %v5998_v42  ;;  %v5771_v53 = vor.u32 %v7676_v46, %v5770_v41 }
  0x3d   :  { %613 = vmatpush.bf16.msra.mxu3 %v5815_v10  ;;  %v5758_v54 = vld [vmem:[#allocation2 + $0x80] sm:$0xf]  ;;  %v6095_v55 = vor.u32 %v7750_v48, %v6094_v47  ;;  %v5986_v56 = vld [vmem:[#allocation4 + $0x90] sm:$0xf]  ;;  %v7723_v57 = vld [vmem:[#allocation4 + $0x98] sm:$0xf0]  ;;  %v5867_v58 = vor.u32 %v7700_v51, %v5866_v50 }
  0x3e   :  { %v5658_v28 = vld [vmem:[%s11185_s19] sm:$0xf]  ;;  %527 = vmatpush.bf16.msra.mxu0 %v5703_v16  ;;  %v7641_v32 = vld [vmem:[%s11185_s19 + $0x4] sm:$0xf0]  ;;  %v7640_v37 = vld [vmem:[%s11185_s19 + $0x4] sm:$0xf]  ;;  %v5987_v0 = vor.u32 %v7723_v57, %v5986_v56 }
  0x3f   :  { %556 = vmatpush.bf16.msra.mxu1 %v5799_v19  ;;  %v5660_v38 = vld [vmem:[%s11185_s19 + $0x8] sm:$0xf0]  ;;  %v8417_v44 = vor.u32 %v7641_v32, %v5658_v28  ;;  %v6082_v60 = vld [vmem:[#allocation4 + $0x150] sm:$0xf]  ;;  %v7747_v61 = vld [vmem:[#allocation4 + $0x158] sm:$0xf0] }
  0x40   :  { %585 = vmatpush.bf16.msra.mxu2 %v5707_v20  ;;  %v8419_v49 = vor.u32 %v7640_v37, %v5660_v38  ;;  %v7673_v59 = vld [vmem:[#allocation2 + $0x88] sm:$0xf0]  ;;  %v5854_v62 = vld [vmem:[#allocation2 + $0x140] sm:$0xf]  ;;  %v5746_v2 = vld [vmem:[#allocation2 + $0x68] sm:$0xf]  ;;  %v6083_v3 = vor.u32 %v7747_v61, %v6082_v60 }
  0x41   :  { %614 = vmatpush.bf16.msra.mxu3 %v5803_v24  ;;  %v7697_v63 = vld [vmem:[#allocation2 + $0x148] sm:$0xf0]  ;;  %v5759_v1 = vor.u32 %v7673_v59, %v5758_v54  ;;  %v5974_v4 = vld [vmem:[#allocation4 + $0x78] sm:$0xf]  ;;  %v7720_v5 = vld [vmem:[#allocation4 + $0x80] sm:$0xf0] }
  0x42   :  { %528 = vmatpush.bf16.msra.mxu0 %v5691_v31  ;;  %v5855_v6 = vor.u32 %v7697_v63, %v5854_v62  ;;  %v7670_v7 = vld [vmem:[#allocation2 + $0x70] sm:$0xf0]  ;;  %v6070_v8 = vld [vmem:[#allocation4 + $0x138] sm:$0xf]  ;;  %v7744_v9 = vld [vmem:[#allocation4 + $0x140] sm:$0xf0]  ;;  %v5975_v12 = vor.u32 %v7720_v5, %v5974_v4 }
  0x43   :  { %557 = vmatpush.bf16.msra.mxu1 %v5787_v35  ;;  %v5842_v10 = vld [vmem:[#allocation2 + $0x128] sm:$0xf]  ;;  %v7694_v11 = vld [vmem:[#allocation2 + $0x130] sm:$0xf0]  ;;  %v5666_v13 = vld [vmem:[%s11185_s19 + $0x10] sm:$0xf]  ;;  %v5747_v14 = vor.u32 %v7670_v7, %v5746_v2  ;;  %v6071_v16 = vor.u32 %v7744_v9, %v6070_v8 }
  0x44   :  { %586 = vmatpush.bf16.msra.mxu2 %v5695_v36  ;;  %v5734_v15 = vld [vmem:[#allocation2 + $0x50] sm:$0xf]  ;;  %v5962_v17 = vld [vmem:[#allocation4 + $0x60] sm:$0xf]  ;;  %v7717_v18 = vld [vmem:[#allocation4 + $0x68] sm:$0xf0]  ;;  %v5843_v19 = vor.u32 %v7694_v11, %v5842_v10 }
  0x45   :  { %615 = vmatpush.bf16.msra.mxu3 %v5791_v39  ;;  %529 = vmatmul.bf16.vlgmr.msra.gmra.mxu0 %v8417_v44  ;;  %v7667_v20 = vld [vmem:[#allocation2 + $0x58] sm:$0xf0]  ;;  %v6058_v21 = vld [vmem:[#allocation4 + $0x120] sm:$0xf]  ;;  %v7741_v22 = vld [vmem:[#allocation4 + $0x128] sm:$0xf0]  ;;  %v5963_v28 = vor.u32 %v7717_v18, %v5962_v17 }
  0x46   :  { %637 = vmatpush.bf16.msrb.mxu0 %v5783_v40  ;;  %558 = vmatmul.bf16.vlgmr.msra.gmra.mxu1 %v8419_v49  ;;  %v7643_v23 = vld [vmem:[%s11185_s19 + $0x14] sm:$0xf0]  ;;  %v5830_v24 = vld [vmem:[#allocation2 + $0x110] sm:$0xf]  ;;  %v7691_v25 = vld [vmem:[#allocation2 + $0x118] sm:$0xf0]  ;;  %v5735_v29 = vor.u32 %v7667_v20, %v5734_v15  ;;  %v6059_v30 = vor.u32 %v7741_v22, %v6058_v21 }
  0x47   :  { %666 = vmatpush.bf16.msrb.mxu1 %v5879_v45  ;;  %587 = vmatmul.bf16.vlgmr.msra.gmra.mxu2 %v8417_v44  ;;  %v7642_v26 = vld [vmem:[%s11185_s19 + $0x14] sm:$0xf]  ;;  %v5668_v27 = vld [vmem:[%s11185_s19 + $0x18] sm:$0xf0]  ;;  %v8437_v31 = vor.u32 %v7643_v23, %v5666_v13  ;;  %v5831_v32 = vor.u32 %v7691_v25, %v5830_v24  ;;  %v5722_v33 = vld [vmem:[#allocation2 + $0x38] sm:$0xf] }
  0x48   :  { %616 = vmatmul.bf16.vlgmr.msra.gmra.mxu3 %v8419_v49  ;;  %1135 = vmatpush.bf16.msrb.mxu2 %v5999_v52  ;;  %v7664_v34 = vld [vmem:[#allocation2 + $0x40] sm:$0xf0]  ;;  %v8439_v35 = vor.u32 %v7642_v26, %v5668_v27  ;;  %v5818_v36 = vld [vmem:[#allocation2 + $0xf8] sm:$0xf]  ;;  %v6046_v40 = vld [vmem:[#allocation4 + $0x108] sm:$0xf] }
  0x49   :  { %1164 = vmatpush.bf16.msrb.mxu3 %v6095_v55  ;;  %v7688_v37 = vld [vmem:[#allocation2 + $0x100] sm:$0xf0]  ;;  %v5723_v38 = vor.u32 %v7664_v34, %v5722_v33  ;;  %v7738_v41 = vld [vmem:[#allocation4 + $0x110] sm:$0xf0]  ;;  %v5710_v43 = vld [vmem:[#allocation2 + $0x20] sm:$0xf] }
  0x4a   :  { %638 = vmatpush.bf16.msrb.mxu0 %v5771_v53  ;;  %v5819_v39 = vor.u32 %v7688_v37, %v5818_v36  ;;  %v6047_v42 = vor.u32 %v7738_v41, %v6046_v40  ;;  %v7661_v45 = vld [vmem:[#allocation2 + $0x28] sm:$0xf0]  ;;  %v5806_v46 = vld [vmem:[#allocation2 + $0xe0] sm:$0xf]  ;;  %v5950_v50 = vld [vmem:[#allocation4 + $0x48] sm:$0xf] }
  0x4b   :  { %667 = vmatpush.bf16.msrb.mxu1 %v5867_v58  ;;  %v5711_v47 = vor.u32 %v7661_v45, %v5710_v43  ;;  %v7685_v48 = vld [vmem:[#allocation2 + $0xe8] sm:$0xf0]  ;;  %v7714_v51 = vld [vmem:[#allocation4 + $0x50] sm:$0xf0]  ;;  %v6034_v54 = vld [vmem:[#allocation4 + $0xf0] sm:$0xf] }
  0x4c   :  { %1136 = vmatpush.bf16.msrb.mxu2 %v5987_v0  ;;  %v5807_v52 = vor.u32 %v7685_v48, %v5806_v46  ;;  %v5951_v53 = vor.u32 %v7714_v51, %v5950_v50  ;;  %v7735_v55 = vld [vmem:[#allocation4 + $0xf8] sm:$0xf0]  ;;  %v5698_v56 = vld [vmem:[#allocation2 + $0x8] sm:$0xf]  ;;  %v7658_v58 = vld [vmem:[#allocation2 + $0x10] sm:$0xf0] }
  0x4d   :  { %1165 = vmatpush.bf16.msrb.mxu3 %v6083_v3  ;;  %v6035_v57 = vor.u32 %v7735_v55, %v6034_v54  ;;  %v6022_v59 = vld [vmem:[#allocation4 + $0xd8] sm:$0xf]  ;;  %v7732_v60 = vld [vmem:[#allocation4 + $0xe0] sm:$0xf0]  ;;  %v5794_v61 = vld [vmem:[#allocation2 + $0xc8] sm:$0xf]  ;;  %v5699_v0 = vor.u32 %v7658_v58, %v5698_v56 }
  0x4e   :  { %639 = vmatpush.bf16.msrb.mxu0 %v5759_v1  ;;  %v7682_v62 = vld [vmem:[#allocation2 + $0xd0] sm:$0xf0]  ;;  %v5938_v63 = vld [vmem:[#allocation4 + $0x30] sm:$0xf]  ;;  %v6023_v1 = vor.u32 %v7732_v60, %v6022_v59  ;;  %v7711_v2 = vld [vmem:[#allocation4 + $0x38] sm:$0xf0] }
  0x4f   :  { %668 = vmatpush.bf16.msrb.mxu1 %v5855_v6  ;;  %v5795_v3 = vor.u32 %v7682_v62, %v5794_v61  ;;  %v5939_v4 = vor.u32 %v7711_v2, %v5938_v63  ;;  %v6010_v5 = vld [vmem:[#allocation4 + $0xc0] sm:$0xf]  ;;  %v7729_v6 = vld [vmem:[#allocation4 + $0xc8] sm:$0xf0]  ;;  %v7645_v8 = vld [vmem:[%s11185_s19 + $0x24] sm:$0xf0] }
  0x50   :  { %1137 = vmatpush.bf16.msrb.mxu2 %v5975_v12  ;;  %v5674_v7 = vld [vmem:[%s11185_s19 + $0x20] sm:$0xf]  ;;  %v7644_v9 = vld [vmem:[%s11185_s19 + $0x24] sm:$0xf]  ;;  %v5676_v10 = vld [vmem:[%s11185_s19 + $0x28] sm:$0xf0]  ;;  %v6011_v11 = vor.u32 %v7729_v6, %v6010_v5 }
  0x51   :  { %1166 = vmatpush.bf16.msrb.mxu3 %v6071_v16  ;;  %v8457_v12 = vor.u32 %v7645_v8, %v5674_v7  ;;  %v8459_v13 = vor.u32 %v7644_v9, %v5676_v10  ;;  %v7708_v15 = vld [vmem:[#allocation4 + $0x20] sm:$0xf0]  ;;  %v7725_v16 = vld [vmem:[#allocation4 + $0xac] sm:$0xf]  ;;  %v6000_v17 = vld [vmem:[#allocation4 + $0xb4] sm:$0xf0] }
  0x52   :  { %640 = vmatpush.bf16.msrb.mxu0 %v5747_v14  ;;  %v5926_v14 = vld [vmem:[#allocation4 + $0x18] sm:$0xf]  ;;  %v6003_v20 = vor.u32 %v7725_v16, %v6000_v17  ;;  %v5914_v22 = vld [vmem:[#allocation4] sm:$0xf]  ;;  %v7705_v23 = vld [vmem:[#allocation4 + $0x8] sm:$0xf0] }
  0x53   :  { %669 = vmatpush.bf16.msrb.mxu1 %v5843_v19  ;;  %v5927_v18 = vor.u32 %v7708_v15, %v5926_v14  ;;  %v7749_v19 = vld [vmem:[#allocation4 + $0x16c] sm:$0xf]  ;;  %v6096_v21 = vld [vmem:[#allocation4 + $0x174] sm:$0xf0]  ;;  %v5915_v25 = vor.u32 %v7705_v23, %v5914_v22  ;;  %v7722_v26 = vld [vmem:[#allocation4 + $0x94] sm:$0xf] }
  0x54   :  { %1138 = vmatpush.bf16.msrb.mxu2 %v5963_v28  ;;  %v6099_v24 = vor.u32 %v7749_v19, %v6096_v21  ;;  %v5988_v27 = vld [vmem:[#allocation4 + $0x9c] sm:$0xf0]  ;;  %v5682_v33 = vld [vmem:[%s11185_s19 + $0x30] sm:$0xf]  ;;  %v7647_v34 = vld [vmem:[%s11185_s19 + $0x34] sm:$0xf0] }
  0x55   :  { %1167 = vmatpush.bf16.msrb.mxu3 %v6059_v30  ;;  %534 = vmatmul.bf16.gmra.mxu0 %v8437_v31  ;;  %v5991_v28 = vor.u32 %v7722_v26, %v5988_v27  ;;  %v6084_v30 = vld [vmem:[#allocation4 + $0x15c] sm:$0xf0]  ;;  %v7646_v36 = vld [vmem:[%s11185_s19 + $0x34] sm:$0xf]  ;;  %v5684_v37 = vld [vmem:[%s11185_s19 + $0x38] sm:$0xf0] }
  0x56   :  { %641 = vmatpush.bf16.msrb.mxu0 %v5735_v29  ;;  %563 = vmatmul.bf16.gmra.mxu1 %v8439_v35  ;;  %v7746_v29 = vld [vmem:[#allocation4 + $0x154] sm:$0xf]  ;;  %v7719_v40 = vld [vmem:[#allocation4 + $0x7c] sm:$0xf]  ;;  %v5976_v41 = vld [vmem:[#allocation4 + $0x84] sm:$0xf0] }
  0x57   :  { %670 = vmatpush.bf16.msrb.mxu1 %v5831_v32  ;;  %592 = vmatmul.bf16.gmra.mxu2 %v8437_v31  ;;  %v6087_v32 = vor.u32 %v7746_v29, %v6084_v30  ;;  %v5979_v43 = vor.u32 %v7719_v40, %v5976_v41  ;;  %v6072_v45 = vld [vmem:[#allocation4 + $0x144] sm:$0xf0]  ;;  %v6006_v46 = vld [vmem:[#allocation4 + $0xb0] sm:$0xf]  ;;  %v5994_v59 = vld [vmem:[#allocation4 + $0x98] sm:$0xf] }
  0x58   :  { %621 = vmatmul.bf16.gmra.mxu3 %v8439_v35  ;;  %1139 = vmatpush.bf16.msrb.mxu2 %v5951_v53  ;;  %v6102_v51 = vld [vmem:[#allocation4 + $0x170] sm:$0xf]  ;;  %v7716_v53 = vld [vmem:[#allocation4 + $0x64] sm:$0xf]  ;;  %v6090_v62 = vld [vmem:[#allocation4 + $0x158] sm:$0xf] }
  0x59   :  { %1168 = vmatpush.bf16.msrb.mxu3 %v6047_v42  ;;  %v7743_v42 = vld [vmem:[#allocation4 + $0x13c] sm:$0xf]  ;;  %v5964_v55 = vld [vmem:[#allocation4 + $0x6c] sm:$0xf0]  ;;  %v7724_v61 = vld [vmem:[#allocation4 + $0xa0] sm:$0xf0] }
  0x5a   :  { %642 = vmatpush.bf16.msrb.mxu0 %v5723_v38  ;;  %v8477_v38 = vor.u32 %v7647_v34, %v5682_v33  ;;  %v6075_v48 = vor.u32 %v7743_v42, %v6072_v45  ;;  %v5967_v56 = vor.u32 %v7716_v53, %v5964_v55  ;;  %v6060_v58 = vld [vmem:[#allocation4 + $0x12c] sm:$0xf0]  ;;  %v7748_v63 = vld [vmem:[#allocation4 + $0x160] sm:$0xf0]  ;;  %s11186_s20 = sld [smem:[#allocation18_spill]] }
  0x5b   :  { %671 = vmatpush.bf16.msrb.mxu1 %v5819_v39  ;;  %v8479_v39 = vor.u32 %v7646_v36, %v5684_v37  ;;  %v7713_v8 = vld [vmem:[#allocation4 + $0x4c] sm:$0xf]  ;;  %v5952_v9 = vld [vmem:[#allocation4 + $0x54] sm:$0xf0]  ;;  %v5982_v15 = vld [vmem:[#allocation4 + $0x80] sm:$0xf] }
  0x5c   :  { %1140 = vmatpush.bf16.msrb.mxu2 %v5939_v4  ;;  %v7737_v10 = vld [vmem:[#allocation4 + $0x10c] sm:$0xf]  ;;  %v6048_v14 = vld [vmem:[#allocation4 + $0x114] sm:$0xf0]  ;;  %v6078_v19 = vld [vmem:[#allocation4 + $0x140] sm:$0xf] }
  0x5d   :  { %1169 = vmatpush.bf16.msrb.mxu3 %v6035_v57  ;;  %v7740_v57 = vld [vmem:[#allocation4 + $0x124] sm:$0xf]  ;;  %v7721_v16 = vld [vmem:[#allocation4 + $0x88] sm:$0xf0]  ;;  %v6051_v17 = vor.u32 %v7737_v10, %v6048_v14  ;;  %v7710_v21 = vld [vmem:[#allocation4 + $0x34] sm:$0xf] }
  0x5e   :  { %643 = vmatpush.bf16.msrb.mxu0 %v5711_v47  ;;  %v7727_v47 = vld [vmem:[#allocation4 + $0xb8] sm:$0xf0]  ;;  %v6063_v60 = vor.u32 %v7740_v57, %v6060_v58  ;;  %v5940_v22 = vld [vmem:[#allocation4 + $0x3c] sm:$0xf0]  ;;  %v7734_v23 = vld [vmem:[#allocation4 + $0xf4] sm:$0xf] }
  0x5f   :  { %672 = vmatpush.bf16.msrb.mxu1 %v5807_v52  ;;  %v6007_v50 = vor.u32 %v7727_v47, %v6006_v46  ;;  %v7751_v52 = vld [vmem:[#allocation4 + $0x178] sm:$0xf0]  ;;  %v7718_v27 = vld [vmem:[#allocation4 + $0x70] sm:$0xf0]  ;;  %v6054_v42 = vld [vmem:[#allocation4 + $0x110] sm:$0xf] }
  0x60   :  { %1141 = vmatpush.bf16.msrb.mxu2 %v5927_v18  ;;  %v6103_v54 = vor.u32 %v7751_v52, %v6102_v51  ;;  %v5882_v2 = vld [vmem:[%s11186_s20] sm:$0xf]  ;;  %v7648_v4 = vld [vmem:[%s11186_s20 + $0x4] sm:$0xf]  ;;  %v5884_v5 = vld [vmem:[%s11186_s20 + $0x8] sm:$0xf0]  ;;  %v5983_v18 = vor.u32 %v7721_v16, %v5982_v15 }
  0x61   :  { %1170 = vmatpush.bf16.msrb.mxu3 %v6023_v1  ;;  %v6091_v1 = vor.u32 %v7748_v63, %v6090_v62  ;;  %v8499_v7 = vor.u32 %v7648_v4, %v5884_v5  ;;  %v7742_v29 = vld [vmem:[#allocation4 + $0x130] sm:$0xf0]  ;;  %v5890_v33 = vld [vmem:[%s11186_s20 + $0x10] sm:$0xf]  ;;  %v7651_v34 = vld [vmem:[%s11186_s20 + $0x14] sm:$0xf0] }
  0x62   :  { %644 = vmatpush.bf16.msrb.mxu0 %v5699_v0  ;;  %v5995_v0 = vor.u32 %v7724_v61, %v5994_v59  ;;  %v7650_v36 = vld [vmem:[%s11186_s20 + $0x14] sm:$0xf]  ;;  %v5892_v37 = vld [vmem:[%s11186_s20 + $0x18] sm:$0xf0]  ;;  %v8517_v40 = vor.u32 %v7651_v34, %v5890_v33  ;;  %v5928_v47 = vld [vmem:[#allocation4 + $0x24] sm:$0xf0] }
  0x63   :  { %673 = vmatpush.bf16.msrb.mxu1 %v5795_v3  ;;  %v7649_v3 = vld [vmem:[%s11186_s20 + $0x4] sm:$0xf0]  ;;  %v8519_v41 = vor.u32 %v7650_v36, %v5892_v37  ;;  %v7707_v46 = vld [vmem:[#allocation4 + $0x1c] sm:$0xf]  ;;  %v5958_v52 = vld [vmem:[#allocation4 + $0x50] sm:$0xf] }
  0x64   :  { %1142 = vmatpush.bf16.msrb.mxu2 %v5915_v25  ;;  %v8497_v6 = vor.u32 %v7649_v3, %v5882_v2  ;;  %v5970_v25 = vld [vmem:[#allocation4 + $0x68] sm:$0xf]  ;;  %v7715_v53 = vld [vmem:[#allocation4 + $0x58] sm:$0xf0]  ;;  %v7704_v57 = vld [vmem:[#allocation4 + $0x4] sm:$0xf] }
  0x65   :  { %1171 = vmatpush.bf16.msrb.mxu3 %v6011_v11  ;;  %539 = vmatmul.bf16.gmra.mxu0 %v8457_v12  ;;  %v5955_v11 = vor.u32 %v7713_v8, %v5952_v9  ;;  %v5971_v30 = vor.u32 %v7718_v27, %v5970_v25  ;;  %v6024_v51 = vld [vmem:[#allocation4 + $0xe4] sm:$0xf0]  ;;  %v5959_v55 = vor.u32 %v7715_v53, %v5958_v52  ;;  %v5916_v58 = vld [vmem:[#allocation4 + $0xc] sm:$0xf0]  ;;  %v7733_v61 = vld [vmem:[#allocation4 + $0xe8] sm:$0xf0] }
  0x66   :  { %568 = vmatmul.bf16.gmra.mxu1 %v8459_v13  ;;  %1193 = vmatpush.bf16.msra.mxu0 %v6003_v20  ;;  %v7745_v20 = vld [vmem:[#allocation4 + $0x148] sm:$0xf0]  ;;  %v5919_v59 = vor.u32 %v7704_v57, %v5916_v58  ;;  %v7728_v62 = vld [vmem:[#allocation4 + $0xc4] sm:$0xf]  ;;  %v5898_v5 = vld [vmem:[%s11186_s20 + $0x20] sm:$0xf] }
  0x67   :  { %597 = vmatmul.bf16.gmra.mxu2 %v8457_v12  ;;  %1222 = vmatpush.bf16.msra.mxu1 %v6099_v24  ;;  %v6036_v24 = vld [vmem:[#allocation4 + $0xfc] sm:$0xf0]  ;;  %v7712_v2 = vld [vmem:[#allocation4 + $0x40] sm:$0xf0]  ;;  %v7653_v8 = vld [vmem:[%s11186_s20 + $0x24] sm:$0xf0] }
  0x68   :  { %626 = vmatmul.bf16.gmra.mxu3 %v8459_v13  ;;  %1251 = vmatpush.bf16.msra.mxu2 %v6007_v50  ;;  %v6039_v26 = vor.u32 %v7734_v23, %v6036_v24  ;;  %v5931_v50 = vor.u32 %v7707_v46, %v5928_v47  ;;  %v7652_v9 = vld [vmem:[%s11186_s20 + $0x24] sm:$0xf]  ;;  %v5900_v10 = vld [vmem:[%s11186_s20 + $0x28] sm:$0xf0]  ;;  %v7730_v14 = vld [vmem:[#allocation4 + $0xd0] sm:$0xf0]  ;;  %v8537_v15 = vor.u32 %v7653_v8, %v5898_v5 }
  0x69   :  { %1280 = vmatpush.bf16.msra.mxu3 %v6103_v54  ;;  %v5908_v23 = vld [vmem:[%s11186_s20 + $0x38] sm:$0xf0]  ;;  %v7766_v33 = vld [vmem:[#allocation6 + $0x74] sm:$0xf]  ;;  %v6226_v36 = vld [vmem:[#allocation6 + $0xf0] sm:$0xf] }
  0x6a   :  { %1194 = vmatpush.bf16.msra.mxu0 %v5991_v28  ;;  %v6066_v28 = vld [vmem:[#allocation4 + $0x128] sm:$0xf]  ;;  %v6164_v34 = vld [vmem:[#allocation6 + $0x78] sm:$0xf0]  ;;  %v7783_v37 = vld [vmem:[#allocation6 + $0xf4] sm:$0xf0] }
  0x6b   :  { %1223 = vmatpush.bf16.msra.mxu1 %v6087_v32  ;;  %v6067_v32 = vor.u32 %v7742_v29, %v6066_v28  ;;  %v7767_v46 = vld [vmem:[#allocation6 + $0x74] sm:$0xf0]  ;;  %v7764_v52 = vld [vmem:[#allocation6 + $0x64] sm:$0xf]  ;;  %v6156_v53 = vld [vmem:[#allocation6 + $0x68] sm:$0xf0] }
  0x6c   :  { %1252 = vmatpush.bf16.msra.mxu2 %v5995_v0  ;;  %v6012_v0 = vld [vmem:[#allocation4 + $0xcc] sm:$0xf0]  ;;  %v6159_v57 = vor.u32 %v7764_v52, %v6156_v53  ;;  %v6154_v58 = vld [vmem:[#allocation6 + $0x60] sm:$0xf]  ;;  %v6148_v8 = vld [vmem:[#allocation6 + $0x58] sm:$0xf0] }
  0x6d   :  { %1281 = vmatpush.bf16.msra.mxu3 %v6091_v1  ;;  %v5946_v1 = vld [vmem:[#allocation4 + $0x38] sm:$0xf]  ;;  %v6015_v3 = vor.u32 %v7728_v62, %v6012_v0  ;;  %v6194_v52 = vld [vmem:[#allocation6 + $0xb0] sm:$0xf]  ;;  %s11197_s5 = sld [smem:[#allocation24_spill]] }
  0x6e   :  { %1195 = vmatpush.bf16.msra.mxu0 %v5979_v43  ;;  %v7739_v43 = vld [vmem:[#allocation4 + $0x118] sm:$0xf0]  ;;  %v5947_v4 = vor.u32 %v7712_v2, %v5946_v1  ;;  %v6282_v1 = vld [vmem:[#allocation6 + $0x160] sm:$0xf]  ;;  %v7797_v2 = vld [vmem:[#allocation6 + $0x164] sm:$0xf0] }
  0x6f   :  { %1224 = vmatpush.bf16.msra.mxu1 %v6075_v48  ;;  %v6055_v45 = vor.u32 %v7739_v43, %v6054_v42  ;;  %v7731_v48 = vld [vmem:[#allocation4 + $0xdc] sm:$0xf]  ;;  %v6167_v42 = vor.u32 %v7766_v33, %v6164_v34  ;;  %v6227_v43 = vor.u32 %v7783_v37, %v6226_v36  ;;  %v6283_v5 = vor.u32 %v7797_v2, %v6282_v1  ;;  %v6140_v33 = vld [vmem:[#allocation6 + $0x48] sm:$0xf0]  ;;  %v6274_v36 = vld [vmem:[#allocation6 + $0x150] sm:$0xf] }
  0x70   :  { %1253 = vmatpush.bf16.msra.mxu2 %v5983_v18  ;;  %v6027_v54 = vor.u32 %v7731_v48, %v6024_v51  ;;  %v5934_v18 = vld [vmem:[#allocation4 + $0x20] sm:$0xf]  ;;  %v7795_v37 = vld [vmem:[#allocation6 + $0x154] sm:$0xf0]  ;;  %v7773_v1 = vld [vmem:[#allocation6 + $0xa4] sm:$0xf0] }
  0x71   :  { %v7756_v2 = vld [vmem:[#allocation6 + $0x24] sm:$0xf]  ;;  %s11198_s2 = sld [smem:[#allocation26_spill]] }
  0x72   :  { %1196 = vmatpush.bf16.msra.mxu0 %v5967_v56  ;;  %v7736_v56 = vld [vmem:[#allocation4 + $0x100] sm:$0xf0] }
  0x73   :  { %1225 = vmatpush.bf16.msra.mxu1 %v6063_v60  ;;  %v6030_v60 = vld [vmem:[#allocation4 + $0xe0] sm:$0xf] }
  0x74   :  { %1254 = vmatpush.bf16.msra.mxu2 %v5971_v30  ;;  %v6031_v63 = vor.u32 %v7733_v61, %v6030_v60  ;;  %v6290_v30 = vld [vmem:[#allocation6 + $0x170] sm:$0xf] }
  0x75   :  { %544 = vmatmul.bf16.gmra.mxu0 %v8477_v38 }
  0x76   :  { %573 = vmatmul.bf16.gmra.mxu1 %v8479_v39  ;;  %1197 = vmatpush.bf16.msra.mxu0 %v5955_v11  ;;  %v6018_v11 = vld [vmem:[#allocation4 + $0xc8] sm:$0xf] }
  0x77   :  { %602 = vmatmul.bf16.gmra.mxu2 %v8477_v38  ;;  %1226 = vmatpush.bf16.msra.mxu1 %v6051_v17  ;;  %v6019_v16 = vor.u32 %v7730_v14, %v6018_v11  ;;  %v8539_v17 = vor.u32 %v7652_v9, %v5900_v10  ;;  %v6210_v10 = vld [vmem:[#allocation6 + $0xd0] sm:$0xf] }
  0x78   :  { %631 = vmatmul.bf16.gmra.mxu3 %v8479_v39  ;;  %1255 = vmatpush.bf16.msra.mxu2 %v5959_v55 }
  0x7b   :  { %1227 = vmatpush.bf16.msra.mxu1 %v6039_v26  ;;  %v8568_v26 = vld [vmem:[%s11147_s10] sm:$0x7] }
  0x7c   :  { %1256 = vmatpush.bf16.msra.mxu2 %v5947_v4  ;;  %v8571_v27 = vperm.slane %v8568_v26, 0  ;;  %v8577_v47 = vperm.slane %v8568_v26, 1 }
  0x7f   :  { %1228 = vmatpush.bf16.msra.mxu1 %v6027_v54  ;;  %v6218_v54 = vld [vmem:[#allocation6 + $0xe0] sm:$0xf] }
  0x83   :  { %1229 = vmatpush.bf16.msra.mxu1 %v6015_v3  ;;  %v7762_v3 = vld [vmem:[#allocation6 + $0x54] sm:$0xf] }
  0x84   :  { %v6151_v9 = vor.u32 %v7762_v3, %v6148_v8  ;;  %v6124_v3 = vld [vmem:[#allocation6 + $0x28] sm:$0xf0] }
  0x85   :  { %645 = vmatmul.bf16.vlgmr.msrb.gmra.mxu0 %v8417_v44  ;;  %v6079_v44 = vor.u32 %v7745_v20, %v6078_v19  ;;  %v7709_v19 = vld [vmem:[#allocation4 + $0x28] sm:$0xf0] }
  0x86   :  { %674 = vmatmul.bf16.vlgmr.msrb.gmra.mxu1 %v8419_v49  ;;  %v5943_v49 = vor.u32 %v7710_v21, %v5940_v22  ;;  %v5935_v20 = vor.u32 %v7709_v19, %v5934_v18  ;;  %v5922_v21 = vld [vmem:[#allocation4 + $0x8] sm:$0xf]  ;;  %v6146_v18 = vld [vmem:[#allocation6 + $0x50] sm:$0xf]  ;;  %v7763_v19 = vld [vmem:[#allocation6 + $0x54] sm:$0xf0] }
  0x87   :  { %1143 = vmatmul.bf16.vlgmr.msrb.gmra.mxu2 %v8497_v6  ;;  %1282 = vmatpush.bf16.msra.mxu3 %v6079_v44  ;;  %v7706_v44 = vld [vmem:[#allocation4 + $0x10] sm:$0xf0] }
  0x88   :  { %1172 = vmatmul.bf16.vlgmr.msrb.gmra.mxu3 %v8499_v7  ;;  %1198 = vmatpush.bf16.msra.mxu0 %v5943_v49  ;;  %v5923_v22 = vor.u32 %v7706_v44, %v5922_v21  ;;  %v5906_v49 = vld [vmem:[%s11186_s20 + $0x30] sm:$0xf] }
  0x89   :  { %1257 = vmatpush.bf16.msra.mxu2 %v5935_v20  ;;  %1832 = vmatpush.bf16.msrb.mxu1 %v6227_v43  ;;  %v6275_v43 = vor.u32 %v7795_v37, %v6274_v36  ;;  %v7753_v36 = vld [vmem:[#allocation6 + $0x4] sm:$0xf0] }
  0x8b   :  { %1283 = vmatpush.bf16.msra.mxu3 %v6067_v32  ;;  %v7799_v32 = vld [vmem:[#allocation6 + $0x174] sm:$0xf0] }
  0x8c   :  { %1199 = vmatpush.bf16.msra.mxu0 %v5931_v50 }
  0x8d   :  { %1258 = vmatpush.bf16.msra.mxu2 %v5923_v22  ;;  %v6147_v22 = vor.u32 %v7763_v19, %v6146_v18  ;;  %v6127_v18 = vor.u32 %v7756_v2, %v6124_v3  ;;  %v6114_v19 = vld [vmem:[#allocation6 + $0x10] sm:$0xf]  ;;  %v7789_v2 = vld [vmem:[#allocation6 + $0x124] sm:$0xf0] }
  0x8f   :  { %1284 = vmatpush.bf16.msra.mxu3 %v6055_v45  ;;  %v6162_v45 = vld [vmem:[#allocation6 + $0x70] sm:$0xf] }
  0x90   :  { %1200 = vmatpush.bf16.msra.mxu0 %v5919_v59  ;;  %v6163_v48 = vor.u32 %v7767_v46, %v6162_v45 }
  0x94   :  { %1803 = vmatpush.bf16.msrb.mxu0 %v6163_v48 }
  0x95   :  { %650 = vmatmul.bf16.gmra.mxu0 %v8437_v31  ;;  %v6042_v31 = vld [vmem:[#allocation4 + $0xf8] sm:$0xf] }
  0x96   :  { %679 = vmatmul.bf16.gmra.mxu1 %v8439_v35  ;;  %v6043_v35 = vor.u32 %v7736_v56, %v6042_v31 }
  0x97   :  { %1148 = vmatmul.bf16.gmra.mxu2 %v8517_v40 }
  0x98   :  { %1177 = vmatmul.bf16.gmra.mxu3 %v8519_v41 }
  0x99   :  { %1285 = vmatpush.bf16.msra.mxu3 %v6043_v35  ;;  %v7781_v35 = vld [vmem:[#allocation6 + $0xe4] sm:$0xf0] }
  0x9a   :  { %v6219_v60 = vor.u32 %v7781_v35, %v6218_v54  ;;  %v7775_v54 = vld [vmem:[#allocation6 + $0xb4] sm:$0xf0] }
  0x9c   :  { %1833 = vmatpush.bf16.msrb.mxu1 %v6219_v60 }
  0x9d   :  { %1286 = vmatpush.bf16.msra.mxu3 %v6031_v63 }
  0xa1   :  { %1287 = vmatpush.bf16.msra.mxu3 %v6019_v16  ;;  %v7779_v16 = vld [vmem:[#allocation6 + $0xd4] sm:$0xf0] }
  0xa2   :  { %v6211_v44 = vor.u32 %v7779_v16, %v6210_v10 }
  0xa4   :  { %1834 = vmatpush.bf16.msrb.mxu1 %v6211_v44 }
  0xa5   :  { %655 = vmatmul.bf16.gmra.mxu0 %v8457_v12  ;;  %v7655_v12 = vld [vmem:[%s11186_s20 + $0x34] sm:$0xf0]  ;;  %1890 = vmatpush.bf16.msrb.mxu3 %v6167_v42 }
  0xa6   :  { %684 = vmatmul.bf16.gmra.mxu1 %v8459_v13  ;;  %v7654_v13 = vld [vmem:[%s11186_s20 + $0x34] sm:$0xf]  ;;  %v8557_v24 = vor.u32 %v7655_v12, %v5906_v49  ;;  %v6138_v49 = vld [vmem:[#allocation6 + $0x40] sm:$0xf]  ;;  %v7761_v12 = vld [vmem:[#allocation6 + $0x44] sm:$0xf0] }
  0xa7   :  { %1153 = vmatmul.bf16.gmra.mxu2 %v8537_v15  ;;  %v8559_v25 = vor.u32 %v7654_v13, %v5908_v23  ;;  %v6202_v13 = vld [vmem:[#allocation6 + $0xc0] sm:$0xf]  ;;  %v6139_v45 = vor.u32 %v7761_v12, %v6138_v49  ;;  %v7755_v49 = vld [vmem:[#allocation6 + $0x14] sm:$0xf0]  ;;  %v6178_v12 = vld [vmem:[#allocation6 + $0x90] sm:$0xf] }
  0xa8   :  { %1182 = vmatmul.bf16.gmra.mxu3 %v8539_v17 }
  0xa9   :  { %1891 = vmatpush.bf16.msrb.mxu3 %v6159_v57 }
  0xad   :  { %1892 = vmatpush.bf16.msrb.mxu3 %v6151_v9 }
  0xb5   :  { %660 = vmatmul.bf16.gmra.mxu0 %v8477_v38 }
  0xb6   :  { %689 = vmatmul.bf16.gmra.mxu1 %v8479_v39  ;;  %v6291_v39 = vor.u32 %v7799_v32, %v6290_v30  ;;  %v7777_v30 = vld [vmem:[#allocation6 + $0xc4] sm:$0xf0]  ;;  %v7760_v32 = vld [vmem:[#allocation6 + $0x44] sm:$0xf] }
  0xb7   :  { %1158 = vmatmul.bf16.gmra.mxu2 %v8557_v24  ;;  %v6203_v46 = vor.u32 %v7777_v30, %v6202_v13  ;;  %v6143_v48 = vor.u32 %v7760_v32, %v6140_v33  ;;  %v7754_v30 = vld [vmem:[#allocation6 + $0x14] sm:$0xf]  ;;  %v6116_v32 = vld [vmem:[#allocation6 + $0x18] sm:$0xf0] }
  0xb8   :  { %1187 = vmatmul.bf16.gmra.mxu3 %v8559_v25  ;;  %1861 = vmatpush.bf16.msrb.mxu2 %v6291_v39 }
  0xb9   :  { %1835 = vmatpush.bf16.msrb.mxu1 %v6203_v46  ;;  %1893 = vmatpush.bf16.msrb.mxu3 %v6143_v48  ;;  %v6170_v46 = vld [vmem:[#allocation6 + $0x80] sm:$0xf]  ;;  %v7769_v48 = vld [vmem:[#allocation6 + $0x84] sm:$0xf0] }
  0xbc   :  { %1862 = vmatpush.bf16.msrb.mxu2 %v6283_v5 }
  0xc0   :  { %1863 = vmatpush.bf16.msrb.mxu2 %v6275_v43 }
  0xc2   :  { %v530_v28 = vpop.f32.mrf.mxu0 }
  0xc3   :  { %v559_v29 = vpop.f32.mrf.mxu1  ;;  %v531_v38 = vadd.f32 %v530_v28, %v8571_v27 }
  0xc5   :  { %1201 = vmatmul.bf16.vlgmr.msra.gmra.mxu0 %v8497_v6  ;;  %v560_v50 = vadd.f32 %v559_v29, %v531_v38 }
  0xc6   :  { %1230 = vmatmul.bf16.vlgmr.msra.gmra.mxu1 %v8499_v7 }
  0xc7   :  { %1259 = vmatmul.bf16.vlgmr.msra.gmra.mxu2 %v8497_v6  ;;  %v7765_v6 = vld [vmem:[#allocation6 + $0x64] sm:$0xf0]  ;;  %vm695_vm0 = vcmp.ge.f32.partialorder %v560_v50, 0.0  ;;  %v719_v62 = vmul.f32 0.01, %v560_v50 }
  0xc8   :  { %1288 = vmatmul.bf16.vlgmr.msra.gmra.mxu3 %v8499_v7  ;;  %v6155_v61 = vor.u32 %v7765_v6, %v6154_v58  ;;  %v6195_v58 = vor.u32 %v7775_v54, %v6194_v52  ;;  %v6132_v6 = vld [vmem:[#allocation6 + $0x38] sm:$0xf0]  ;;  %v7791_v52 = vld [vmem:[#allocation6 + $0x134] sm:$0xf0] }
  0xc9   :  { %v743_v11 = vsel %vm695_vm0, %v560_v50, %v719_v62  ;;  %v6130_v50 = vld [vmem:[#allocation6 + $0x30] sm:$0xf]  ;;  %v6186_v62 = vld [vmem:[#allocation6 + $0xa0] sm:$0xf] }
  0xca   :  { %v588_v51 = vpop.f32.mrf.mxu2  ;;  %v532_v56 = vpop.f32.mrf.mxu0  ;;  %1804 = vmatpush.bf16.msrb.mxu0 %v6155_v61  ;;  %v7757_v61 = vld [vmem:[#allocation6 + $0x24] sm:$0xf0]  ;;  %1836 = vmatpush.bf16.msrb.mxu1 %v6195_v58  ;;  %v6187_v16 = vor.u32 %v7773_v1, %v6186_v62  ;;  %v6108_v58 = vld [vmem:[#allocation6 + $0x8] sm:$0xf0] }
  0xcb   :  { %v589_v55 = vadd.f32 %v588_v51, %v8577_v47  ;;  %v617_v31 = vpop.f32.mrf.mxu3  ;;  %v533_v59 = vadd.f32 %v532_v56, %v8571_v27  ;;  %v561_v7 = vpop.f32.mrf.mxu1  ;;  %v7759_v51 = vld [vmem:[#allocation6 + $0x34] sm:$0xf0]  ;;  %v7758_v56 = vld [vmem:[#allocation6 + $0x34] sm:$0xf] }
  0xcc   :  { %v6131_v35 = vor.u32 %v7759_v51, %v6130_v50  ;;  %v6135_v60 = vor.u32 %v7758_v56, %v6132_v6  ;;  %v6258_v51 = vld [vmem:[#allocation6 + $0x130] sm:$0xf] }
  0xcd   :  { %v618_v63 = vadd.f32 %v617_v31, %v589_v55  ;;  %v562_v0 = vadd.f32 %v561_v7, %v533_v59 }
  0xce   :  { %1805 = vmatpush.bf16.msrb.mxu0 %v6147_v22  ;;  %1894 = vmatpush.bf16.msrb.mxu3 %v6135_v60 }
  0xcf   :  { %vm696_vm1 = vcmp.ge.f32.partialorder %v618_v63, 0.0  ;;  %v720_v4 = vmul.f32 0.01, %v618_v63  ;;  %vm698_vm2 = vcmp.ge.f32.partialorder %v562_v0, 0.0  ;;  %v722_v38 = vmul.f32 0.01, %v562_v0  ;;  %1837 = vmatpush.bf16.msrb.mxu1 %v6187_v16 }
  0xd1   :  { %v744_v14 = vsel %vm696_vm1, %v618_v63, %v720_v4  ;;  %v746_v55 = vsel %vm698_vm2, %v562_v0, %v722_v38 }
  0xd2   :  { %v8584_v20 = vpack.c.bf16 %v744_v14, %v743_v11  ;;  %v590_v21 = vpop.f32.mrf.mxu2  ;;  %v535_v29 = vpop.f32.mrf.mxu0  ;;  %1806 = vmatpush.bf16.msrb.mxu0 %v6139_v45  ;;  %v6266_v11 = vld [vmem:[#allocation6 + $0x140] sm:$0xf]  ;;  %v7793_v14 = vld [vmem:[#allocation6 + $0x144] sm:$0xf0]  ;;  %1895 = vmatpush.bf16.msrb.mxu3 %v6127_v18 }
  0xd3   :  { %v591_v23 = vadd.f32 %v590_v21, %v8577_v47  ;;  %v619_v28 = vpop.f32.mrf.mxu3  ;;  %v536_v39 = vadd.f32 %v535_v29, %v8571_v27  ;;  %v564_v34 = vpop.f32.mrf.mxu1  ;;  %v6267_v22 = vor.u32 %v7793_v14, %v6266_v11  ;;  %v7771_v29 = vld [vmem:[#allocation6 + $0x94] sm:$0xf0] }
  0xd4   :  { %1413 = vst [vmem:[%s11153_s16] sm:$0xff] %v8584_v20 }
  0xd5   :  { %v620_v42 = vadd.f32 %v619_v28, %v591_v23  ;;  %1206 = vmatmul.bf16.gmra.mxu0 %v8517_v40  ;;  %v565_v31 = vadd.f32 %v564_v34, %v536_v39  ;;  %1864 = vmatpush.bf16.msrb.mxu2 %v6267_v22  ;;  %v6115_v28 = vor.u32 %v7755_v49, %v6114_v19  ;;  %v6106_v34 = vld [vmem:[#allocation6] sm:$0xf] }
  0xd6   :  { %1235 = vmatmul.bf16.gmra.mxu1 %v8519_v41  ;;  %1807 = vmatpush.bf16.msrb.mxu0 %v6131_v35  ;;  %v6179_v39 = vor.u32 %v7771_v29, %v6178_v12  ;;  %v6107_v56 = vor.u32 %v7753_v36, %v6106_v34  ;;  %v7752_v35 = vld [vmem:[#allocation6 + $0x4] sm:$0xf] }
  0xd7   :  { %vm699_vm3 = vcmp.ge.f32.partialorder %v620_v42, 0.0  ;;  %v723_v53 = vmul.f32 0.01, %v620_v42  ;;  %1264 = vmatmul.bf16.gmra.mxu2 %v8517_v40  ;;  %v6122_v40 = vld [vmem:[#allocation6 + $0x20] sm:$0xf]  ;;  %vm701_vm4 = vcmp.ge.f32.partialorder %v565_v31, 0.0 }
  0xd8   :  { %1293 = vmatmul.bf16.gmra.mxu3 %v8519_v41  ;;  %v725_v8 = vmul.f32 0.01, %v565_v31  ;;  %v6123_v10 = vor.u32 %v7757_v61, %v6122_v40  ;;  %1838 = vmatpush.bf16.msrb.mxu1 %v6179_v39  ;;  %v6111_v61 = vor.u32 %v7752_v35, %v6108_v58 }
  0xd9   :  { %v747_v57 = vsel %vm699_vm3, %v620_v42, %v723_v53  ;;  %v6119_v53 = vor.u32 %v7754_v30, %v6116_v32  ;;  %v6234_v30 = vld [vmem:[#allocation6 + $0x100] sm:$0xf]  ;;  %v7785_v32 = vld [vmem:[#allocation6 + $0x104] sm:$0xf0] }
  0xda   :  { %v8597_v59 = vpack.c.bf16 %v747_v57, %v746_v55  ;;  %v593_v7 = vpop.f32.mrf.mxu2  ;;  %v537_v41 = vpop.f32.mrf.mxu0  ;;  %v749_v13 = vsel %vm701_vm4, %v565_v31, %v725_v8  ;;  %1808 = vmatpush.bf16.msrb.mxu0 %v6123_v10  ;;  %v6259_v31 = vor.u32 %v7791_v52, %v6258_v51  ;;  %v6171_v57 = vor.u32 %v7769_v48, %v6170_v46  ;;  %v7787_v10 = vld [vmem:[#allocation6 + $0x114] sm:$0xf0]  ;;  %v6354_v52 = vld [vmem:[#allocation9 + $0x70] sm:$0xf] }
  0xdb   :  { %v594_v63 = vadd.f32 %v593_v7, %v8577_v47  ;;  %v622_v0 = vpop.f32.mrf.mxu3  ;;  %v538_v4 = vadd.f32 %v537_v41, %v8571_v27  ;;  %v566_v5 = vpop.f32.mrf.mxu1  ;;  %1896 = vmatpush.bf16.msrb.mxu3 %v6119_v53  ;;  %v7815_v53 = vld [vmem:[#allocation9 + $0x74] sm:$0xf0] }
  0xdc   :  { %1415 = vst [vmem:[%s11153_s16 + $0xc] sm:$0xff] %v8597_v59  ;;  %1865 = vmatpush.bf16.msrb.mxu2 %v6259_v31  ;;  %1839 = vmatpush.bf16.msrb.mxu1 %v6171_v57  ;;  %v1518_v31 = vunpack.c.l.b16 %v8597_v59  ;;  %v1519_v57 = vunpack.c.h.b16 %v8597_v59 }
  0xdd   :  { %v623_v9 = vadd.f32 %v622_v0, %v594_v63  ;;  %v567_v44 = vadd.f32 %v566_v5, %v538_v4 }
  0xde   :  { %1809 = vmatpush.bf16.msrb.mxu0 %v6115_v28 }
  0xdf   :  { %vm702_vm5 = vcmp.ge.f32.partialorder %v623_v9, 0.0  ;;  %v726_v21 = vmul.f32 0.01, %v623_v9  ;;  %v728_v37 = vmul.f32 0.01, %v567_v44  ;;  %vm704_vm6 = vcmp.ge.f32.partialorder %v567_v44, 0.0  ;;  %1897 = vmatpush.bf16.msrb.mxu3 %v6111_v61 }
  0xe1   :  { %v750_v23 = vsel %vm702_vm5, %v623_v9, %v726_v21  ;;  %v752_v7 = vsel %vm704_vm6, %v567_v44, %v728_v37  ;;  %v6242_v9 = vld [vmem:[#allocation6 + $0x110] sm:$0xf] }
  0xe2   :  { %v8606_v33 = vpack.c.bf16 %v750_v23, %v749_v13  ;;  %v595_v38 = vpop.f32.mrf.mxu2  ;;  %v540_v45 = vpop.f32.mrf.mxu0  ;;  %1810 = vmatpush.bf16.msrb.mxu0 %v6107_v56  ;;  %v6243_v14 = vor.u32 %v7787_v10, %v6242_v9  ;;  %v8649_v56 = vperm.slane %v8568_v26, 2  ;;  %v7831_v10 = vld [vmem:[#allocation9 + $0xf4] sm:$0xf0] }
  0xe3   :  { %v596_v42 = vadd.f32 %v595_v38, %v8577_v47  ;;  %v624_v43 = vpop.f32.mrf.mxu3  ;;  %v569_v50 = vpop.f32.mrf.mxu1  ;;  %v541_v55 = vadd.f32 %v540_v45, %v8571_v27  ;;  %v6235_v38 = vor.u32 %v7785_v32, %v6234_v30  ;;  %v7780_v30 = vld [vmem:[#allocation6 + $0xe4] sm:$0xf] }
  0xe4   :  { %1417 = vst [vmem:[%s11153_s16 + $0x18] sm:$0xff] %v8606_v33 }
  0xe5   :  { %v625_v54 = vadd.f32 %v624_v43, %v596_v42  ;;  %1211 = vmatmul.bf16.gmra.mxu0 %v8537_v15  ;;  %v570_v40 = vadd.f32 %v569_v50, %v541_v55 }
  0xe6   :  { %1240 = vmatmul.bf16.gmra.mxu1 %v8539_v17 }
  0xe7   :  { %vm705_vm7 = vcmp.ge.f32.partialorder %v625_v54, 0.0  ;;  %v729_v6 = vmul.f32 0.01, %v625_v54  ;;  %1269 = vmatmul.bf16.gmra.mxu2 %v8537_v15  ;;  %v731_v3 = vmul.f32 0.01, %v570_v40  ;;  %vm707_vm8 = vcmp.ge.f32.partialorder %v570_v40, 0.0 }
  0xe8   :  { %1298 = vmatmul.bf16.gmra.mxu3 %v8539_v17  ;;  %v6250_v17 = vld [vmem:[#allocation6 + $0x120] sm:$0xf] }
  0xe9   :  { %v753_v60 = vsel %vm705_vm7, %v625_v54, %v729_v6  ;;  %v6251_v8 = vor.u32 %v7789_v2, %v6250_v17  ;;  %v755_v16 = vsel %vm707_vm8, %v570_v40, %v731_v3  ;;  %v6355_v54 = vor.u32 %v7815_v53, %v6354_v52  ;;  %v6292_v2 = vld [vmem:[#allocation6 + $0x178] sm:$0xf0]  ;;  %v7782_v3 = vld [vmem:[#allocation6 + $0xf4] sm:$0xf] }
  0xea   :  { %v8619_v62 = vpack.c.bf16 %v753_v60, %v752_v7  ;;  %v598_v63 = vpop.f32.mrf.mxu2  ;;  %v542_v1 = vpop.f32.mrf.mxu0  ;;  %v1515_v7 = vunpack.c.l.b16 %v8584_v20  ;;  %v1516_v40 = vunpack.c.h.b16 %v8584_v20  ;;  %v7794_v52 = vld [vmem:[#allocation6 + $0x154] sm:$0xf] }
  0xeb   :  { %v599_v0 = vadd.f32 %v598_v63, %v8577_v47  ;;  %v627_v41 = vpop.f32.mrf.mxu3  ;;  %v571_v15 = vpop.f32.mrf.mxu1  ;;  %v543_v5 = vadd.f32 %v542_v1, %v8571_v27  ;;  %1866 = vmatpush.bf16.msrb.mxu2 %v6251_v8 }
  0xec   :  { %1419 = vst [vmem:[%s11153_s16 + $0x24] sm:$0xff] %v8619_v62  ;;  %v8664_v17 = vpack.c.b16 %v1519_v57, %v1516_v40 }
  0xed   :  { %v628_v4 = vadd.f32 %v627_v41, %v599_v0  ;;  %v572_v19 = vadd.f32 %v571_v15, %v543_v5  ;;  %v8662_v41 = vpack.c.b16 %v1518_v31, %v1515_v7  ;;  %v6418_v5 = vld [vmem:[#allocation9 + $0xf0] sm:$0xf]  ;;  %v1521_v7 = vunpack.c.l.b16 %v8606_v33 }
  0xef   :  { %vm708_vm9 = vcmp.ge.f32.partialorder %v628_v4, 0.0  ;;  %v732_v11 = vmul.f32 0.01, %v628_v4  ;;  %1867 = vmatpush.bf16.msrb.mxu2 %v6243_v14  ;;  %v734_v23 = vmul.f32 0.01, %v572_v19  ;;  %vm710_vm10 = vcmp.ge.f32.partialorder %v572_v19, 0.0 }
  0xf1   :  { %v756_v18 = vsel %vm708_vm9, %v628_v4, %v732_v11  ;;  %v758_v34 = vsel %vm710_vm10, %v572_v19, %v734_v23  ;;  %v6346_v19 = vld [vmem:[#allocation9 + $0x60] sm:$0xf] }
  0xf2   :  { %v8627_v21 = vpack.c.bf16 %v756_v18, %v755_v16  ;;  %v600_v44 = vpop.f32.mrf.mxu2  ;;  %v545_v12 = vpop.f32.mrf.mxu0  ;;  %v6419_v16 = vor.u32 %v7831_v10, %v6418_v5  ;;  %v6228_v18 = vld [vmem:[#allocation6 + $0xf8] sm:$0xf0] }
  0xf3   :  { %v601_v22 = vadd.f32 %v600_v44, %v8577_v47  ;;  %v629_v49 = vpop.f32.mrf.mxu3  ;;  %v574_v13 = vpop.f32.mrf.mxu1  ;;  %v546_v29 = vadd.f32 %v545_v12, %v8571_v27  ;;  %1868 = vmatpush.bf16.msrb.mxu2 %v6235_v38  ;;  %v7813_v44 = vld [vmem:[#allocation9 + $0x64] sm:$0xf0] }
  0xf4   :  { %1421 = vst [vmem:[%s11153_s16 + $0x30] sm:$0xff] %v8627_v21  ;;  %v6347_v23 = vor.u32 %v7813_v44, %v6346_v19  ;;  %2428 = vmatpush.bf16.msra.mxu3 %v6419_v16  ;;  %v7790_v19 = vld [vmem:[#allocation6 + $0x134] sm:$0xf] }
  0xf5   :  { %v630_v28 = vadd.f32 %v629_v49, %v601_v22  ;;  %1216 = vmatmul.bf16.gmra.mxu0 %v8557_v24  ;;  %v575_v37 = vadd.f32 %v574_v13, %v546_v29  ;;  %v6231_v13 = vor.u32 %v7782_v3, %v6228_v18  ;;  %v6284_v29 = vld [vmem:[#allocation6 + $0x168] sm:$0xf0]  ;;  %v6402_v18 = vld [vmem:[#allocation9 + $0xd0] sm:$0xf] }
  0xf6   :  { %1245 = vmatmul.bf16.gmra.mxu1 %v8559_v25 }
  0xf7   :  { %vm711_vm11 = vcmp.ge.f32.partialorder %v630_v28, 0.0  ;;  %v735_v39 = vmul.f32 0.01, %v630_v28  ;;  %1274 = vmatmul.bf16.gmra.mxu2 %v8557_v24  ;;  %v737_v24 = vmul.f32 0.01, %v575_v37  ;;  %vm713_vm12 = vcmp.ge.f32.partialorder %v575_v37, 0.0  ;;  %1919 = vmatpush.bf16.msra.mxu0 %v6231_v13 }
  0xf8   :  { %1303 = vmatmul.bf16.gmra.mxu3 %v8559_v25  ;;  %2399 = vmatpush.bf16.msra.mxu2 %v6355_v54  ;;  %v6276_v54 = vld [vmem:[#allocation6 + $0x158] sm:$0xf0] }
  0xf9   :  { %v759_v36 = vsel %vm711_vm11, %v630_v28, %v735_v39  ;;  %v761_v35 = vsel %vm713_vm12, %v575_v37, %v737_v24  ;;  %v7796_v28 = vld [vmem:[#allocation6 + $0x164] sm:$0xf]  ;;  %v6279_v57 = vor.u32 %v7794_v52, %v6276_v54  ;;  %v7825_v54 = vld [vmem:[#allocation9 + $0xc4] sm:$0xf0] }
  0xfa   :  { %v8639_v42 = vpack.c.bf16 %v759_v36, %v758_v34  ;;  %v603_v43 = vpop.f32.mrf.mxu2  ;;  %v547_v48 = vpop.f32.mrf.mxu0  ;;  %v6287_v34 = vor.u32 %v7796_v28, %v6284_v29  ;;  %v6220_v36 = vld [vmem:[#allocation6 + $0xe8] sm:$0xf0]  ;;  %v6330_v28 = vld [vmem:[#allocation9 + $0x40] sm:$0xf]  ;;  %v7809_v29 = vld [vmem:[#allocation9 + $0x44] sm:$0xf0] }
  0xfb   :  { %v604_v45 = vadd.f32 %v603_v43, %v8577_v47  ;;  %v632_v46 = vpop.f32.mrf.mxu3  ;;  %v576_v50 = vpop.f32.mrf.mxu1  ;;  %v548_v25 = vadd.f32 %v547_v48, %v8571_v27  ;;  %v7829_v48 = vld [vmem:[#allocation9 + $0xe4] sm:$0xf0] }
  0xfc   :  { %1423 = vst [vmem:[%s11153_s16 + $0x3c] sm:$0xff] %v8639_v42  ;;  %2400 = vmatpush.bf16.msra.mxu2 %v6347_v23 }
  0xfd   :  { %v633_v51 = vadd.f32 %v632_v46, %v604_v45  ;;  %v577_v6 = vadd.f32 %v576_v50, %v548_v25  ;;  %v6223_v45 = vor.u32 %v7780_v30, %v6220_v36  ;;  %v6410_v46 = vld [vmem:[#allocation9 + $0xe0] sm:$0xf]  ;;  %v7811_v25 = vld [vmem:[#allocation9 + $0x54] sm:$0xf0]  ;;  %v6260_v30 = vld [vmem:[#allocation6 + $0x138] sm:$0xf0] }
  0xfe   :  { %v6411_v24 = vor.u32 %v7829_v48, %v6410_v46  ;;  %v6263_v36 = vor.u32 %v7790_v19, %v6260_v30 }
  0xff   :  { %vm714_vm13 = vcmp.ge.f32.partialorder %v633_v51, 0.0  ;;  %v738_v55 = vmul.f32 0.01, %v633_v51  ;;  %vm716_vm14 = vcmp.ge.f32.partialorder %v577_v6, 0.0  ;;  %v740_v1 = vmul.f32 0.01, %v577_v6  ;;  %1920 = vmatpush.bf16.msra.mxu0 %v6223_v45 }
 0x100   :  { %2429 = vmatpush.bf16.msra.mxu3 %v6411_v24  ;;  %v7788_v45 = vld [vmem:[#allocation6 + $0x124] sm:$0xf]  ;;  %v6252_v24 = vld [vmem:[#allocation6 + $0x128] sm:$0xf0] }
 0x101   :  { %v762_v58 = vsel %vm714_vm13, %v633_v51, %v738_v55  ;;  %v764_v11 = vsel %vm716_vm14, %v577_v6, %v740_v1  ;;  %v6338_v51 = vld [vmem:[#allocation9 + $0x50] sm:$0xf]  ;;  %v1524_v55 = vunpack.c.l.b16 %v8619_v62  ;;  %v6212_v6 = vld [vmem:[#allocation6 + $0xd8] sm:$0xf0] }
 0x102   :  { %v8653_v27 = vpack.c.bf16 %v762_v58, %v761_v35  ;;  %v605_v60 = vpop.f32.mrf.mxu2  ;;  %v646_v0 = vpop.f32.mrf.mxu0  ;;  %v6339_v53 = vor.u32 %v7811_v25, %v6338_v51  ;;  %v7778_v35 = vld [vmem:[#allocation6 + $0xd4] sm:$0xf]  ;;  %v1525_v58 = vunpack.c.h.b16 %v8619_v62 }
 0x103   :  { %v606_v61 = vadd.f32 %v605_v60, %v8577_v47  ;;  %v634_v63 = vpop.f32.mrf.mxu3  ;;  %v647_v26 = vadd.f32 %v646_v0, %v8649_v56  ;;  %v675_v59 = vpop.f32.mrf.mxu1  ;;  %v7798_v47 = vld [vmem:[#allocation6 + $0x174] sm:$0xf]  ;;  %v6204_v0 = vld [vmem:[#allocation6 + $0xc8] sm:$0xf0]  ;;  %v8692_v62 = vpack.c.b16 %v1524_v55, %v1521_v7  ;;  %v6255_v55 = vor.u32 %v7788_v45, %v6252_v24  ;;  %v7805_v45 = vld [vmem:[#allocation9 + $0x24] sm:$0xf0] }
 0x104   :  { %1425 = vst [vmem:[%s11153_s16 + $0x48] sm:$0xff] %v8653_v27  ;;  %v6295_v8 = vor.u32 %v7798_v47, %v6292_v2  ;;  %2401 = vmatpush.bf16.msra.mxu2 %v6339_v53  ;;  %v6268_v47 = vld [vmem:[#allocation6 + $0x148] sm:$0xf0]  ;;  %v6394_v53 = vld [vmem:[#allocation9 + $0xc0] sm:$0xf] }
 0x105   :  { %v635_v15 = vadd.f32 %v634_v63, %v606_v61  ;;  %v676_v20 = vadd.f32 %v675_v59, %v647_v26  ;;  %1811 = vmatmul.bf16.vlgmr.msrb.gmra.mxu0 %v8662_v41  ;;  %v6215_v61 = vor.u32 %v7778_v35, %v6212_v6  ;;  %v7776_v63 = vld [vmem:[#allocation6 + $0xc4] sm:$0xf]  ;;  %v1522_v59 = vunpack.c.h.b16 %v8606_v33  ;;  %v6322_v35 = vld [vmem:[#allocation9 + $0x30] sm:$0xf]  ;;  %v7770_v6 = vld [vmem:[#allocation6 + $0x94] sm:$0xf] }
 0x106   :  { %1840 = vmatmul.bf16.vlgmr.msrb.gmra.mxu1 %v8664_v17  ;;  %v7792_v26 = vld [vmem:[#allocation6 + $0x144] sm:$0xf] }
 0x107   :  { %vm717_vm15 = vcmp.ge.f32.partialorder %v635_v15, 0.0  ;;  %v741_v4 = vmul.f32 0.01, %v635_v15  ;;  %vm697_vm0 = vcmp.ge.f32.partialorder %v676_v20, 0.0  ;;  %v721_v9 = vmul.f32 0.01, %v676_v20  ;;  %1948 = vmatpush.bf16.msra.mxu1 %v6295_v8  ;;  %1921 = vmatpush.bf16.msra.mxu0 %v6215_v61 }
 0x108   :  { %1898 = vmatmul.bf16.vlgmr.msrb.gmra.mxu3 %v8662_v41  ;;  %v6271_v5 = vor.u32 %v7792_v26, %v6268_v47  ;;  %v8695_v8 = vpack.c.b16 %v1525_v58, %v1522_v59  ;;  %v7807_v58 = vld [vmem:[#allocation9 + $0x34] sm:$0xf0]  ;;  %v1530_v61 = vunpack.c.l.b16 %v8639_v42  ;;  %v7786_v26 = vld [vmem:[#allocation6 + $0x114] sm:$0xf]  ;;  %v1531_v59 = vunpack.c.h.b16 %v8639_v42 }
 0x109   :  { %v765_v14 = vsel %vm717_vm15, %v635_v15, %v741_v4  ;;  %v745_v49 = vsel %vm697_vm0, %v676_v20, %v721_v9  ;;  %v6207_v4 = vor.u32 %v7776_v63, %v6204_v0  ;;  %v6323_v7 = vor.u32 %v7807_v58, %v6322_v35  ;;  %v6306_v58 = vld [vmem:[#allocation9 + $0x10] sm:$0xf] }
 0x10a   :  { %v8670_v22 = vpack.c.bf16 %v765_v14, %v764_v11  ;;  %v8672_v12 = vpop.f32.mrf.mxu2  ;;  %v1382_v32 = vpack.c.bf16 %v745_v49, %v745_v49  ;;  %v648_v39 = vpop.f32.mrf.mxu0  ;;  %v7774_v11 = vld [vmem:[#allocation6 + $0xb4] sm:$0xf]  ;;  %v6196_v14 = vld [vmem:[#allocation6 + $0xb8] sm:$0xf0]  ;;  %v7827_v49 = vld [vmem:[#allocation9 + $0xd4] sm:$0xf0] }
 0x10b   :  { %v8674_v38 = vpop.f32.mrf.mxu3  ;;  %v649_v37 = vadd.f32 %v648_v39, %v8649_v56  ;;  %v677_v43 = vpop.f32.mrf.mxu1  ;;  %1949 = vmatpush.bf16.msra.mxu1 %v6287_v34  ;;  %1922 = vmatpush.bf16.msra.mxu0 %v6207_v4  ;;  %v6199_v13 = vor.u32 %v7774_v11, %v6196_v14  ;;  %v6403_v23 = vor.u32 %v7827_v49, %v6402_v18  ;;  %v7768_v4 = vld [vmem:[#allocation6 + $0x84] sm:$0xf]  ;;  %v6236_v18 = vld [vmem:[#allocation6 + $0x108] sm:$0xf0] }
 0x10c   :  { %1427 = vst [vmem:[%s11153_s16 + $0x54] sm:$0xff] %v8670_v22  ;;  %v1517_v9 = vunpack.c.l.b16 %v1382_v32  ;;  %v6331_v34 = vor.u32 %v7809_v29, %v6330_v28 }
 0x10d   :  { %1414 = vst [vmem:[%s11153_s16 + $0x8] sm:$0xf] %v1382_v32  ;;  %v678_v50 = vadd.f32 %v677_v43, %v649_v37  ;;  %v7772_v37 = vld [vmem:[#allocation6 + $0xa4] sm:$0xf]  ;;  %v6188_v43 = vld [vmem:[#allocation6 + $0xa8] sm:$0xf0]  ;;  %2430 = vmatpush.bf16.msra.mxu3 %v6403_v23 }
 0x10e   :  { %2402 = vmatpush.bf16.msra.mxu2 %v6331_v34  ;;  %v6191_v52 = vor.u32 %v7772_v37, %v6188_v43  ;;  %v6314_v43 = vld [vmem:[#allocation9 + $0x20] sm:$0xf] }
 0x10f   :  { %vm700_vm1 = vcmp.ge.f32.partialorder %v678_v50, 0.0  ;;  %v724_v31 = vmul.f32 0.01, %v678_v50  ;;  %1950 = vmatpush.bf16.msra.mxu1 %v6279_v57  ;;  %1923 = vmatpush.bf16.msra.mxu0 %v6199_v13  ;;  %v6395_v57 = vor.u32 %v7825_v54, %v6394_v53  ;;  %v6315_v24 = vor.u32 %v7805_v45, %v6314_v43 }
 0x111   :  { %v748_v60 = vsel %vm700_vm1, %v678_v50, %v724_v31  ;;  %2431 = vmatpush.bf16.msra.mxu3 %v6395_v57 }
 0x112   :  { %v8687_v40 = vpop.f32.mrf.mxu2  ;;  %v1384_v1 = vpack.c.bf16 %v748_v60, %v748_v60  ;;  %v651_v20 = vpop.f32.mrf.mxu0  ;;  %v6180_v60 = vld [vmem:[#allocation6 + $0x98] sm:$0xf0]  ;;  %2403 = vmatpush.bf16.msra.mxu2 %v6323_v7 }
 0x113   :  { %v8690_v15 = vpop.f32.mrf.mxu3  ;;  %v652_v2 = vadd.f32 %v651_v20, %v8649_v56  ;;  %v680_v3 = vpop.f32.mrf.mxu1  ;;  %1951 = vmatpush.bf16.msra.mxu1 %v6271_v5  ;;  %1924 = vmatpush.bf16.msra.mxu0 %v6191_v52  ;;  %v6183_v0 = vor.u32 %v7770_v6, %v6180_v60  ;;  %v1527_v20 = vunpack.c.l.b16 %v8627_v21  ;;  %v6172_v5 = vld [vmem:[#allocation6 + $0x88] sm:$0xf0]  ;;  %v7803_v6 = vld [vmem:[#allocation9 + $0x14] sm:$0xf0]  ;;  %v1536_v60 = vunpack.c.l.b16 %v8670_v22 }
 0x114   :  { %1416 = vst [vmem:[%s11153_s16 + $0x14] sm:$0xf] %v1384_v1  ;;  %v1520_v33 = vunpack.c.l.b16 %v1384_v1  ;;  %v6244_v1 = vld [vmem:[#allocation6 + $0x118] sm:$0xf0]  ;;  %v6175_v49 = vor.u32 %v7768_v4, %v6172_v5  ;;  %v6307_v7 = vor.u32 %v7803_v6, %v6306_v58 }
 0x115   :  { %v681_v10 = vadd.f32 %v680_v3, %v652_v2  ;;  %1816 = vmatmul.bf16.gmra.mxu0 %v8692_v62  ;;  %v6247_v3 = vor.u32 %v7786_v26, %v6244_v1  ;;  %v8722_v42 = vpack.c.b16 %v1530_v61, %v1527_v20  ;;  %v7819_v26 = vld [vmem:[#allocation9 + $0x94] sm:$0xf0] }
 0x116   :  { %v8701_v16 = vpack.c.b16 %v1520_v33, %v1517_v9  ;;  %1845 = vmatmul.bf16.gmra.mxu1 %v8695_v8  ;;  %v7784_v9 = vld [vmem:[#allocation6 + $0x104] sm:$0xf]  ;;  %v1528_v33 = vunpack.c.h.b16 %v8627_v21  ;;  %2404 = vmatpush.bf16.msra.mxu2 %v6315_v24 }
 0x117   :  { %vm703_vm2 = vcmp.ge.f32.partialorder %v681_v10, 0.0  ;;  %v727_v44 = vmul.f32 0.01, %v681_v10  ;;  %1952 = vmatpush.bf16.msra.mxu1 %v6263_v36  ;;  %1925 = vmatpush.bf16.msra.mxu0 %v6183_v0  ;;  %v6239_v28 = vor.u32 %v7784_v9, %v6236_v18  ;;  %v7823_v36 = vld [vmem:[#allocation9 + $0xb4] sm:$0xf0] }
 0x118   :  { %1903 = vmatmul.bf16.gmra.mxu3 %v8692_v62  ;;  %1869 = vmatmul.bf16.vlgmr.msrb.gmra.mxu2 %v8701_v16  ;;  %v8725_v13 = vpack.c.b16 %v1531_v59, %v1528_v33  ;;  %v6370_v0 = vld [vmem:[#allocation9 + $0x90] sm:$0xf]  ;;  %v1533_v59 = vunpack.c.l.b16 %v8653_v27 }
 0x119   :  { %v751_v32 = vsel %vm703_vm2, %v681_v10, %v727_v44 }
 0x11a   :  { %v8706_v39 = vpop.f32.mrf.mxu2  ;;  %v1386_v46 = vpack.c.bf16 %v751_v32, %v751_v32  ;;  %v653_v50 = vpop.f32.mrf.mxu0  ;;  %v6386_v32 = vld [vmem:[#allocation9 + $0xb0] sm:$0xf]  ;;  %2405 = vmatpush.bf16.msra.mxu2 %v6307_v7 }
 0x11b   :  { %v8708_v48 = vpop.f32.mrf.mxu3  ;;  %v654_v51 = vadd.f32 %v653_v50, %v8649_v56  ;;  %v682_v25 = vpop.f32.mrf.mxu1  ;;  %1953 = vmatpush.bf16.msra.mxu1 %v6255_v55  ;;  %1926 = vmatpush.bf16.msra.mxu0 %v6175_v49  ;;  %v6387_v37 = vor.u32 %v7823_v36, %v6386_v32  ;;  %v6378_v55 = vld [vmem:[#allocation9 + $0xa0] sm:$0xf] }
 0x11c   :  { %1418 = vst [vmem:[%s11153_s16 + $0x20] sm:$0xf] %v1386_v46  ;;  %v1523_v23 = vunpack.c.l.b16 %v1386_v46 }
 0x11d   :  { %v683_v31 = vadd.f32 %v682_v25, %v654_v51  ;;  %2432 = vmatpush.bf16.msra.mxu3 %v6387_v37 }
 0x11f   :  { %vm706_vm3 = vcmp.ge.f32.partialorder %v683_v31, 0.0  ;;  %v730_v63 = vmul.f32 0.01, %v683_v31  ;;  %1954 = vmatpush.bf16.msra.mxu1 %v6247_v3  ;;  %v1534_v3 = vunpack.c.h.b16 %v8653_v27  ;;  %v7801_v27 = vld [vmem:[#allocation9 + $0x4] sm:$0xf0] }
 0x121   :  { %v754_v47 = vsel %vm706_vm3, %v683_v31, %v730_v63  ;;  %v7821_v31 = vld [vmem:[#allocation9 + $0xa4] sm:$0xf0]  ;;  %v1537_v63 = vunpack.c.h.b16 %v8670_v22 }
 0x122   :  { %v8717_v2 = vpop.f32.mrf.mxu2  ;;  %v1388_v10 = vpack.c.bf16 %v754_v47, %v754_v47  ;;  %v656_v14 = vpop.f32.mrf.mxu0  ;;  %v6379_v35 = vor.u32 %v7821_v31, %v6378_v55  ;;  %v6371_v47 = vor.u32 %v7819_v26, %v6370_v0  ;;  %v6420_v55 = vld [vmem:[#allocation9 + $0xf8] sm:$0xf0] }
 0x123   :  { %v8720_v11 = vpop.f32.mrf.mxu3  ;;  %v657_v19 = vadd.f32 %v656_v14, %v8649_v56  ;;  %v685_v44 = vpop.f32.mrf.mxu1  ;;  %1955 = vmatpush.bf16.msra.mxu1 %v6239_v28  ;;  %v8753_v14 = vpack.c.b16 %v1536_v60, %v1533_v59  ;;  %v7817_v28 = vld [vmem:[#allocation9 + $0x84] sm:$0xf0] }
 0x124   :  { %1420 = vst [vmem:[%s11153_s16 + $0x2c] sm:$0xf] %v1388_v10  ;;  %v1526_v21 = vunpack.c.l.b16 %v1388_v10  ;;  %2433 = vmatpush.bf16.msra.mxu3 %v6379_v35 }
 0x125   :  { %v686_v29 = vadd.f32 %v685_v44, %v657_v19  ;;  %1821 = vmatmul.bf16.gmra.mxu0 %v8722_v42  ;;  %v8758_v19 = vpack.c.b16 %v1537_v63, %v1534_v3  ;;  %v6298_v44 = vld [vmem:[#allocation9] sm:$0xf] }
 0x126   :  { %v8731_v30 = vpack.c.b16 %v1526_v21, %v1523_v23  ;;  %1850 = vmatmul.bf16.gmra.mxu1 %v8725_v13  ;;  %v6299_v23 = vor.u32 %v7801_v27, %v6298_v44  ;;  %v6362_v21 = vld [vmem:[#allocation9 + $0x80] sm:$0xf] }
 0x127   :  { %vm709_vm4 = vcmp.ge.f32.partialorder %v686_v29, 0.0  ;;  %v733_v34 = vmul.f32 0.01, %v686_v29 }
 0x128   :  { %1908 = vmatmul.bf16.gmra.mxu3 %v8722_v42  ;;  %1874 = vmatmul.bf16.gmra.mxu2 %v8731_v30 }
 0x129   :  { %v757_v46 = vsel %vm709_vm4, %v686_v29, %v733_v34  ;;  %2434 = vmatpush.bf16.msra.mxu3 %v6371_v47  ;;  %v831_v29 = vld [vmem:[%s11148_s11] sm:$0x7]  ;;  %v6363_v34 = vor.u32 %v7817_v28, %v6362_v21  ;;  %2406 = vmatpush.bf16.msra.mxu2 %v6299_v23  ;;  %v7847_v28 = vld [vmem:[#allocation9 + $0x174] sm:$0xf0]  ;;  %s11193_s11 = sld [smem:[#allocation25_spill]] }
 0x12a   :  { %v8736_v50 = vpop.f32.mrf.mxu2  ;;  %v1390_v51 = vpack.c.bf16 %v757_v46, %v757_v46  ;;  %v658_v52 = vpop.f32.mrf.mxu0  ;;  %v8769_v37 = vperm.slane %v831_v29, 0  ;;  %v8781_v6 = vperm.slane %v831_v29, 1 }
 0x12b   :  { %v8738_v25 = vpop.f32.mrf.mxu3  ;;  %v659_v53 = vadd.f32 %v658_v52, %v8649_v56  ;;  %v687_v54 = vpop.f32.mrf.mxu1 }
 0x12c   :  { %1422 = vst [vmem:[%s11153_s16 + $0x38] sm:$0xf] %v1390_v51  ;;  %v1529_v22 = vunpack.c.l.b16 %v1390_v51  ;;  %v1145_v31 = vadd.f32 %v8672_v12, %v8769_v37  ;;  %v1147_v26 = vadd.f32 %v8687_v40, %v8769_v37  ;;  %v8798_v40 = vperm.slane %v831_v29, 2 }
 0x12d   :  { %v688_v57 = vadd.f32 %v687_v54, %v659_v53  ;;  %2435 = vmatpush.bf16.msra.mxu3 %v6363_v34  ;;  %v7830_v54 = vld [vmem:[#allocation9 + $0xf4] sm:$0xf]  ;;  %v1150_v23 = vadd.f32 %v8706_v39, %v8769_v37  ;;  %v7828_v34 = vld [vmem:[#allocation9 + $0xe4] sm:$0xf] }
 0x12e   :  { %v6423_v35 = vor.u32 %v7830_v54, %v6420_v55  ;;  %v1174_v7 = vadd.f32 %v8674_v38, %v1145_v31  ;;  %v1176_v44 = vadd.f32 %v8690_v15, %v1147_v26  ;;  %v7812_v15 = vld [vmem:[#allocation9 + $0x64] sm:$0xf]  ;;  %v6474_v54 = vld [vmem:[#allocation9 + $0x160] sm:$0xf] }
 0x12f   :  { %vm712_vm5 = vcmp.ge.f32.partialorder %v688_v57, 0.0  ;;  %v736_v61 = vmul.f32 0.01, %v688_v57  ;;  %v1179_v26 = vadd.f32 %v8708_v48, %v1150_v23  ;;  %v6466_v48 = vld [vmem:[#allocation9 + $0x150] sm:$0xf] }
 0x130   :  { %2515 = vmatpush.bf16.msrb.mxu2 %v6423_v35  ;;  %v1333_v38 = vmul.f32 0.01, %v1174_v7  ;;  %vm1309_vm8 = vcmp.ge.f32.partialorder %v1174_v7, 0.0  ;;  %vm1312_vm10 = vcmp.ge.f32.partialorder %v1176_v44, 0.0  ;;  %v7843_v23 = vld [vmem:[#allocation9 + $0x154] sm:$0xf0] }
 0x131   :  { %v760_v1 = vsel %vm712_vm5, %v688_v57, %v736_v61  ;;  %vm1315_vm13 = vcmp.ge.f32.partialorder %v1179_v26, 0.0 }
 0x132   :  { %v8747_v20 = vpop.f32.mrf.mxu2  ;;  %v1392_v4 = vpack.c.bf16 %v760_v1, %v760_v1  ;;  %v661_v9 = vpop.f32.mrf.mxu0  ;;  %v1357_v29 = vsel %vm1309_vm8, %v1174_v7, %v1333_v38 }
 0x133   :  { %v8750_v5 = vpop.f32.mrf.mxu3  ;;  %v662_v33 = vadd.f32 %v661_v9, %v8649_v56  ;;  %v690_v10 = vpop.f32.mrf.mxu1  ;;  %v6356_v9 = vld [vmem:[#allocation9 + $0x78] sm:$0xf0] }
 0x134   :  { %1424 = vst [vmem:[%s11153_s16 + $0x44] sm:$0xf] %v1392_v4  ;;  %v1532_v18 = vunpack.c.l.b16 %v1392_v4  ;;  %v7814_v4 = vld [vmem:[#allocation9 + $0x74] sm:$0xf] }
 0x135   :  { %v691_v49 = vadd.f32 %v690_v10, %v662_v33  ;;  %1826 = vmatmul.bf16.gmra.mxu0 %v8753_v14  ;;  %v7846_v10 = vld [vmem:[#allocation9 + $0x174] sm:$0xf] }
 0x136   :  { %v8764_v32 = vpack.c.b16 %v1532_v18, %v1529_v22  ;;  %1855 = vmatmul.bf16.gmra.mxu1 %v8758_v19  ;;  %v6359_v22 = vor.u32 %v7814_v4, %v6356_v9  ;;  %v6482_v18 = vld [vmem:[#allocation9 + $0x170] sm:$0xf]  ;;  %v6404_v4 = vld [vmem:[#allocation9 + $0xd8] sm:$0xf0]  ;;  %v7810_v9 = vld [vmem:[#allocation9 + $0x54] sm:$0xf] }
 0x137   :  { %vm715_vm6 = vcmp.ge.f32.partialorder %v691_v49, 0.0  ;;  %v739_v36 = vmul.f32 0.01, %v691_v49 }
 0x138   :  { %1913 = vmatmul.bf16.gmra.mxu3 %v8753_v14  ;;  %1879 = vmatmul.bf16.gmra.mxu2 %v8764_v32 }
 0x139   :  { %v763_v43 = vsel %vm715_vm6, %v691_v49, %v739_v36  ;;  %v6484_v49 = vld [vmem:[#allocation9 + $0x178] sm:$0xf0]  ;;  %2486 = vmatpush.bf16.msrb.mxu1 %v6359_v22  ;;  %v6412_v36 = vld [vmem:[#allocation9 + $0xe8] sm:$0xf0] }
 0x13a   :  { %v8771_v45 = vpop.f32.mrf.mxu2  ;;  %v1394_v46 = vpack.c.bf16 %v763_v43, %v763_v43  ;;  %v663_v51 = vpop.f32.mrf.mxu0  ;;  %v6487_v21 = vor.u32 %v7846_v10, %v6484_v49  ;;  %v6340_v10 = vld [vmem:[#allocation9 + $0x58] sm:$0xf0] }
 0x13b   :  { %v8773_v24 = vpop.f32.mrf.mxu3  ;;  %v664_v52 = vadd.f32 %v663_v51, %v8649_v56  ;;  %v692_v53 = vpop.f32.mrf.mxu1  ;;  %v6483_v51 = vor.u32 %v7847_v28, %v6482_v18 }
 0x13c   :  { %1426 = vst [vmem:[%s11153_s16 + $0x50] sm:$0xf] %v1394_v46  ;;  %v1535_v1 = vunpack.c.l.b16 %v1394_v46  ;;  %2544 = vmatpush.bf16.msrb.mxu3 %v6487_v21  ;;  %v1339_v21 = vmul.f32 0.01, %v1179_v26 }
 0x13d   :  { %v693_v57 = vadd.f32 %v692_v53, %v664_v52  ;;  %v6415_v52 = vor.u32 %v7828_v34, %v6412_v36  ;;  %v6348_v53 = vld [vmem:[#allocation9 + $0x68] sm:$0xf0]  ;;  %2457 = vmatpush.bf16.msrb.mxu0 %v6483_v51  ;;  %v6467_v34 = vor.u32 %v7843_v23, %v6466_v48  ;;  %v6458_v51 = vld [vmem:[#allocation9 + $0x140] sm:$0xf] }
 0x13e   :  { %v6351_v35 = vor.u32 %v7812_v15, %v6348_v53  ;;  %v7808_v15 = vld [vmem:[#allocation9 + $0x44] sm:$0xf]  ;;  %v1152_v53 = vadd.f32 %v8717_v2, %v8769_v37 }
 0x13f   :  { %vm718_vm7 = vcmp.ge.f32.partialorder %v693_v57, 0.0  ;;  %v742_v58 = vmul.f32 0.01, %v693_v57  ;;  %2516 = vmatpush.bf16.msrb.mxu2 %v6415_v52  ;;  %v7841_v52 = vld [vmem:[#allocation9 + $0x144] sm:$0xf0] }
 0x140   :  { %2487 = vmatpush.bf16.msrb.mxu1 %v6351_v35  ;;  %v6332_v35 = vld [vmem:[#allocation9 + $0x48] sm:$0xf0] }
 0x141   :  { %v766_v56 = vsel %vm718_vm7, %v693_v57, %v742_v58  ;;  %v7845_v58 = vld [vmem:[#allocation9 + $0x164] sm:$0xf0] }
 0x142   :  { %v8784_v60 = vpop.f32.mrf.mxu2  ;;  %v1396_v61 = vpack.c.bf16 %v766_v56, %v766_v56  ;;  %v1202_v0 = vpop.f32.mrf.mxu0  ;;  %v1336_v56 = vmul.f32 0.01, %v1176_v44 }
 0x143   :  { %v8786_v63 = vpop.f32.mrf.mxu3  ;;  %v1203_v12 = vadd.f32 %v1202_v0, %v8781_v6  ;;  %v1231_v59 = vpop.f32.mrf.mxu1  ;;  %v6475_v0 = vor.u32 %v7845_v58, %v6474_v54 }
 0x144   :  { %1428 = vst [vmem:[%s11153_s16 + $0x5c] sm:$0xf] %v1396_v61  ;;  %v1538_v47 = vunpack.c.l.b16 %v1396_v61  ;;  %v1360_v36 = vsel %vm1312_vm10, %v1176_v44, %v1336_v56 }
 0x145   :  { %v1232_v3 = vadd.f32 %v1231_v59, %v1203_v12  ;;  %1927 = vmatmul.bf16.vlgmr.msra.gmra.mxu0 %v8664_v17  ;;  %v7844_v59 = vld [vmem:[#allocation9 + $0x164] sm:$0xf] }
 0x146   :  { %v8795_v33 = vpack.c.b16 %v1538_v47, %v1535_v1  ;;  %1956 = vmatmul.bf16.vlgmr.msra.gmra.mxu1 %v8701_v16  ;;  %v6476_v1 = vld [vmem:[#allocation9 + $0x168] sm:$0xf0]  ;;  %v7826_v47 = vld [vmem:[#allocation9 + $0xd4] sm:$0xf]  ;;  %2458 = vmatpush.bf16.msrb.mxu0 %v6475_v0 }
 0x147   :  { %vm1310_vm9 = vcmp.ge.f32.partialorder %v1232_v3, 0.0  ;;  %v1334_v27 = vmul.f32 0.01, %v1232_v3  ;;  %v6407_v18 = vor.u32 %v7826_v47, %v6404_v4  ;;  %v1363_v47 = vsel %vm1315_vm13, %v1179_v26, %v1339_v21  ;;  %v7806_v4 = vld [vmem:[#allocation9 + $0x34] sm:$0xf] }
 0x148   :  { %1884 = vmatmul.bf16.gmra.mxu2 %v8795_v33  ;;  %v6468_v26 = vld [vmem:[#allocation9 + $0x158] sm:$0xf0] }
 0x149   :  { %v1358_v43 = vsel %vm1310_vm9, %v1232_v3, %v1334_v27  ;;  %v6479_v3 = vor.u32 %v7844_v59, %v6476_v1  ;;  %v6343_v27 = vor.u32 %v7810_v9, %v6340_v10  ;;  %2517 = vmatpush.bf16.msrb.mxu2 %v6407_v18  ;;  %v1181_v18 = vadd.f32 %v8720_v11, %v1152_v53  ;;  %v7837_v53 = vld [vmem:[#allocation9 + $0x124] sm:$0xf0] }
 0x14a   :  { %v1260_v46 = vpop.f32.mrf.mxu2  ;;  %v8805_v55 = vpack.c.bf16 %v1358_v43, %v1357_v29  ;;  %v1204_v39 = vpop.f32.mrf.mxu0  ;;  %2459 = vmatpush.bf16.msrb.mxu0 %v6467_v34  ;;  %v6396_v34 = vld [vmem:[#allocation9 + $0xc8] sm:$0xf0] }
 0x14b   :  { %v1289_v31 = vpop.f32.mrf.mxu3  ;;  %v1261_v57 = vadd.f32 %v1260_v46, %v8798_v40  ;;  %v1205_v7 = vadd.f32 %v1204_v39, %v8781_v6  ;;  %v1233_v61 = vpop.f32.mrf.mxu1  ;;  %2545 = vmatpush.bf16.msrb.mxu3 %v6479_v3  ;;  %2488 = vmatpush.bf16.msrb.mxu1 %v6343_v27  ;;  %v7839_v3 = vld [vmem:[#allocation9 + $0x134] sm:$0xf0]  ;;  %vm1318_vm0 = vcmp.ge.f32.partialorder %v1181_v18, 0.0 }
 0x14c   :  { %1429 = vst [vmem:[%s11154_s17] sm:$0xff] %v8805_v55  ;;  %v2111_v58 = vunpack.c.l.b16 %v8805_v55  ;;  %v2112_v2 = vunpack.c.h.b16 %v8805_v55 }
 0x14d   :  { %v1290_v12 = vadd.f32 %v1289_v31, %v1261_v57  ;;  %v1234_v38 = vadd.f32 %v1233_v61, %v1205_v7  ;;  %v6459_v7 = vor.u32 %v7841_v52, %v6458_v51  ;;  %v6335_v61 = vor.u32 %v7808_v15, %v6332_v35  ;;  %v6442_v15 = vld [vmem:[#allocation9 + $0x120] sm:$0xf]  ;;  %v6316_v35 = vld [vmem:[#allocation9 + $0x28] sm:$0xf0] }
 0x14f   :  { %vm1311_vm11 = vcmp.ge.f32.partialorder %v1290_v12, 0.0  ;;  %v1335_v22 = vmul.f32 0.01, %v1290_v12  ;;  %vm1313_vm12 = vcmp.ge.f32.partialorder %v1234_v38, 0.0  ;;  %v1337_v49 = vmul.f32 0.01, %v1234_v38  ;;  %2489 = vmatpush.bf16.msrb.mxu1 %v6335_v61  ;;  %2460 = vmatpush.bf16.msrb.mxu0 %v6459_v7 }
 0x150   :  { %v6443_v7 = vor.u32 %v7837_v53, %v6442_v15 }
 0x151   :  { %v1359_v28 = vsel %vm1311_vm11, %v1290_v12, %v1335_v22  ;;  %v1361_v29 = vsel %vm1313_vm12, %v1234_v38, %v1337_v49  ;;  %v6450_v38 = vld [vmem:[#allocation9 + $0x130] sm:$0xf]  ;;  %v7842_v22 = vld [vmem:[#allocation9 + $0x154] sm:$0xf]  ;;  %v1155_v49 = vadd.f32 %v8736_v50, %v8769_v37 }
 0x152   :  { %v8815_v43 = vpack.c.bf16 %v1359_v28, %v1359_v28  ;;  %v1262_v46 = vpop.f32.mrf.mxu2  ;;  %v1399_v54 = vpack.c.bf16 %v1361_v29, %v1360_v36  ;;  %v1207_v39 = vpop.f32.mrf.mxu0  ;;  %v6451_v48 = vor.u32 %v7839_v3, %v6450_v38  ;;  %v6471_v21 = vor.u32 %v7842_v22, %v6468_v26  ;;  %v7824_v28 = vld [vmem:[#allocation9 + $0xc4] sm:$0xf]  ;;  %v6324_v36 = vld [vmem:[#allocation9 + $0x38] sm:$0xf0]  ;;  %v7822_v38 = vld [vmem:[#allocation9 + $0xb4] sm:$0xf] }
 0x153   :  { %v1291_v31 = vpop.f32.mrf.mxu3  ;;  %v1263_v57 = vadd.f32 %v1262_v46, %v8798_v40  ;;  %v1208_v44 = vadd.f32 %v1207_v39, %v8781_v6  ;;  %v1236_v56 = vpop.f32.mrf.mxu1  ;;  %v6399_v51 = vor.u32 %v7824_v28, %v6396_v34  ;;  %v6327_v52 = vor.u32 %v7806_v4, %v6324_v36  ;;  %v6388_v3 = vld [vmem:[#allocation9 + $0xb8] sm:$0xf0]  ;;  %v6434_v4 = vld [vmem:[#allocation9 + $0x110] sm:$0xf] }
 0x154   :  { %1430 = vst [vmem:[%s11154_s17 + $0x8] sm:$0xf] %v8815_v43  ;;  %v2114_v0 = vunpack.c.l.b16 %v1399_v54  ;;  %v2115_v12 = vunpack.c.h.b16 %v1399_v54  ;;  %2546 = vmatpush.bf16.msrb.mxu3 %v6471_v21  ;;  %2461 = vmatpush.bf16.msrb.mxu0 %v6451_v48  ;;  %v6391_v22 = vor.u32 %v7822_v38, %v6388_v3  ;;  %v7820_v38 = vld [vmem:[#allocation9 + $0xa4] sm:$0xf]  ;;  %v6380_v3 = vld [vmem:[#allocation9 + $0xa8] sm:$0xf0] }
 0x155   :  { %1431 = vst [vmem:[%s11154_s17 + $0xc] sm:$0xff] %v1399_v54  ;;  %v1292_v59 = vadd.f32 %v1291_v31, %v1263_v57  ;;  %v1237_v1 = vadd.f32 %v1236_v56, %v1208_v44  ;;  %1932 = vmatmul.bf16.gmra.mxu0 %v8695_v8  ;;  %v7804_v54 = vld [vmem:[#allocation9 + $0x24] sm:$0xf]  ;;  %2518 = vmatpush.bf16.msrb.mxu2 %v6399_v51  ;;  %v7833_v51 = vld [vmem:[#allocation9 + $0x104] sm:$0xf0] }
 0x156   :  { %1961 = vmatmul.bf16.gmra.mxu1 %v8731_v30  ;;  %v8833_v9 = vpack.c.b16 %v2114_v0, %v2111_v58  ;;  %v8835_v55 = vpack.c.b16 %v2115_v12, %v2112_v2  ;;  %v1342_v58 = vmul.f32 0.01, %v1181_v18  ;;  %v7840_v2 = vld [vmem:[#allocation9 + $0x144] sm:$0xf]  ;;  %v6460_v0 = vld [vmem:[#allocation9 + $0x148] sm:$0xf0]  ;;  %v6319_v12 = vor.u32 %v7804_v54, %v6316_v35 }
 0x157   :  { %vm1314_vm14 = vcmp.ge.f32.partialorder %v1292_v59, 0.0  ;;  %v1338_v10 = vmul.f32 0.01, %v1292_v59  ;;  %vm1316_vm15 = vcmp.ge.f32.partialorder %v1237_v1, 0.0  ;;  %v1340_v27 = vmul.f32 0.01, %v1237_v1  ;;  %2490 = vmatpush.bf16.msrb.mxu1 %v6327_v52 }
 0x158   :  { %11187 = vst [vmem:[#allocation13_spill] sm:$0xff] %v8833_v9  ;;  %2407 = vmatmul.bf16.vlgmr.msra.gmra.mxu2 %v8833_v9  ;;  %2436 = vmatmul.bf16.vlgmr.msra.gmra.mxu3 %v8835_v55  ;;  %v1366_v21 = vsel %vm1318_vm0, %v1181_v18, %v1342_v58 }
 0x159   :  { %11188 = vst [vmem:[#allocation14_spill] sm:$0xff] %v8835_v55  ;;  %v1362_v23 = vsel %vm1314_vm14, %v1292_v59, %v1338_v10  ;;  %v1364_v29 = vsel %vm1316_vm15, %v1237_v1, %v1340_v27  ;;  %v8857_v59 = vadd.f32 %v8738_v25, %v1155_v49  ;;  %v7835_v27 = vld [vmem:[#allocation9 + $0x114] sm:$0xf0]  ;;  %2462 = vmatpush.bf16.msrb.mxu0 %v6443_v7  ;;  %v6308_v25 = vld [vmem:[#allocation9 + $0x18] sm:$0xf0] }
 0x15a   :  { %v8842_v46 = vpack.c.bf16 %v1362_v23, %v1362_v23  ;;  %v1265_v11 = vpop.f32.mrf.mxu2  ;;  %v8844_v31 = vpack.c.bf16 %v1364_v29, %v1363_v47  ;;  %v1209_v39 = vpop.f32.mrf.mxu0  ;;  %v6463_v47 = vor.u32 %v7840_v2, %v6460_v0  ;;  %v6435_v48 = vor.u32 %v7835_v27, %v6434_v4  ;;  %v7802_v23 = vld [vmem:[#allocation9 + $0x14] sm:$0xf]  ;;  %2519 = vmatpush.bf16.msrb.mxu2 %v6391_v22 }
 0x15b   :  { %v1294_v50 = vpop.f32.mrf.mxu3  ;;  %v1266_v57 = vadd.f32 %v1265_v11, %v8798_v40  ;;  %v1210_v44 = vadd.f32 %v1209_v39, %v8781_v6  ;;  %v1238_v56 = vpop.f32.mrf.mxu1  ;;  %2491 = vmatpush.bf16.msrb.mxu1 %v6319_v12  ;;  %vm1321_vm3 = vcmp.ge.f32.partialorder %v8857_v59, 0.0  ;;  %v6311_v29 = vor.u32 %v7802_v23, %v6308_v25  ;;  %v6426_v11 = vld [vmem:[#allocation9 + $0x100] sm:$0xf]  ;;  %v6300_v39 = vld [vmem:[#allocation9 + $0x8] sm:$0xf0] }
 0x15c   :  { %1432 = vst [vmem:[%s11154_s17 + $0x14] sm:$0xf] %v8842_v46  ;;  %2547 = vmatpush.bf16.msrb.mxu3 %v6463_v47  ;;  %v1345_v52 = vmul.f32 0.01, %v8857_v59  ;;  %v2117_v35 = vunpack.c.l.b16 %v8844_v31  ;;  %v2118_v7 = vunpack.c.h.b16 %v8844_v31  ;;  %v7838_v0 = vld [vmem:[#allocation9 + $0x134] sm:$0xf]  ;;  %v6383_v23 = vor.u32 %v7820_v38, %v6380_v3 }
 0x15d   :  { %1433 = vst [vmem:[%s11154_s17 + $0x18] sm:$0xff] %v8844_v31  ;;  %v1295_v61 = vadd.f32 %v1294_v50, %v1266_v57  ;;  %v1239_v1 = vadd.f32 %v1238_v56, %v1210_v44  ;;  %v7800_v50 = vld [vmem:[#allocation9 + $0x4] sm:$0xf]  ;;  %v1157_v57 = vadd.f32 %v8747_v20, %v8769_v37  ;;  %2463 = vmatpush.bf16.msrb.mxu0 %v6435_v48  ;;  %v6452_v12 = vld [vmem:[#allocation9 + $0x138] sm:$0xf0] }
 0x15e   :  { %v6427_v56 = vor.u32 %v7833_v51, %v6426_v11  ;;  %v6455_v47 = vor.u32 %v7838_v0, %v6452_v12  ;;  %v6303_v4 = vor.u32 %v7800_v50, %v6300_v39  ;;  %2520 = vmatpush.bf16.msrb.mxu2 %v6383_v23  ;;  %v1160_v51 = vadd.f32 %v8771_v45, %v8769_v37  ;;  %v6372_v50 = vld [vmem:[#allocation9 + $0x98] sm:$0xf0]  ;;  %v7816_v23 = vld [vmem:[#allocation9 + $0x84] sm:$0xf] }
 0x15f   :  { %vm1317_vm1 = vcmp.ge.f32.partialorder %v1295_v61, 0.0  ;;  %v1341_v10 = vmul.f32 0.01, %v1295_v61  ;;  %vm1319_vm2 = vcmp.ge.f32.partialorder %v1239_v1, 0.0  ;;  %v1343_v26 = vmul.f32 0.01, %v1239_v1  ;;  %2492 = vmatpush.bf16.msrb.mxu1 %v6311_v29 }
 0x160   :  { %2548 = vmatpush.bf16.msrb.mxu3 %v6455_v47 }
 0x161   :  { %v1365_v28 = vsel %vm1317_vm1, %v1295_v61, %v1341_v10  ;;  %v1367_v49 = vsel %vm1319_vm2, %v1239_v1, %v1343_v26  ;;  %v7836_v10 = vld [vmem:[#allocation9 + $0x124] sm:$0xf]  ;;  %v6444_v26 = vld [vmem:[#allocation9 + $0x128] sm:$0xf0]  ;;  %2464 = vmatpush.bf16.msrb.mxu0 %v6427_v56  ;;  %v1189_v56 = vadd.f32 %v8773_v24, %v1160_v51 }
 0x162   :  { %v8861_v34 = vpack.c.bf16 %v1365_v28, %v1365_v28  ;;  %v1267_v36 = vpop.f32.mrf.mxu2  ;;  %v1403_v15 = vpack.c.bf16 %v1367_v49, %v1366_v21  ;;  %v1212_v54 = vpop.f32.mrf.mxu0  ;;  %v6447_v21 = vor.u32 %v7836_v10, %v6444_v26  ;;  %v1186_v28 = vadd.f32 %v8750_v5, %v1157_v57  ;;  %v6428_v51 = vld [vmem:[#allocation9 + $0x108] sm:$0xf0] }
 0x163   :  { %v1296_v53 = vpop.f32.mrf.mxu3  ;;  %v1268_v18 = vadd.f32 %v1267_v36, %v8798_v40  ;;  %v1213_v58 = vadd.f32 %v1212_v54, %v8781_v6  ;;  %v1241_v44 = vpop.f32.mrf.mxu1  ;;  %v1369_v49 = vsel %vm1321_vm3, %v8857_v59, %v1345_v52  ;;  %2493 = vmatpush.bf16.msrb.mxu1 %v6303_v4  ;;  %vm1327_vm9 = vcmp.ge.f32.partialorder %v1189_v56, 0.0 }
 0x164   :  { %1434 = vst [vmem:[%s11154_s17 + $0x20] sm:$0xf] %v8861_v34  ;;  %v2120_v61 = vunpack.c.l.b16 %v1403_v15  ;;  %v2121_v20 = vunpack.c.h.b16 %v1403_v15  ;;  %2549 = vmatpush.bf16.msrb.mxu3 %v6447_v21  ;;  %vm1324_vm6 = vcmp.ge.f32.partialorder %v1186_v28, 0.0  ;;  %v1348_v57 = vmul.f32 0.01, %v1186_v28 }
 0x165   :  { %1435 = vst [vmem:[%s11154_s17 + $0x24] sm:$0xff] %v1403_v15  ;;  %v1297_v2 = vadd.f32 %v1296_v53, %v1268_v18  ;;  %v1242_v1 = vadd.f32 %v1241_v44, %v1213_v58  ;;  %1937 = vmatmul.bf16.gmra.mxu0 %v8725_v13  ;;  %v7818_v18 = vld [vmem:[#allocation9 + $0x94] sm:$0xf]  ;;  %v6436_v44 = vld [vmem:[#allocation9 + $0x118] sm:$0xf0] }
 0x166   :  { %v8878_v22 = vpack.c.b16 %v2120_v61, %v2117_v35  ;;  %v8880_v31 = vpack.c.b16 %v2121_v20, %v2118_v7  ;;  %1966 = vmatmul.bf16.gmra.mxu1 %v8764_v32  ;;  %v6375_v39 = vor.u32 %v7818_v18, %v6372_v50  ;;  %v7834_v58 = vld [vmem:[#allocation9 + $0x114] sm:$0xf]  ;;  %v1372_v0 = vsel %vm1324_vm6, %v1186_v28, %v1348_v57  ;;  %v6364_v21 = vld [vmem:[#allocation9 + $0x88] sm:$0xf0] }
 0x167   :  { %vm1320_vm4 = vcmp.ge.f32.partialorder %v1297_v2, 0.0  ;;  %v1344_v27 = vmul.f32 0.01, %v1297_v2  ;;  %vm1322_vm5 = vcmp.ge.f32.partialorder %v1242_v1, 0.0  ;;  %v1346_v48 = vmul.f32 0.01, %v1242_v1 }
 0x168   :  { %2412 = vmatmul.bf16.gmra.mxu2 %v8878_v22  ;;  %2441 = vmatmul.bf16.gmra.mxu3 %v8880_v31  ;;  %v6439_v61 = vor.u32 %v7834_v58, %v6436_v44 }
 0x169   :  { %v1368_v25 = vsel %vm1320_vm4, %v1297_v2, %v1344_v27  ;;  %v1370_v36 = vsel %vm1322_vm5, %v1242_v1, %v1346_v48  ;;  %2521 = vmatpush.bf16.msrb.mxu2 %v6375_v39 }
 0x16a   :  { %v8889_v29 = vpack.c.bf16 %v1368_v25, %v1368_v25  ;;  %v1270_v11 = vpop.f32.mrf.mxu2  ;;  %v1405_v15 = vpack.c.bf16 %v1370_v36, %v1369_v49  ;;  %v1214_v53 = vpop.f32.mrf.mxu0  ;;  %2550 = vmatpush.bf16.msrb.mxu3 %v6439_v61  ;;  %v6367_v36 = vor.u32 %v7816_v23, %v6364_v21  ;;  %v6670_v23 = vld [vmem:[%s11143_s6 + $0x168] sm:$0xf]  ;;  %v7966_v21 = vld [vmem:[%s11143_s6 + $0x170] sm:$0xf0] }
 0x16b   :  { %v1299_v5 = vpop.f32.mrf.mxu3  ;;  %v1271_v54 = vadd.f32 %v1270_v11, %v8798_v40  ;;  %v1215_v59 = vadd.f32 %v1214_v53, %v8781_v6  ;;  %v1243_v52 = vpop.f32.mrf.mxu1  ;;  %v7832_v11 = vld [vmem:[#allocation9 + $0x104] sm:$0xf] }
 0x16c   :  { %1436 = vst [vmem:[%s11154_s17 + $0x2c] sm:$0xf] %v8889_v29  ;;  %v2123_v10 = vunpack.c.l.b16 %v1405_v15  ;;  %v2124_v27 = vunpack.c.h.b16 %v1405_v15 }
 0x16d   :  { %1437 = vst [vmem:[%s11154_s17 + $0x30] sm:$0xff] %v1405_v15  ;;  %v1300_v45 = vadd.f32 %v1299_v5, %v1271_v54  ;;  %v1244_v35 = vadd.f32 %v1243_v52, %v1215_v59  ;;  %v1351_v15 = vmul.f32 0.01, %v1189_v56  ;;  %v1162_v5 = vadd.f32 %v8784_v60, %v8769_v37  ;;  %2522 = vmatpush.bf16.msrb.mxu2 %v6367_v36 }
 0x16e   :  { %v6431_v54 = vor.u32 %v7832_v11, %v6428_v51 }
 0x16f   :  { %vm1323_vm7 = vcmp.ge.f32.partialorder %v1300_v45, 0.0  ;;  %v1347_v7 = vmul.f32 0.01, %v1300_v45  ;;  %vm1325_vm8 = vcmp.ge.f32.partialorder %v1244_v35, 0.0  ;;  %v1349_v20 = vmul.f32 0.01, %v1244_v35 }
 0x170   :  { %2551 = vmatpush.bf16.msrb.mxu3 %v6431_v54  ;;  %v1191_v60 = vadd.f32 %v8786_v63, %v1162_v5  ;;  %v6766_v63 = vld [vmem:[%s11143_s6 + $0x228] sm:$0xf] }
 0x171   :  { %v1371_v2 = vsel %vm1323_vm7, %v1300_v45, %v1347_v7  ;;  %v1373_v12 = vsel %vm1325_vm8, %v1244_v35, %v1349_v20  ;;  %v1375_v45 = vsel %vm1327_vm9, %v1189_v56, %v1351_v15  ;;  %v7990_v56 = vld [vmem:[%s11143_s6 + $0x230] sm:$0xf0] }
 0x172   :  { %v8904_v1 = vpack.c.bf16 %v1371_v2, %v1371_v2  ;;  %v1272_v47 = vpop.f32.mrf.mxu2  ;;  %v1407_v38 = vpack.c.bf16 %v1373_v12, %v1372_v0  ;;  %v1217_v4 = vpop.f32.mrf.mxu0  ;;  %v6767_v12 = vor.u32 %v7990_v56, %v6766_v63  ;;  %vm1330_vm12 = vcmp.ge.f32.partialorder %v1191_v60, 0.0 }
 0x173   :  { %v1301_v3 = vpop.f32.mrf.mxu3  ;;  %v1273_v24 = vadd.f32 %v1272_v47, %v8798_v40  ;;  %v1218_v26 = vadd.f32 %v1217_v4, %v8781_v6  ;;  %v1246_v48 = vpop.f32.mrf.mxu1  ;;  %v1354_v47 = vmul.f32 0.01, %v1191_v60 }
 0x174   :  { %1438 = vst [vmem:[%s11154_s17 + $0x38] sm:$0xf] %v8904_v1  ;;  %v2126_v28 = vunpack.c.l.b16 %v1407_v38  ;;  %v2127_v25 = vunpack.c.h.b16 %v1407_v38  ;;  %3261 = vmatpush.bf16.msra.mxu2 %v6767_v12  ;;  %v6658_v12 = vld [vmem:[%s11143_s6 + $0x150] sm:$0xf] }
 0x175   :  { %1439 = vst [vmem:[%s11154_s17 + $0x3c] sm:$0xff] %v1407_v38  ;;  %v1302_v49 = vadd.f32 %v1301_v3, %v1273_v24  ;;  %v1247_v53 = vadd.f32 %v1246_v48, %v1218_v26  ;;  %1942 = vmatmul.bf16.gmra.mxu0 %v8758_v19  ;;  %v6576_v3 = vld [vmem:[%s11143_s6 + $0xb4] sm:$0xf0] }
 0x176   :  { %v8918_v59 = vpack.c.b16 %v2126_v28, %v2123_v10  ;;  %v8920_v52 = vpack.c.b16 %v2127_v25, %v2124_v27  ;;  %1971 = vmatmul.bf16.gmra.mxu1 %v8795_v33  ;;  %v2113_v10 = vunpack.c.l.b16 %v8815_v43  ;;  %v2116_v27 = vunpack.c.l.b16 %v8842_v46 }
 0x177   :  { %vm1326_vm10 = vcmp.ge.f32.partialorder %v1302_v49, 0.0  ;;  %v1350_v18 = vmul.f32 0.01, %v1302_v49  ;;  %vm1328_vm11 = vcmp.ge.f32.partialorder %v1247_v53, 0.0  ;;  %v1352_v50 = vmul.f32 0.01, %v1247_v53 }
 0x178   :  { %2417 = vmatmul.bf16.gmra.mxu2 %v8918_v59  ;;  %2446 = vmatmul.bf16.gmra.mxu3 %v8920_v52  ;;  %v1378_v28 = vsel %vm1330_vm12, %v1191_v60, %v1354_v47  ;;  %v6671_v43 = vor.u32 %v7966_v21, %v6670_v23  ;;  %v7963_v47 = vld [vmem:[%s11143_s6 + $0x158] sm:$0xf0] }
 0x179   :  { %v1374_v37 = vsel %vm1326_vm10, %v1302_v49, %v1350_v18  ;;  %v1376_v39 = vsel %vm1328_vm11, %v1247_v53, %v1352_v50  ;;  %v8969_v18 = vpack.c.b16 %v2116_v27, %v2113_v10  ;;  %v6574_v50 = vld [vmem:[%s11143_s6 + $0xa8] sm:$0xf]  ;;  %v7935_v21 = vld [vmem:[%s11143_s6 + $0x7c] sm:$0xf] }
 0x17a   :  { %v8927_v57 = vpack.c.bf16 %v1374_v37, %v1374_v37  ;;  %v1275_v35 = vpop.f32.mrf.mxu2  ;;  %v1409_v58 = vpack.c.bf16 %v1376_v39, %v1375_v45  ;;  %v1219_v7 = vpop.f32.mrf.mxu0  ;;  %3237 = vmatpush.bf16.msra.mxu1 %v6671_v43 }
 0x17b   :  { %v1304_v44 = vpop.f32.mrf.mxu3  ;;  %v1276_v61 = vadd.f32 %v1275_v35, %v8798_v40  ;;  %v1220_v20 = vadd.f32 %v1219_v7, %v8781_v6  ;;  %v1248_v2 = vpop.f32.mrf.mxu1  ;;  %v7941_v6 = vld [vmem:[%s11143_s6 + $0xac] sm:$0xf]  ;;  %11189 = vst [vmem:[#allocation15_spill] sm:$0xff] %v8969_v18  ;;  %v6754_v35 = vld [vmem:[%s11143_s6 + $0x210] sm:$0xf] }
 0x17c   :  { %1440 = vst [vmem:[%s11154_s17 + $0x44] sm:$0xf] %v8927_v57  ;;  %v6579_v24 = vor.u32 %v7941_v6, %v6576_v3  ;;  %v2129_v15 = vunpack.c.l.b16 %v1409_v58  ;;  %v2130_v5 = vunpack.c.h.b16 %v1409_v58  ;;  %v7938_v7 = vld [vmem:[%s11143_s6 + $0x94] sm:$0xf]  ;;  %v6659_v6 = vor.u32 %v7963_v47, %v6658_v12  ;;  %v6562_v3 = vld [vmem:[%s11143_s6 + $0x90] sm:$0xf] }
 0x17d   :  { %1441 = vst [vmem:[%s11154_s17 + $0x48] sm:$0xff] %v1409_v58  ;;  %v1305_v0 = vadd.f32 %v1304_v44, %v1276_v61  ;;  %v1249_v38 = vadd.f32 %v1248_v2, %v1220_v20  ;;  %v7987_v58 = vld [vmem:[%s11143_s6 + $0x218] sm:$0xf0]  ;;  %v6564_v61 = vld [vmem:[%s11143_s6 + $0x9c] sm:$0xf0] }
 0x17e   :  { %3285 = vmatpush.bf16.msra.mxu3 %v6579_v24  ;;  %v6755_v44 = vor.u32 %v7987_v58, %v6754_v35  ;;  %v6567_v56 = vor.u32 %v7938_v7, %v6564_v61  ;;  %3238 = vmatpush.bf16.msra.mxu1 %v6659_v6  ;;  %v6730_v58 = vld [vmem:[%s11143_s6 + $0x1e0] sm:$0xf]  ;;  %v6526_v12 = vld [vmem:[%s11143_s6 + $0x48] sm:$0xf]  ;;  %v7930_v6 = vld [vmem:[%s11143_s6 + $0x50] sm:$0xf0] }
 0x17f   :  { %vm1329_vm13 = vcmp.ge.f32.partialorder %v1305_v0, 0.0  ;;  %v1353_v4 = vmul.f32 0.01, %v1305_v0  ;;  %vm1331_vm14 = vcmp.ge.f32.partialorder %v1249_v38, 0.0  ;;  %v1355_v26 = vmul.f32 0.01, %v1249_v38 }
 0x180   :  { %3262 = vmatpush.bf16.msra.mxu2 %v6755_v44  ;;  %v7981_v44 = vld [vmem:[%s11143_s6 + $0x1e8] sm:$0xf0] }
 0x181   :  { %v1377_v48 = vsel %vm1329_vm13, %v1305_v0, %v1353_v4  ;;  %v1379_v25 = vsel %vm1331_vm14, %v1249_v38, %v1355_v26  ;;  %v7939_v4 = vld [vmem:[%s11143_s6 + $0x98] sm:$0xf0]  ;;  %v6742_v26 = vld [vmem:[%s11143_s6 + $0x1f8] sm:$0xf] }
 0x182   :  { %v8958_v49 = vpack.c.bf16 %v1377_v48, %v1377_v48  ;;  %v1277_v36 = vpop.f32.mrf.mxu2  ;;  %v1411_v11 = vpack.c.bf16 %v1379_v25, %v1378_v28  ;;  %v8960_v46 = vpop.f32.mrf.mxu0  ;;  %3286 = vmatpush.bf16.msra.mxu3 %v6567_v56  ;;  %v6563_v10 = vor.u32 %v7939_v4, %v6562_v3  ;;  %v7984_v48 = vld [vmem:[%s11143_s6 + $0x200] sm:$0xf0]  ;;  %v6552_v28 = vld [vmem:[%s11143_s6 + $0x84] sm:$0xf0]  ;;  %v6646_v25 = vld [vmem:[%s11143_s6 + $0x138] sm:$0xf] }
 0x183   :  { %v1278_v51 = vadd.f32 %v1277_v36, %v8798_v40  ;;  %v1306_v53 = vpop.f32.mrf.mxu3  ;;  %v8967_v54 = vpop.f32.mrf.mxu1  ;;  %v7942_v40 = vld [vmem:[%s11143_s6 + $0xb0] sm:$0xf0]  ;;  %v6743_v23 = vor.u32 %v7984_v48, %v6742_v26  ;;  %v6555_v43 = vor.u32 %v7935_v21, %v6552_v28  ;;  %v7932_v56 = vld [vmem:[%s11143_s6 + $0x64] sm:$0xf]  ;;  %v6622_v3 = vld [vmem:[%s11143_s6 + $0x108] sm:$0xf] }
 0x184   :  { %1442 = vst [vmem:[%s11154_s17 + $0x50] sm:$0xf] %v8958_v49  ;;  %v2132_v37 = vunpack.c.l.b16 %v1411_v11  ;;  %v2133_v60 = vunpack.c.h.b16 %v1411_v11  ;;  %v6575_v39 = vor.u32 %v7942_v40, %v6574_v50  ;;  %v7954_v4 = vld [vmem:[%s11143_s6 + $0x110] sm:$0xf0]  ;;  %v7927_v21 = vld [vmem:[%s11143_s6 + $0x38] sm:$0xf0] }
 0x185   :  { %1443 = vst [vmem:[%s11154_s17 + $0x54] sm:$0xff] %v1411_v11  ;;  %v1307_v45 = vadd.f32 %v1306_v53, %v1278_v51  ;;  %2465 = vmatmul.bf16.vlgmr.msrb.gmra.mxu0 %v8969_v18  ;;  %3263 = vmatpush.bf16.msra.mxu2 %v6743_v23  ;;  %v7960_v11 = vld [vmem:[%s11143_s6 + $0x140] sm:$0xf0]  ;;  %v6550_v51 = vld [vmem:[%s11143_s6 + $0x78] sm:$0xf]  ;;  %v2122_v53 = vunpack.c.l.b16 %v8889_v29  ;;  %v6623_v26 = vor.u32 %v7954_v4, %v6622_v3 }
 0x186   :  { %2494 = vmatmul.bf16.vlgmr.msrb.gmra.mxu1 %v8833_v9  ;;  %v8994_v20 = vpack.c.b16 %v2132_v37, %v2129_v15  ;;  %v8996_v2 = vpack.c.b16 %v2133_v60, %v2130_v5  ;;  %3213 = vmatpush.bf16.msra.mxu0 %v6575_v39  ;;  %v7936_v15 = vld [vmem:[%s11143_s6 + $0x80] sm:$0xf0]  ;;  %v2119_v5 = vunpack.c.l.b16 %v8861_v34  ;;  %v6647_v50 = vor.u32 %v7960_v11, %v6646_v25  ;;  %v6538_v37 = vld [vmem:[%s11143_s6 + $0x60] sm:$0xf]  ;;  %v7933_v60 = vld [vmem:[%s11143_s6 + $0x68] sm:$0xf0] }
 0x187   :  { %vm1332_vm15 = vcmp.ge.f32.partialorder %v1307_v45, 0.0  ;;  %v1356_v63 = vmul.f32 0.01, %v1307_v45  ;;  %v6551_v40 = vor.u32 %v7936_v15, %v6550_v51  ;;  %3287 = vmatpush.bf16.msra.mxu3 %v6555_v43  ;;  %v7957_v29 = vld [vmem:[%s11143_s6 + $0x128] sm:$0xf0]  ;;  %v6539_v7 = vor.u32 %v7933_v60, %v6538_v37 }
 0x188   :  { %2422 = vmatmul.bf16.gmra.mxu2 %v8994_v20  ;;  %2451 = vmatmul.bf16.gmra.mxu3 %v8996_v2  ;;  %v9064_v39 = vpack.c.b16 %v2122_v53, %v2119_v5  ;;  %v6514_v23 = vld [vmem:[%s11143_s6 + $0x30] sm:$0xf]  ;;  %v7951_v43 = vld [vmem:[%s11143_s6 + $0xf8] sm:$0xf0]  ;;  %v6718_v15 = vld [vmem:[%s11143_s6 + $0x1c8] sm:$0xf] }
 0x189   :  { %v1380_v0 = vsel %vm1332_vm15, %v1307_v45, %v1356_v63  ;;  %3239 = vmatpush.bf16.msra.mxu1 %v6647_v50  ;;  %v6634_v45 = vld [vmem:[%s11143_s6 + $0x120] sm:$0xf]  ;;  %v6731_v63 = vor.u32 %v7981_v44, %v6730_v58  ;;  %v6610_v28 = vld [vmem:[%s11143_s6 + $0xf0] sm:$0xf]  ;;  %v7978_v5 = vld [vmem:[%s11143_s6 + $0x1d0] sm:$0xf0]  ;;  %v6515_v53 = vor.u32 %v7927_v21, %v6514_v23  ;;  %v2125_v44 = vunpack.c.l.b16 %v8904_v1 }
 0x18a   :  { %v9006_v38 = vpack.c.bf16 %v1380_v0, %v1380_v0  ;;  %v9014_v24 = vpop.f32.mrf.mxu0  ;;  %3214 = vmatpush.bf16.msra.mxu0 %v6563_v10  ;;  %v6635_v61 = vor.u32 %v7957_v29, %v6634_v45  ;;  %v6540_v0 = vld [vmem:[%s11143_s6 + $0x6c] sm:$0xf0]  ;;  %v6527_v10 = vor.u32 %v7930_v6, %v6526_v12  ;;  %v6611_v50 = vor.u32 %v7951_v43, %v6610_v28  ;;  %v7929_v37 = vld [vmem:[%s11143_s6 + $0x4c] sm:$0xf]  ;;  %v6528_v60 = vld [vmem:[%s11143_s6 + $0x54] sm:$0xf0] }
 0x18b   :  { %v9020_v27 = vpop.f32.mrf.mxu1  ;;  %v9037_v36 = vpop.f32.mrf.mxu3  ;;  %3264 = vmatpush.bf16.msra.mxu2 %v6731_v63  ;;  %v6543_v47 = vor.u32 %v7932_v56, %v6540_v0  ;;  %v6502_v45 = vld [vmem:[%s11143_s6 + $0x18] sm:$0xf]  ;;  %v6531_v29 = vor.u32 %v7929_v37, %v6528_v60  ;;  %v7924_v58 = vld [vmem:[%s11143_s6 + $0x20] sm:$0xf0]  ;;  %v6490_v12 = vld [vmem:[%s11143_s6] sm:$0xf] }
 0x18c   :  { %1444 = vst [vmem:[%s11154_s17 + $0x5c] sm:$0xf] %v9006_v38  ;;  %v6598_v63 = vld [vmem:[%s11143_s6 + $0xd8] sm:$0xf]  ;;  %v7948_v56 = vld [vmem:[%s11143_s6 + $0xe0] sm:$0xf0] }
 0x18d   :  { %3240 = vmatpush.bf16.msra.mxu1 %v6635_v61  ;;  %3288 = vmatpush.bf16.msra.mxu3 %v6543_v47  ;;  %v6503_v61 = vor.u32 %v7924_v58, %v6502_v45  ;;  %v6599_v0 = vor.u32 %v7948_v56, %v6598_v63  ;;  %v7921_v1 = vld [vmem:[%s11143_s6 + $0x8] sm:$0xf0]  ;;  %v6706_v23 = vld [vmem:[%s11143_s6 + $0x1b0] sm:$0xf]  ;;  %v7975_v21 = vld [vmem:[%s11143_s6 + $0x1b8] sm:$0xf0] }
 0x18e   :  { %3215 = vmatpush.bf16.msra.mxu0 %v6551_v40  ;;  %v6719_v40 = vor.u32 %v7978_v5, %v6718_v15  ;;  %v7945_v3 = vld [vmem:[%s11143_s6 + $0xc8] sm:$0xf0]  ;;  %v6491_v28 = vor.u32 %v7921_v1, %v6490_v12  ;;  %v6707_v15 = vor.u32 %v7975_v21, %v6706_v23  ;;  %v7926_v37 = vld [vmem:[%s11143_s6 + $0x34] sm:$0xf]  ;;  %v6516_v60 = vld [vmem:[%s11143_s6 + $0x3c] sm:$0xf0] }
 0x18f   :  { %v6694_v45 = vld [vmem:[%s11143_s6 + $0x198] sm:$0xf]  ;;  %v7972_v58 = vld [vmem:[%s11143_s6 + $0x1a0] sm:$0xf0]  ;;  %v1493_v63 = vld [vmem:[%s11149_s12] sm:$0x3] }
 0x190   :  { %3265 = vmatpush.bf16.msra.mxu2 %v6719_v40  ;;  %v7923_v56 = vld [vmem:[%s11143_s6 + $0x1c] sm:$0xf]  ;;  %v6682_v23 = vld [vmem:[%s11143_s6 + $0x180] sm:$0xf]  ;;  %v7969_v21 = vld [vmem:[%s11143_s6 + $0x188] sm:$0xf0] }
 0x191   :  { %3241 = vmatpush.bf16.msra.mxu1 %v6623_v26  ;;  %3289 = vmatpush.bf16.msra.mxu3 %v6531_v29  ;;  %v6519_v29 = vor.u32 %v7926_v37, %v6516_v60  ;;  %v7965_v37 = vld [vmem:[%s11143_s6 + $0x16c] sm:$0xf]  ;;  %v6672_v60 = vld [vmem:[%s11143_s6 + $0x174] sm:$0xf0]  ;;  %v7887_v9 = vld [vmem:[#allocation7 + $0x13c] sm:$0xf] }
 0x192   :  { %v9059_v34 = vpop.f32.mrf.mxu0  ;;  %3216 = vmatpush.bf16.msra.mxu0 %v6539_v7  ;;  %v2128_v7 = vunpack.c.l.b16 %v8927_v57  ;;  %v6586_v57 = vld [vmem:[%s11143_s6 + $0xc0] sm:$0xf] }
 0x193   :  { %v9066_v35 = vpop.f32.mrf.mxu1  ;;  %v9094_v48 = vpop.f32.mrf.mxu3  ;;  %v6587_v43 = vor.u32 %v7945_v3, %v6586_v57 }
 0x194   :  { %v9158_v4 = vpack.c.b16 %v2128_v7, %v2125_v44  ;;  %3266 = vmatpush.bf16.msra.mxu2 %v6707_v15  ;;  %v6695_v44 = vor.u32 %v7972_v58, %v6694_v45  ;;  %v2131_v7 = vunpack.c.l.b16 %v8958_v49  ;;  %v9207_v49 = vperm.slane %v1493_v63, 0  ;;  %v6492_v15 = vld [vmem:[%s11143_s6 + $0xc] sm:$0xf0] }
 0x195   :  { %2470 = vmatmul.bf16.gmra.mxu0 %v9064_v39  ;;  %3242 = vmatpush.bf16.msra.mxu1 %v6611_v50  ;;  %v6675_v58 = vor.u32 %v7965_v37, %v6672_v60  ;;  %v9265_v60 = vperm.slane %v1493_v63, 1  ;;  %v6648_v63 = vld [vmem:[%s11143_s6 + $0x144] sm:$0xf0] }
 0x196   :  { %2499 = vmatmul.bf16.gmra.mxu1 %v8878_v22  ;;  %3217 = vmatpush.bf16.msra.mxu0 %v6527_v10 }
 0x197   :  { %3290 = vmatpush.bf16.msra.mxu3 %v6519_v29 }
 0x198   :  { %2523 = vmatmul.bf16.vlgmr.msrb.gmra.mxu2 %v8835_v55  ;;  %2552 = vmatmul.bf16.vlgmr.msrb.gmra.mxu3 %v8969_v18  ;;  %v7967_v18 = vld [vmem:[%s11143_s6 + $0x178] sm:$0xf0]  ;;  %v1902_v55 = vadd.f32 %v9094_v48, %v9265_v60 }
 0x199   :  { %3243 = vmatpush.bf16.msra.mxu1 %v6599_v0  ;;  %3267 = vmatpush.bf16.msra.mxu2 %v6695_v44  ;;  %v6504_v0 = vld [vmem:[%s11143_s6 + $0x24] sm:$0xf0]  ;;  %v7989_v44 = vld [vmem:[%s11143_s6 + $0x22c] sm:$0xf] }
 0x19a   :  { %v9107_v25 = vpop.f32.mrf.mxu0  ;;  %3218 = vmatpush.bf16.msra.mxu0 %v6515_v53  ;;  %v6507_v12 = vor.u32 %v7923_v56, %v6504_v0  ;;  %v1813_v56 = vadd.f32 %v8960_v46, %v9207_v49  ;;  %v7962_v0 = vld [vmem:[%s11143_s6 + $0x154] sm:$0xf]  ;;  %v6756_v46 = vld [vmem:[%s11143_s6 + $0x21c] sm:$0xf0] }
 0x19b   :  { %v9112_v11 = vpop.f32.mrf.mxu1  ;;  %v9114_v51 = vpop.f32.mrf.mxu2 }
 0x19c   :  { %v9151_v47 = vpop.f32.mrf.mxu3  ;;  %3291 = vmatpush.bf16.msra.mxu3 %v6507_v12  ;;  %v6660_v12 = vld [vmem:[%s11143_s6 + $0x15c] sm:$0xf0] }
 0x19d   :  { %3244 = vmatpush.bf16.msra.mxu1 %v6587_v43  ;;  %v6683_v43 = vor.u32 %v7969_v21, %v6682_v23  ;;  %v7986_v23 = vld [vmem:[%s11143_s6 + $0x214] sm:$0xf] }
 0x19e   :  { %3219 = vmatpush.bf16.msra.mxu0 %v6503_v61  ;;  %v2134_v61 = vunpack.c.l.b16 %v9006_v38  ;;  %v6759_v37 = vor.u32 %v7986_v23, %v6756_v46  ;;  %v1900_v46 = vadd.f32 %v9037_v36, %v9265_v60 }
 0x19f   :  { %3268 = vmatpush.bf16.msra.mxu2 %v6683_v43 }
 0x1a0   :  { %v9213_v3 = vpack.c.b16 %v2134_v61, %v2131_v7  ;;  %v6768_v7 = vld [vmem:[%s11143_s6 + $0x234] sm:$0xf0] }
 0x1a1   :  { %v6771_v61 = vor.u32 %v7989_v44, %v6768_v7  ;;  %v1842_v44 = vadd.f32 %v8967_v54, %v1813_v56  ;;  %v6744_v54 = vld [vmem:[%s11143_s6 + $0x204] sm:$0xf0] }
 0x1a2   :  { %v9153_v6 = vpop.f32.mrf.mxu0  ;;  %3220 = vmatpush.bf16.msra.mxu0 %v6491_v28  ;;  %11190 = vst [vmem:[#allocation16_spill] sm:$0xff] %v9213_v3  ;;  %v7920_v28 = vld [vmem:[%s11143_s6 + $0x4] sm:$0xf] }
 0x1a3   :  { %v9160_v10 = vpop.f32.mrf.mxu1  ;;  %v9162_v26 = vpop.f32.mrf.mxu2  ;;  %v6495_v29 = vor.u32 %v7920_v28, %v6492_v15  ;;  %3333 = vmatpush.bf16.msrb.mxu1 %v6771_v61  ;;  %v6663_v28 = vor.u32 %v7962_v0, %v6660_v12  ;;  %v7959_v61 = vld [vmem:[%s11143_s6 + $0x13c] sm:$0xf]  ;;  %v1871_v56 = vadd.f32 %v9114_v51, %v1842_v44  ;;  %v7980_v51 = vld [vmem:[%s11143_s6 + $0x1e4] sm:$0xf] }
 0x1a4   :  { %v9180_v40 = vpop.f32.mrf.mxu3  ;;  %v7983_v0 = vld [vmem:[%s11143_s6 + $0x1fc] sm:$0xf]  ;;  %v6651_v12 = vor.u32 %v7959_v61, %v6648_v63 }
 0x1a5   :  { %2475 = vmatmul.bf16.gmra.mxu0 %v9158_v4  ;;  %3292 = vmatpush.bf16.msra.mxu3 %v6495_v29  ;;  %v6582_v29 = vld [vmem:[%s11143_s6 + $0xb0] sm:$0xf]  ;;  %v6747_v23 = vor.u32 %v7983_v0, %v6744_v54  ;;  %v1993_v36 = vmul.f32 0.01, %v1871_v56  ;;  %vm1977_vm0 = vcmp.ge.f32.partialorder %v1871_v56, 0.0 }
 0x1a6   :  { %2504 = vmatmul.bf16.gmra.mxu1 %v8918_v59  ;;  %3309 = vmatpush.bf16.msrb.mxu0 %v6675_v58  ;;  %v7943_v58 = vld [vmem:[%s11143_s6 + $0xb8] sm:$0xf0]  ;;  %v6678_v54 = vld [vmem:[%s11143_s6 + $0x170] sm:$0xf] }
 0x1a7   :  { %v6583_v7 = vor.u32 %v7943_v58, %v6582_v29  ;;  %3334 = vmatpush.bf16.msrb.mxu1 %v6759_v37  ;;  %v1815_v29 = vadd.f32 %v9014_v24, %v9207_v49  ;;  %v7956_v37 = vld [vmem:[%s11143_s6 + $0x124] sm:$0xf]  ;;  %v6636_v58 = vld [vmem:[%s11143_s6 + $0x12c] sm:$0xf0] }
 0x1a8   :  { %2528 = vmatmul.bf16.gmra.mxu2 %v8880_v31  ;;  %2557 = vmatmul.bf16.gmra.mxu3 %v9064_v39  ;;  %v6732_v24 = vld [vmem:[%s11143_s6 + $0x1ec] sm:$0xf0] }
 0x1a9   :  { %3357 = vmatpush.bf16.msrb.mxu2 %v6583_v7  ;;  %v6639_v7 = vor.u32 %v7956_v37, %v6636_v58  ;;  %v1844_v37 = vadd.f32 %v9020_v27, %v1815_v29 }
 0x1aa   :  { %v9174_v5 = vpop.f32.mrf.mxu0  ;;  %3310 = vmatpush.bf16.msrb.mxu0 %v6663_v28 }
 0x1ab   :  { %v9176_v53 = vpop.f32.mrf.mxu1  ;;  %v9178_v50 = vpop.f32.mrf.mxu2  ;;  %3335 = vmatpush.bf16.msrb.mxu1 %v6747_v23  ;;  %v6570_v23 = vld [vmem:[%s11143_s6 + $0x98] sm:$0xf]  ;;  %v1873_v29 = vadd.f32 %v9162_v26, %v1844_v37  ;;  %v7977_v26 = vld [vmem:[%s11143_s6 + $0x1cc] sm:$0xf]  ;;  %v2009_v37 = vsel %vm1977_vm0, %v1871_v56, %v1993_v36  ;;  %v6708_v36 = vld [vmem:[%s11143_s6 + $0x1bc] sm:$0xf0] }
 0x1ac   :  { %v9234_v45 = vpop.f32.mrf.mxu3 }
 0x1ad   :  { %vm1979_vm2 = vcmp.ge.f32.partialorder %v1873_v29, 0.0 }
 0x1ae   :  { %3311 = vmatpush.bf16.msrb.mxu0 %v6651_v12  ;;  %v6735_v12 = vor.u32 %v7980_v51, %v6732_v24  ;;  %v7940_v51 = vld [vmem:[%s11143_s6 + $0xa0] sm:$0xf0] }
 0x1af   :  { %v7964_v24 = vld [vmem:[%s11143_s6 + $0x160] sm:$0xf0]  ;;  %v6571_v27 = vor.u32 %v7940_v51, %v6570_v23  ;;  %v1818_v23 = vadd.f32 %v9059_v34, %v9207_v49  ;;  %v7950_v51 = vld [vmem:[%s11143_s6 + $0xf4] sm:$0xf] }
 0x1b0   :  { %3336 = vmatpush.bf16.msrb.mxu1 %v6735_v12  ;;  %v6720_v12 = vld [vmem:[%s11143_s6 + $0x1d4] sm:$0xf0] }
 0x1b1   :  { %3358 = vmatpush.bf16.msrb.mxu2 %v6571_v27  ;;  %v6723_v48 = vor.u32 %v7977_v26, %v6720_v12 }
 0x1b2   :  { %v9205_v1 = vpop.f32.mrf.mxu0  ;;  %3312 = vmatpush.bf16.msrb.mxu0 %v6639_v7 }
 0x1b3   :  { %v9209_v38 = vpop.f32.mrf.mxu1  ;;  %v9211_v57 = vpop.f32.mrf.mxu2 }
 0x1b4   :  { %v9287_v28 = vpop.f32.mrf.mxu3  ;;  %3337 = vmatpush.bf16.msrb.mxu1 %v6723_v48 }
 0x1b5   :  { %2480 = vmatmul.bf16.gmra.mxu0 %v9213_v3 }
 0x1b6   :  { %2509 = vmatmul.bf16.gmra.mxu1 %v8994_v20 }
 0x1b8   :  { %2533 = vmatmul.bf16.gmra.mxu2 %v8920_v52  ;;  %2562 = vmatmul.bf16.gmra.mxu3 %v9158_v4 }
 0x1ba   :  { %v9256_v21 = vpop.f32.mrf.mxu0 }
 0x1bb   :  { %v9261_v43 = vpop.f32.mrf.mxu1  ;;  %v9263_v15 = vpop.f32.mrf.mxu2 }
 0x1c2   :  { %v1928_v44 = vpop.f32.mrf.mxu0 }
 0x1c3   :  { %v1929_v61 = vadd.f32 %v1928_v44, %v1900_v46  ;;  %v1957_v63 = vpop.f32.mrf.mxu1  ;;  %v9305_v0 = vpop.f32.mrf.mxu2  ;;  %v6679_v46 = vor.u32 %v7967_v18, %v6678_v54  ;;  %v6666_v44 = vld [vmem:[%s11143_s6 + $0x158] sm:$0xf]  ;;  %v7953_v18 = vld [vmem:[%s11143_s6 + $0x10c] sm:$0xf] }
 0x1c4   :  { %v6624_v54 = vld [vmem:[%s11143_s6 + $0x114] sm:$0xf0] }
 0x1c5   :  { %v1958_v58 = vadd.f32 %v1957_v63, %v1929_v61  ;;  %3221 = vmatmul.bf16.vlgmr.msra.gmra.mxu0 %v8692_v62  ;;  %3381 = vmatpush.bf16.msrb.mxu3 %v6679_v46  ;;  %v6667_v63 = vor.u32 %v7964_v24, %v6666_v44  ;;  %v6627_v7 = vor.u32 %v7953_v18, %v6624_v54  ;;  %v6612_v44 = vld [vmem:[%s11143_s6 + $0xfc] sm:$0xf0]  ;;  %v7974_v24 = vld [vmem:[%s11143_s6 + $0x1b4] sm:$0xf]  ;;  %v9357_v18 = vpop.f32.mrf.mxu3 }
 0x1c6   :  { %3245 = vmatmul.bf16.vlgmr.msra.gmra.mxu1 %v8695_v8  ;;  %v6615_v56 = vor.u32 %v7950_v51, %v6612_v44  ;;  %v6711_v12 = vor.u32 %v7974_v24, %v6708_v36  ;;  %v7961_v51 = vld [vmem:[%s11143_s6 + $0x148] sm:$0xf0]  ;;  %v7947_v44 = vld [vmem:[%s11143_s6 + $0xdc] sm:$0xf]  ;;  %v6600_v24 = vld [vmem:[%s11143_s6 + $0xe4] sm:$0xf0] }
 0x1c7   :  { %vm1978_vm1 = vcmp.ge.f32.partialorder %v1958_v58, 0.0  ;;  %v1994_v61 = vmul.f32 0.01, %v1958_v58  ;;  %3313 = vmatpush.bf16.msrb.mxu0 %v6627_v7  ;;  %v6558_v7 = vld [vmem:[%s11143_s6 + $0x80] sm:$0xf] }
 0x1c8   :  { %2538 = vmatmul.bf16.gmra.mxu2 %v8996_v2  ;;  %2567 = vmatmul.bf16.gmra.mxu3 %v9213_v3 }
 0x1c9   :  { %v2010_v46 = vsel %vm1978_vm1, %v1958_v58, %v1994_v61  ;;  %v1995_v58 = vmul.f32 0.01, %v1873_v29  ;;  %3382 = vmatpush.bf16.msrb.mxu3 %v6667_v63  ;;  %v1847_v63 = vadd.f32 %v9066_v35, %v1818_v23  ;;  %v7971_v35 = vld [vmem:[%s11143_s6 + $0x19c] sm:$0xf]  ;;  %3338 = vmatpush.bf16.msrb.mxu1 %v6711_v12  ;;  %v7968_v12 = vld [vmem:[%s11143_s6 + $0x184] sm:$0xf] }
 0x1ca   :  { %v2025_v34 = vpack.c.bf16 %v2010_v46, %v2009_v37  ;;  %v1930_v54 = vpop.f32.mrf.mxu0  ;;  %v7937_v37 = vld [vmem:[%s11143_s6 + $0x88] sm:$0xf0] }
 0x1cb   :  { %v1931_v27 = vadd.f32 %v1930_v54, %v1902_v55  ;;  %v1959_v61 = vpop.f32.mrf.mxu1  ;;  %v9362_v26 = vpop.f32.mrf.mxu2  ;;  %v6654_v55 = vld [vmem:[%s11143_s6 + $0x140] sm:$0xf]  ;;  %v6559_v48 = vor.u32 %v7937_v37, %v6558_v7  ;;  %3314 = vmatpush.bf16.msrb.mxu0 %v6615_v56  ;;  %v6603_v54 = vor.u32 %v7947_v44, %v6600_v24  ;;  %v1876_v23 = vadd.f32 %v9178_v50, %v1847_v63  ;;  %v6588_v50 = vld [vmem:[%s11143_s6 + $0xcc] sm:$0xf0] }
 0x1cc   :  { %2033 = vst [vmem:[%s11155_s18] sm:$0xff] %v2025_v34  ;;  %v6655_v34 = vor.u32 %v7961_v51, %v6654_v55  ;;  %v1905_v56 = vadd.f32 %v9151_v47, %v9265_v60  ;;  %v2011_v7 = vsel %vm1979_vm2, %v1873_v29, %v1995_v58  ;;  %v7944_v55 = vld [vmem:[%s11143_s6 + $0xc4] sm:$0xf]  ;;  %v6684_v47 = vld [vmem:[%s11143_s6 + $0x18c] sm:$0xf0]  ;;  %v1820_v29 = vadd.f32 %v9107_v25, %v9207_v49  ;;  %v7934_v25 = vld [vmem:[%s11143_s6 + $0x70] sm:$0xf0] }
 0x1cd   :  { %v1960_v46 = vadd.f32 %v1959_v61, %v1931_v27  ;;  %3359 = vmatpush.bf16.msrb.mxu2 %v6559_v48  ;;  %v6696_v27 = vld [vmem:[%s11143_s6 + $0x1a4] sm:$0xf0]  ;;  %v6591_v51 = vor.u32 %v7944_v55, %v6588_v50  ;;  %v1997_v58 = vmul.f32 0.01, %v1876_v23  ;;  %vm1981_vm4 = vcmp.ge.f32.partialorder %v1876_v23, 0.0 }
 0x1ce   :  { %3383 = vmatpush.bf16.msrb.mxu3 %v6655_v34  ;;  %v6699_v61 = vor.u32 %v7971_v35, %v6696_v27  ;;  %v6687_v34 = vor.u32 %v7968_v12, %v6684_v47  ;;  %v9411_v35 = vpop.f32.mrf.mxu3  ;;  %v7931_v55 = vld [vmem:[%s11143_s6 + $0x58] sm:$0xf0]  ;;  %v1849_v50 = vadd.f32 %v9112_v11, %v1820_v29  ;;  %v1823_v47 = vadd.f32 %v9153_v6, %v9207_v49 }
 0x1cf   :  { %vm1980_vm3 = vcmp.ge.f32.partialorder %v1960_v46, 0.0  ;;  %v1996_v36 = vmul.f32 0.01, %v1960_v46  ;;  %3315 = vmatpush.bf16.msrb.mxu0 %v6603_v54  ;;  %v6546_v54 = vld [vmem:[%s11143_s6 + $0x68] sm:$0xf]  ;;  %v2013_v29 = vsel %vm1981_vm4, %v1876_v23, %v1997_v58 }
 0x1d0   :  { %3339 = vmatpush.bf16.msrb.mxu1 %v6699_v61  ;;  %v6547_v27 = vor.u32 %v7934_v25, %v6546_v54  ;;  %v6642_v61 = vld [vmem:[%s11143_s6 + $0x128] sm:$0xf]  ;;  %v7955_v11 = vld [vmem:[%s11143_s6 + $0x118] sm:$0xf0]  ;;  %v7928_v23 = vld [vmem:[%s11143_s6 + $0x40] sm:$0xf0]  ;;  %v1852_v58 = vadd.f32 %v9160_v10, %v1823_v47 }
 0x1d1   :  { %v2012_v37 = vsel %vm1980_vm3, %v1960_v46, %v1996_v36  ;;  %v6510_v10 = vld [vmem:[%s11143_s6 + $0x20] sm:$0xf] }
 0x1d2   :  { %v2026_v63 = vpack.c.bf16 %v2012_v37, %v2011_v7  ;;  %v1933_v48 = vpop.f32.mrf.mxu0  ;;  %v6534_v7 = vld [vmem:[%s11143_s6 + $0x50] sm:$0xf]  ;;  %3360 = vmatpush.bf16.msrb.mxu2 %v6547_v27  ;;  %v6606_v47 = vld [vmem:[%s11143_s6 + $0xe0] sm:$0xf] }
 0x1d3   :  { %v1934_v46 = vadd.f32 %v1933_v48, %v1905_v56  ;;  %v1962_v44 = vpop.f32.mrf.mxu1  ;;  %v9409_v24 = vpop.f32.mrf.mxu2  ;;  %v7958_v56 = vld [vmem:[%s11143_s6 + $0x130] sm:$0xf0]  ;;  %3316 = vmatpush.bf16.msrb.mxu0 %v6591_v51  ;;  %v1907_v48 = vadd.f32 %v9180_v40, %v9265_v60  ;;  %v6630_v51 = vld [vmem:[%s11143_s6 + $0x110] sm:$0xf] }
 0x1d4   :  { %2034 = vst [vmem:[%s11155_s18 + $0x8] sm:$0xff] %v2026_v63  ;;  %v6643_v37 = vor.u32 %v7958_v56, %v6642_v61  ;;  %v6535_v63 = vor.u32 %v7931_v55, %v6534_v7  ;;  %3340 = vmatpush.bf16.msrb.mxu1 %v6687_v34  ;;  %v7952_v55 = vld [vmem:[%s11143_s6 + $0x100] sm:$0xf0] }
 0x1d5   :  { %v1963_v36 = vadd.f32 %v1962_v44, %v1934_v46  ;;  %3226 = vmatmul.bf16.gmra.mxu0 %v8722_v42  ;;  %v1878_v46 = vadd.f32 %v9211_v57, %v1849_v50  ;;  %v6631_v44 = vor.u32 %v7955_v11, %v6630_v51  ;;  %v6522_v57 = vld [vmem:[%s11143_s6 + $0x38] sm:$0xf]  ;;  %v1910_v51 = vadd.f32 %v9234_v45, %v9265_v60 }
 0x1d6   :  { %3250 = vmatmul.bf16.gmra.mxu1 %v8725_v13  ;;  %3384 = vmatpush.bf16.msrb.mxu3 %v6643_v37  ;;  %v6523_v7 = vor.u32 %v7928_v23, %v6522_v57  ;;  %v6618_v37 = vld [vmem:[%s11143_s6 + $0xf8] sm:$0xf] }
 0x1d7   :  { %vm1982_vm5 = vcmp.ge.f32.partialorder %v1963_v36, 0.0  ;;  %v1998_v12 = vmul.f32 0.01, %v1963_v36  ;;  %3361 = vmatpush.bf16.msrb.mxu2 %v6535_v63  ;;  %vm1983_vm6 = vcmp.ge.f32.partialorder %v1878_v46, 0.0  ;;  %v6619_v50 = vor.u32 %v7952_v55, %v6618_v37  ;;  %v7946_v37 = vld [vmem:[%s11143_s6 + $0xd0] sm:$0xf0] }
 0x1d8   :  { %3269 = vmatmul.bf16.vlgmr.msra.gmra.mxu2 %v8731_v30  ;;  %3293 = vmatmul.bf16.vlgmr.msra.gmra.mxu3 %v8692_v62  ;;  %v6774_v55 = vld [vmem:[%s11143_s6 + $0x230] sm:$0xf] }
 0x1d9   :  { %v2014_v40 = vsel %vm1982_vm5, %v1963_v36, %v1998_v12  ;;  %v1999_v36 = vmul.f32 0.01, %v1878_v46  ;;  %v1881_v12 = vadd.f32 %v9263_v15, %v1852_v58 }
 0x1da   :  { %v2027_v6 = vpack.c.bf16 %v2014_v40, %v2013_v29  ;;  %v1935_v34 = vpop.f32.mrf.mxu0  ;;  %3385 = vmatpush.bf16.msrb.mxu3 %v6631_v44  ;;  %v7949_v40 = vld [vmem:[%s11143_s6 + $0xe8] sm:$0xf0]  ;;  %v1825_v44 = vadd.f32 %v9174_v5, %v9207_v49  ;;  %v6498_v5 = vld [vmem:[%s11143_s6 + $0x8] sm:$0xf] }
 0x1db   :  { %v1936_v54 = vadd.f32 %v1935_v34, %v1907_v48  ;;  %v1964_v25 = vpop.f32.mrf.mxu1  ;;  %v9451_v27 = vpop.f32.mrf.mxu2  ;;  %3362 = vmatpush.bf16.msrb.mxu2 %v6523_v7  ;;  %v7925_v48 = vld [vmem:[%s11143_s6 + $0x28] sm:$0xf0]  ;;  %v2015_v11 = vsel %vm1983_vm6, %v1878_v46, %v1999_v36  ;;  %vm1985_vm8 = vcmp.ge.f32.partialorder %v1881_v12, 0.0  ;;  %v7922_v46 = vld [vmem:[%s11143_s6 + $0x10] sm:$0xf0] }
 0x1dc   :  { %2035 = vst [vmem:[%s11155_s18 + $0x10] sm:$0xff] %v2027_v6  ;;  %v9456_v61 = vpop.f32.mrf.mxu3  ;;  %v6511_v29 = vor.u32 %v7925_v48, %v6510_v10  ;;  %v6594_v7 = vld [vmem:[%s11143_s6 + $0xc8] sm:$0xf]  ;;  %v7991_v10 = vld [vmem:[%s11143_s6 + $0x238] sm:$0xf0] }
 0x1dd   :  { %v1965_v56 = vadd.f32 %v1964_v25, %v1936_v54  ;;  %v6607_v54 = vor.u32 %v7949_v40, %v6606_v47  ;;  %v2001_v25 = vmul.f32 0.01, %v1881_v12  ;;  %v6862_v48 = vld [vmem:[#allocation7 + $0xa8] sm:$0xf]  ;;  %v7870_v47 = vld [vmem:[#allocation7 + $0xb0] sm:$0xf0] }
 0x1de   :  { %3386 = vmatpush.bf16.msrb.mxu3 %v6619_v50  ;;  %v1854_v50 = vadd.f32 %v9176_v53, %v1825_v44  ;;  %v6958_v53 = vld [vmem:[#allocation7 + $0x168] sm:$0xf]  ;;  %v7894_v44 = vld [vmem:[#allocation7 + $0x170] sm:$0xf0] }
 0x1df   :  { %vm1984_vm7 = vcmp.ge.f32.partialorder %v1965_v56, 0.0  ;;  %v2000_v63 = vmul.f32 0.01, %v1965_v56  ;;  %3363 = vmatpush.bf16.msrb.mxu2 %v6511_v29  ;;  %v1912_v29 = vadd.f32 %v9287_v28, %v9265_v60  ;;  %v7988_v28 = vld [vmem:[%s11143_s6 + $0x220] sm:$0xf0] }
 0x1e0   :  { %v1883_v40 = vadd.f32 %v9305_v0, %v1854_v50  ;;  %v6850_v0 = vld [vmem:[#allocation7 + $0x90] sm:$0xf] }
 0x1e1   :  { %v2016_v15 = vsel %vm1984_vm7, %v1965_v56, %v2000_v63  ;;  %v6499_v56 = vor.u32 %v7922_v46, %v6498_v5  ;;  %v6595_v63 = vor.u32 %v7946_v37, %v6594_v7 }
 0x1e2   :  { %v2028_v6 = vpack.c.bf16 %v2016_v15, %v2015_v11  ;;  %v1938_v34 = vpop.f32.mrf.mxu0  ;;  %3387 = vmatpush.bf16.msrb.mxu3 %v6607_v54  ;;  %v6775_v11 = vor.u32 %v7991_v10, %v6774_v55  ;;  %v6863_v15 = vor.u32 %v7870_v47, %v6862_v48  ;;  %v6959_v54 = vor.u32 %v7894_v44, %v6958_v53  ;;  %v7985_v10 = vld [vmem:[%s11143_s6 + $0x208] sm:$0xf0]  ;;  %v6838_v48 = vld [vmem:[#allocation7 + $0x78] sm:$0xf] }
 0x1e3   :  { %v1939_v57 = vadd.f32 %v1938_v34, %v1910_v51  ;;  %v1967_v23 = vpop.f32.mrf.mxu1  ;;  %v9488_v58 = vpop.f32.mrf.mxu2  ;;  %3364 = vmatpush.bf16.msrb.mxu2 %v6499_v56  ;;  %v2003_v55 = vmul.f32 0.01, %v1883_v40  ;;  %vm1987_vm10 = vcmp.ge.f32.partialorder %v1883_v40, 0.0  ;;  %v1915_v44 = vadd.f32 %v9357_v18, %v9265_v60 }
 0x1e4   :  { %2036 = vst [vmem:[%s11155_s18 + $0x18] sm:$0xff] %v2028_v6  ;;  %v9493_v45 = vpop.f32.mrf.mxu3  ;;  %v2017_v6 = vsel %vm1985_vm8, %v1881_v12, %v2001_v25  ;;  %3405 = vmatpush.bf16.msra.mxu0 %v6775_v11  ;;  %3813 = vmatpush.bf16.msra.mxu1 %v6863_v15  ;;  %v7867_v25 = vld [vmem:[#allocation7 + $0x98] sm:$0xf0]  ;;  %v7864_v11 = vld [vmem:[#allocation7 + $0x80] sm:$0xf0] }
 0x1e5   :  { %v1968_v36 = vadd.f32 %v1967_v23, %v1939_v57  ;;  %3231 = vmatmul.bf16.gmra.mxu0 %v8753_v14  ;;  %v6762_v57 = vld [vmem:[%s11143_s6 + $0x218] sm:$0xf]  ;;  %v1828_v23 = vadd.f32 %v9205_v1, %v9207_v49  ;;  %v6851_v37 = vor.u32 %v7867_v25, %v6850_v0  ;;  %v6750_v1 = vld [vmem:[%s11143_s6 + $0x200] sm:$0xf]  ;;  %v6839_v53 = vor.u32 %v7864_v11, %v6838_v48  ;;  %v7979_v11 = vld [vmem:[%s11143_s6 + $0x1d8] sm:$0xf0] }
 0x1e6   :  { %3255 = vmatmul.bf16.gmra.mxu1 %v8758_v19  ;;  %3388 = vmatpush.bf16.msrb.mxu3 %v6595_v63  ;;  %v6763_v12 = vor.u32 %v7988_v28, %v6762_v57  ;;  %v7891_v57 = vld [vmem:[#allocation7 + $0x158] sm:$0xf0]  ;;  %v2019_v28 = vsel %vm1987_vm10, %v1883_v40, %v2003_v55  ;;  %v1830_v25 = vadd.f32 %v9256_v21, %v9207_v49  ;;  %v7982_v40 = vld [vmem:[%s11143_s6 + $0x1f0] sm:$0xf0] }
 0x1e7   :  { %vm1986_vm9 = vcmp.ge.f32.partialorder %v1968_v36, 0.0  ;;  %v2002_v51 = vmul.f32 0.01, %v1968_v36  ;;  %3837 = vmatpush.bf16.msra.mxu2 %v6959_v54  ;;  %v1857_v47 = vadd.f32 %v9209_v38, %v1828_v23  ;;  %v6946_v54 = vld [vmem:[#allocation7 + $0x150] sm:$0xf] }
 0x1e8   :  { %3274 = vmatmul.bf16.gmra.mxu2 %v8764_v32  ;;  %3298 = vmatmul.bf16.gmra.mxu3 %v8722_v42  ;;  %v6947_v38 = vor.u32 %v7891_v57, %v6946_v54  ;;  %v7042_v23 = vld [vmem:[#allocation7 + $0x210] sm:$0xf]  ;;  %v6934_v54 = vld [vmem:[#allocation7 + $0x138] sm:$0xf] }
 0x1e9   :  { %v2018_v34 = vsel %vm1986_vm9, %v1968_v36, %v2002_v51  ;;  %3406 = vmatpush.bf16.msra.mxu0 %v6763_v12  ;;  %3814 = vmatpush.bf16.msra.mxu1 %v6851_v37  ;;  %v6751_v51 = vor.u32 %v7985_v10, %v6750_v1  ;;  %v6738_v12 = vld [vmem:[%s11143_s6 + $0x1e8] sm:$0xf]  ;;  %v7861_v37 = vld [vmem:[#allocation7 + $0x68] sm:$0xf0] }
 0x1ea   :  { %v2029_v5 = vpack.c.bf16 %v2018_v34, %v2017_v6  ;;  %v1940_v46 = vpop.f32.mrf.mxu0  ;;  %v1886_v6 = vadd.f32 %v9362_v26, %v1857_v47  ;;  %v7918_v34 = vld [vmem:[#allocation7 + $0x230] sm:$0xf0]  ;;  %v6739_v10 = vor.u32 %v7982_v40, %v6738_v12  ;;  %v7855_v40 = vld [vmem:[#allocation7 + $0x38] sm:$0xf0] }
 0x1eb   :  { %v1941_v36 = vadd.f32 %v1940_v46, %v1912_v29  ;;  %v1969_v56 = vpop.f32.mrf.mxu1  ;;  %v9530_v7 = vpop.f32.mrf.mxu2  ;;  %v7054_v29 = vld [vmem:[#allocation7 + $0x228] sm:$0xf]  ;;  %v7915_v46 = vld [vmem:[#allocation7 + $0x218] sm:$0xf0]  ;;  %3838 = vmatpush.bf16.msra.mxu2 %v6947_v38  ;;  %v7912_v38 = vld [vmem:[#allocation7 + $0x200] sm:$0xf0] }
 0x1ec   :  { %2037 = vst [vmem:[%s11155_s18 + $0x20] sm:$0xff] %v2029_v5  ;;  %v9535_v50 = vpop.f32.mrf.mxu3  ;;  %v7055_v5 = vor.u32 %v7918_v34, %v7054_v29  ;;  %v7043_v26 = vor.u32 %v7915_v46, %v7042_v23  ;;  %v2005_v47 = vmul.f32 0.01, %v1886_v6  ;;  %v1859_v29 = vadd.f32 %v9261_v43, %v1830_v25  ;;  %v7888_v43 = vld [vmem:[#allocation7 + $0x140] sm:$0xf0] }
 0x1ed   :  { %v1970_v63 = vadd.f32 %v1969_v56, %v1941_v36  ;;  %3407 = vmatpush.bf16.msra.mxu0 %v6751_v51  ;;  %3815 = vmatpush.bf16.msra.mxu1 %v6839_v53  ;;  %v6826_v56 = vld [vmem:[#allocation7 + $0x60] sm:$0xf]  ;;  %v6726_v51 = vld [vmem:[%s11143_s6 + $0x1d0] sm:$0xf]  ;;  %vm1989_vm12 = vcmp.ge.f32.partialorder %v1886_v6, 0.0  ;;  %v6935_v12 = vor.u32 %v7888_v43, %v6934_v54 }
 0x1ee   :  { %3861 = vmatpush.bf16.msra.mxu3 %v7055_v5  ;;  %v6827_v48 = vor.u32 %v7861_v37, %v6826_v56  ;;  %v6727_v53 = vor.u32 %v7979_v11, %v6726_v51  ;;  %v7030_v5 = vld [vmem:[#allocation7 + $0x1f8] sm:$0xf]  ;;  %v2021_v23 = vsel %vm1989_vm12, %v1886_v6, %v2005_v47  ;;  %v6702_v47 = vld [vmem:[%s11143_s6 + $0x1a0] sm:$0xf]  ;;  %v6690_v43 = vld [vmem:[%s11143_s6 + $0x188] sm:$0xf] }
 0x1ef   :  { %vm1988_vm11 = vcmp.ge.f32.partialorder %v1970_v63, 0.0  ;;  %v2004_v15 = vmul.f32 0.01, %v1970_v63  ;;  %v7031_v25 = vor.u32 %v7912_v38, %v7030_v5  ;;  %3839 = vmatpush.bf16.msra.mxu2 %v6935_v12  ;;  %v6790_v51 = vld [vmem:[#allocation7 + $0x18] sm:$0xf] }
 0x1f0   :  { %v7970_v5 = vld [vmem:[%s11143_s6 + $0x190] sm:$0xf0]  ;;  %v6778_v38 = vld [vmem:[#allocation7] sm:$0xf] }
 0x1f1   :  { %v2020_v0 = vsel %vm1988_vm11, %v1970_v63, %v2004_v15  ;;  %v6814_v15 = vld [vmem:[#allocation7 + $0x48] sm:$0xf]  ;;  %3408 = vmatpush.bf16.msra.mxu0 %v6739_v10  ;;  %3816 = vmatpush.bf16.msra.mxu1 %v6827_v48  ;;  %v6691_v12 = vor.u32 %v7970_v5, %v6690_v43  ;;  %v6886_v43 = vld [vmem:[#allocation7 + $0xd8] sm:$0xf]  ;;  %v7876_v5 = vld [vmem:[#allocation7 + $0xe0] sm:$0xf0] }
 0x1f2   :  { %v2030_v18 = vpack.c.bf16 %v2020_v0, %v2019_v28  ;;  %v1943_v36 = vpop.f32.mrf.mxu0  ;;  %3862 = vmatpush.bf16.msra.mxu3 %v7043_v26  ;;  %v1917_v28 = vadd.f32 %v9411_v35, %v9265_v60  ;;  %v1888_v0 = vadd.f32 %v9409_v24, %v1859_v29  ;;  %v7976_v60 = vld [vmem:[%s11143_s6 + $0x1c0] sm:$0xf0]  ;;  %v6802_v24 = vld [vmem:[#allocation7 + $0x30] sm:$0xf] }
 0x1f3   :  { %v1944_v55 = vadd.f32 %v1943_v36, %v1915_v44  ;;  %v1972_v63 = vpop.f32.mrf.mxu1  ;;  %v9555_v1 = vpop.f32.mrf.mxu2  ;;  %v7858_v44 = vld [vmem:[#allocation7 + $0x50] sm:$0xf0] }
 0x1f4   :  { %2038 = vst [vmem:[%s11155_s18 + $0x28] sm:$0xff] %v2030_v18  ;;  %v9560_v49 = vpop.f32.mrf.mxu3  ;;  %v6815_v57 = vor.u32 %v7858_v44, %v6814_v15  ;;  %v6714_v18 = vld [vmem:[%s11143_s6 + $0x1b8] sm:$0xf]  ;;  %vm1991_vm14 = vcmp.ge.f32.partialorder %v1888_v0, 0.0  ;;  %v7852_v15 = vld [vmem:[#allocation7 + $0x20] sm:$0xf0] }
 0x1f5   :  { %v1973_v21 = vadd.f32 %v1972_v63, %v1944_v55  ;;  %3317 = vmatmul.bf16.vlgmr.msrb.gmra.mxu0 %v8695_v8  ;;  %v6715_v26 = vor.u32 %v7976_v60, %v6714_v18  ;;  %v6803_v55 = vor.u32 %v7855_v40, %v6802_v24  ;;  %v2007_v63 = vmul.f32 0.01, %v1888_v0  ;;  %v6910_v40 = vld [vmem:[#allocation7 + $0x108] sm:$0xf] }
 0x1f6   :  { %3341 = vmatmul.bf16.vlgmr.msrb.gmra.mxu1 %v8731_v30  ;;  %3409 = vmatpush.bf16.msra.mxu0 %v6727_v53  ;;  %v6922_v53 = vld [vmem:[#allocation7 + $0x120] sm:$0xf]  ;;  %v6791_v44 = vor.u32 %v7852_v15, %v6790_v51 }
 0x1f7   :  { %vm1990_vm13 = vcmp.ge.f32.partialorder %v1973_v21, 0.0  ;;  %v2006_v34 = vmul.f32 0.01, %v1973_v21  ;;  %3817 = vmatpush.bf16.msra.mxu1 %v6815_v57  ;;  %3863 = vmatpush.bf16.msra.mxu3 %v7031_v25  ;;  %v2023_v54 = vsel %vm1991_vm14, %v1888_v0, %v2007_v63  ;;  %v7849_v25 = vld [vmem:[#allocation7 + $0x8] sm:$0xf0] }
 0x1f8   :  { %3279 = vmatmul.bf16.gmra.mxu2 %v8795_v33  ;;  %3303 = vmatmul.bf16.gmra.mxu3 %v8753_v14  ;;  %v6779_v60 = vor.u32 %v7849_v25, %v6778_v38  ;;  %v7906_v63 = vld [vmem:[#allocation7 + $0x1d0] sm:$0xf0]  ;;  %v6982_v38 = vld [vmem:[#allocation7 + $0x198] sm:$0xf] }
 0x1f9   :  { %v2022_v46 = vsel %vm1990_vm13, %v1973_v21, %v2006_v34  ;;  %v7973_v21 = vld [vmem:[%s11143_s6 + $0x1a8] sm:$0xf0] }
 0x1fa   :  { %v2031_v35 = vpack.c.bf16 %v2022_v46, %v2021_v23  ;;  %v1945_v36 = vpop.f32.mrf.mxu0  ;;  %3410 = vmatpush.bf16.msra.mxu0 %v6715_v26  ;;  %v6703_v11 = vor.u32 %v7973_v21, %v6702_v47  ;;  %v7885_v34 = vld [vmem:[#allocation7 + $0x128] sm:$0xf0]  ;;  %v2089_v21 = vld [vmem:[%s11152_s15] sm:$0x3] }
 0x1fb   :  { %v1946_v56 = vadd.f32 %v1945_v36, %v1917_v28  ;;  %v1974_v37 = vpop.f32.mrf.mxu1  ;;  %v9583_v6 = vpop.f32.mrf.mxu2  ;;  %3818 = vmatpush.bf16.msra.mxu1 %v6803_v55  ;;  %v6923_v28 = vor.u32 %v7885_v34, %v6922_v53  ;;  %v7909_v36 = vld [vmem:[#allocation7 + $0x1e8] sm:$0xf0]  ;;  %v7006_v55 = vld [vmem:[#allocation7 + $0x1c8] sm:$0xf]  ;;  %v7879_v53 = vld [vmem:[#allocation7 + $0xf8] sm:$0xf0] }
 0x1fc   :  { %2039 = vst [vmem:[%s11155_s18 + $0x30] sm:$0xff] %v2031_v35  ;;  %v9588_v10 = vpop.f32.mrf.mxu3  ;;  %v7018_v35 = vld [vmem:[#allocation7 + $0x1e0] sm:$0xf] }
 0x1fd   :  { %v1975_v48 = vadd.f32 %v1974_v37, %v1946_v56  ;;  %3840 = vmatpush.bf16.msra.mxu2 %v6923_v28  ;;  %v7019_v26 = vor.u32 %v7909_v36, %v7018_v35  ;;  %v7882_v56 = vld [vmem:[#allocation7 + $0x110] sm:$0xf0]  ;;  %v9628_v28 = vperm.slane %v2089_v21, 0 }
 0x1fe   :  { %3411 = vmatpush.bf16.msra.mxu0 %v6703_v11  ;;  %v6911_v37 = vor.u32 %v7882_v56, %v6910_v40  ;;  %v6874_v56 = vld [vmem:[#allocation7 + $0xc0] sm:$0xf] }
 0x1ff   :  { %vm1992_vm15 = vcmp.ge.f32.partialorder %v1975_v48, 0.0  ;;  %v2008_v29 = vmul.f32 0.01, %v1975_v48  ;;  %3819 = vmatpush.bf16.msra.mxu1 %v6791_v44  ;;  %3864 = vmatpush.bf16.msra.mxu3 %v7019_v26  ;;  %v6994_v44 = vld [vmem:[#allocation7 + $0x1b0] sm:$0xf]  ;;  %v2409_v35 = vadd.f32 %v9451_v27, %v9628_v28 }
 0x201   :  { %v2024_v57 = vsel %vm1992_vm15, %v1975_v48, %v2008_v29  ;;  %v7007_v48 = vor.u32 %v7906_v63, %v7006_v55  ;;  %3841 = vmatpush.bf16.msra.mxu2 %v6911_v37  ;;  %v6898_v29 = vld [vmem:[#allocation7 + $0xf0] sm:$0xf]  ;;  %v7873_v37 = vld [vmem:[#allocation7 + $0xc8] sm:$0xf0]  ;;  %v6970_v55 = vld [vmem:[#allocation7 + $0x180] sm:$0xf] }
 0x202   :  { %v2032_v23 = vpack.c.bf16 %v2024_v57, %v2023_v54  ;;  %v9602_v46 = vpop.f32.mrf.mxu0  ;;  %3412 = vmatpush.bf16.msra.mxu0 %v6691_v12  ;;  %v6899_v34 = vor.u32 %v7879_v53, %v6898_v29  ;;  %v7903_v54 = vld [vmem:[#allocation7 + $0x1b8] sm:$0xf0]  ;;  %v7900_v12 = vld [vmem:[#allocation7 + $0x1a0] sm:$0xf0]  ;;  %v9640_v63 = vperm.slane %v2089_v21, 1 }
 0x203   :  { %v9604_v18 = vpop.f32.mrf.mxu1  ;;  %v9606_v0 = vpop.f32.mrf.mxu2  ;;  %3820 = vmatpush.bf16.msra.mxu1 %v6779_v60  ;;  %3865 = vmatpush.bf16.msra.mxu3 %v7007_v48  ;;  %v6995_v57 = vor.u32 %v7903_v54, %v6994_v44  ;;  %v6983_v60 = vor.u32 %v7900_v12, %v6982_v38  ;;  %v6875_v48 = vor.u32 %v7873_v37, %v6874_v56  ;;  %v7897_v29 = vld [vmem:[#allocation7 + $0x188] sm:$0xf0]  ;;  %v6864_v44 = vld [vmem:[#allocation7 + $0xb4] sm:$0xf0]  ;;  %v7866_v38 = vld [vmem:[#allocation7 + $0x94] sm:$0xf] }
 0x204   :  { %2040 = vst [vmem:[%s11155_s18 + $0x38] sm:$0xff] %v2032_v23  ;;  %v9611_v24 = vpop.f32.mrf.mxu3  ;;  %v6887_v23 = vor.u32 %v7876_v5, %v6886_v43  ;;  %v6971_v27 = vor.u32 %v7897_v29, %v6970_v55  ;;  %v7869_v53 = vld [vmem:[#allocation7 + $0xac] sm:$0xf]  ;;  %v2438_v54 = vadd.f32 %v9456_v61, %v2409_v35  ;;  %v6960_v43 = vld [vmem:[#allocation7 + $0x174] sm:$0xf0]  ;;  %v2411_v37 = vadd.f32 %v9488_v58, %v9628_v28 }
 0x205   :  { %3322 = vmatmul.bf16.gmra.mxu0 %v8725_v13  ;;  %3842 = vmatpush.bf16.msra.mxu2 %v6899_v34  ;;  %v7893_v34 = vld [vmem:[#allocation7 + $0x16c] sm:$0xf]  ;;  %v7890_v12 = vld [vmem:[#allocation7 + $0x154] sm:$0xf]  ;;  %v6948_v35 = vld [vmem:[#allocation7 + $0x15c] sm:$0xf0] }
 0x206   :  { %3346 = vmatmul.bf16.gmra.mxu1 %v8764_v32  ;;  %v6963_v21 = vor.u32 %v7893_v34, %v6960_v43  ;;  %v2467_v5 = vadd.f32 %v9602_v46, %v2438_v54  ;;  %v6951_v46 = vor.u32 %v7890_v12, %v6948_v35  ;;  %v7863_v54 = vld [vmem:[#allocation7 + $0x7c] sm:$0xf]  ;;  %v2440_v43 = vadd.f32 %v9493_v45, %v2411_v37  ;;  %v6936_v35 = vld [vmem:[#allocation7 + $0x144] sm:$0xf0] }
 0x207   :  { %3866 = vmatpush.bf16.msra.mxu3 %v6995_v57  ;;  %v6867_v57 = vor.u32 %v7869_v53, %v6864_v44  ;;  %v7917_v44 = vld [vmem:[#allocation7 + $0x22c] sm:$0xf]  ;;  %v7871_v58 = vld [vmem:[#allocation7 + $0xb8] sm:$0xf0] }
 0x208   :  { %3365 = vmatmul.bf16.vlgmr.msrb.gmra.mxu2 %v8692_v62  ;;  %3389 = vmatmul.bf16.vlgmr.msrb.gmra.mxu3 %v8695_v8  ;;  %vm2573_vm0 = vcmp.ge.f32.partialorder %v2467_v5, 0.0  ;;  %v2589_v53 = vmul.f32 0.01, %v2467_v5 }
 0x209   :  { %3843 = vmatpush.bf16.msra.mxu2 %v6887_v23  ;;  %3885 = vmatpush.bf16.msrb.mxu0 %v6867_v57  ;;  %v6852_v23 = vld [vmem:[#allocation7 + $0x9c] sm:$0xf0]  ;;  %v6840_v57 = vld [vmem:[#allocation7 + $0x84] sm:$0xf0] }
 0x20a   :  { %v9617_v47 = vpop.f32.mrf.mxu0  ;;  %3909 = vmatpush.bf16.msrb.mxu1 %v6963_v21  ;;  %v6855_v61 = vor.u32 %v7866_v38, %v6852_v23  ;;  %v6870_v38 = vld [vmem:[#allocation7 + $0xb0] sm:$0xf]  ;;  %v6843_v23 = vor.u32 %v7863_v54, %v6840_v57  ;;  %v2605_v3 = vsel %vm2573_vm0, %v2467_v5, %v2589_v53 }
 0x20b   :  { %v9622_v51 = vpop.f32.mrf.mxu1  ;;  %v9624_v11 = vpop.f32.mrf.mxu2  ;;  %3867 = vmatpush.bf16.msra.mxu3 %v6983_v60  ;;  %v2496_v60 = vadd.f32 %v9604_v18, %v9640_v63  ;;  %v7056_v18 = vld [vmem:[#allocation7 + $0x234] sm:$0xf0]  ;;  %v6924_v54 = vld [vmem:[#allocation7 + $0x12c] sm:$0xf0] }
 0x20c   :  { %v9626_v15 = vpop.f32.mrf.mxu3  ;;  %v7059_v21 = vor.u32 %v7917_v44, %v7056_v18  ;;  %v2498_v45 = vadd.f32 %v9622_v51, %v9640_v63  ;;  %v7914_v51 = vld [vmem:[#allocation7 + $0x214] sm:$0xf] }
 0x20d   :  { %3844 = vmatpush.bf16.msra.mxu2 %v6875_v48  ;;  %3886 = vmatpush.bf16.msrb.mxu0 %v6855_v61  ;;  %v6939_v61 = vor.u32 %v7887_v9, %v6936_v35  ;;  %v7857_v35 = vld [vmem:[#allocation7 + $0x4c] sm:$0xf] }
 0x20e   :  { %3910 = vmatpush.bf16.msrb.mxu1 %v6951_v46  ;;  %v6828_v46 = vld [vmem:[#allocation7 + $0x6c] sm:$0xf0] }
 0x20f   :  { %3868 = vmatpush.bf16.msra.mxu3 %v6971_v27 }
 0x211   :  { %3933 = vmatpush.bf16.msrb.mxu2 %v7059_v21  ;;  %3887 = vmatpush.bf16.msrb.mxu0 %v6843_v23 }
 0x212   :  { %v9630_v25 = vpop.f32.mrf.mxu0  ;;  %3911 = vmatpush.bf16.msrb.mxu1 %v6939_v61  ;;  %v6816_v61 = vld [vmem:[#allocation7 + $0x54] sm:$0xf0] }
 0x213   :  { %v9634_v36 = vpop.f32.mrf.mxu1  ;;  %v9636_v26 = vpop.f32.mrf.mxu2 }
 0x214   :  { %v9638_v40 = vpop.f32.mrf.mxu3 }
 0x215   :  { %3327 = vmatmul.bf16.gmra.mxu0 %v8758_v19 }
 0x216   :  { %3351 = vmatmul.bf16.gmra.mxu1 %v8795_v33 }
 0x218   :  { %3370 = vmatmul.bf16.gmra.mxu2 %v8722_v42  ;;  %3394 = vmatmul.bf16.gmra.mxu3 %v8725_v13 }
 0x21a   :  { %v9650_v56 = vpop.f32.mrf.mxu0 }
 0x21b   :  { %v9654_v55 = vpop.f32.mrf.mxu1  ;;  %v2524_v48 = vpop.f32.mrf.mxu2 }
 0x21c   :  { %v2525_v29 = vadd.f32 %v2524_v48, %v2496_v60  ;;  %v2553_v27 = vpop.f32.mrf.mxu3  ;;  %v6871_v60 = vor.u32 %v7871_v58, %v6870_v38  ;;  %v2469_v48 = vadd.f32 %v9617_v47, %v2440_v43  ;;  %v2414_v47 = vadd.f32 %v9530_v7, %v9628_v28  ;;  %v6858_v7 = vld [vmem:[#allocation7 + $0x98] sm:$0xf]  ;;  %v7868_v58 = vld [vmem:[#allocation7 + $0xa0] sm:$0xf0] }
 0x21e   :  { %v2554_v34 = vadd.f32 %v2553_v27, %v2525_v29  ;;  %v7860_v29 = vld [vmem:[#allocation7 + $0x64] sm:$0xf]  ;;  %3957 = vmatpush.bf16.msrb.mxu3 %v6871_v60  ;;  %vm2575_vm2 = vcmp.ge.f32.partialorder %v2469_v48, 0.0  ;;  %v2591_v53 = vmul.f32 0.01, %v2469_v48  ;;  %v2443_v23 = vadd.f32 %v9535_v50, %v2414_v47 }
 0x21f   :  { %v7884_v27 = vld [vmem:[#allocation7 + $0x124] sm:$0xf]  ;;  %v6831_v18 = vor.u32 %v7860_v29, %v6828_v46  ;;  %v6859_v60 = vor.u32 %v7868_v58, %v6858_v7  ;;  %v7881_v29 = vld [vmem:[#allocation7 + $0x10c] sm:$0xf]  ;;  %v7854_v50 = vld [vmem:[#allocation7 + $0x34] sm:$0xf] }
 0x220   :  { %vm2574_vm1 = vcmp.ge.f32.partialorder %v2554_v34, 0.0  ;;  %v2590_v12 = vmul.f32 0.01, %v2554_v34  ;;  %v6927_v21 = vor.u32 %v7884_v27, %v6924_v54  ;;  %v6819_v27 = vor.u32 %v7857_v35, %v6816_v61  ;;  %v6804_v54 = vld [vmem:[#allocation7 + $0x3c] sm:$0xf0] }
 0x221   :  { %3888 = vmatpush.bf16.msrb.mxu0 %v6831_v18  ;;  %v7878_v47 = vld [vmem:[#allocation7 + $0xf4] sm:$0xf] }
 0x222   :  { %v2606_v37 = vsel %vm2574_vm1, %v2554_v34, %v2590_v12  ;;  %v9661_v44 = vpop.f32.mrf.mxu0  ;;  %3912 = vmatpush.bf16.msrb.mxu1 %v6927_v21  ;;  %3958 = vmatpush.bf16.msrb.mxu3 %v6859_v60  ;;  %v7865_v60 = vld [vmem:[#allocation7 + $0x88] sm:$0xf0] }
 0x223   :  { %v2621_v57 = vpack.c.bf16 %v2606_v37, %v2605_v3  ;;  %v9665_v43 = vpop.f32.mrf.mxu1  ;;  %v2526_v9 = vpop.f32.mrf.mxu2  ;;  %v7044_v3 = vld [vmem:[#allocation7 + $0x21c] sm:$0xf0]  ;;  %v2472_v37 = vadd.f32 %v9630_v25, %v2443_v23  ;;  %v2416_v25 = vadd.f32 %v9555_v1, %v9628_v28  ;;  %v7032_v23 = vld [vmem:[#allocation7 + $0x204] sm:$0xf0] }
 0x224   :  { %v2527_v38 = vadd.f32 %v2526_v9, %v2498_v45  ;;  %v2555_v5 = vpop.f32.mrf.mxu3  ;;  %v7047_v12 = vor.u32 %v7914_v51, %v7044_v3  ;;  %v6912_v45 = vld [vmem:[#allocation7 + $0x114] sm:$0xf0]  ;;  %v2501_v9 = vadd.f32 %v9634_v36, %v9640_v63  ;;  %v7911_v36 = vld [vmem:[#allocation7 + $0x1fc] sm:$0xf] }
 0x225   :  { %2629 = vst [vmem:[%s11158_s21] sm:$0xff] %v2621_v57  ;;  %3413 = vmatmul.bf16.vlgmr.msra.gmra.mxu0 %v8731_v30  ;;  %v6915_v18 = vor.u32 %v7881_v29, %v6912_v45  ;;  %v2607_v57 = vsel %vm2575_vm2, %v2469_v48, %v2591_v53  ;;  %vm2577_vm4 = vcmp.ge.f32.partialorder %v2472_v37, 0.0  ;;  %v2593_v53 = vmul.f32 0.01, %v2472_v37  ;;  %v7908_v29 = vld [vmem:[#allocation7 + $0x1e4] sm:$0xf] }
 0x226   :  { %v2556_v34 = vadd.f32 %v2555_v5, %v2527_v38  ;;  %3821 = vmatmul.bf16.vlgmr.msra.gmra.mxu1 %v8662_v41  ;;  %3934 = vmatpush.bf16.msrb.mxu2 %v7047_v12  ;;  %v6846_v12 = vld [vmem:[#allocation7 + $0x80] sm:$0xf]  ;;  %v2445_v1 = vadd.f32 %v9560_v49, %v2416_v25  ;;  %v7035_v35 = vor.u32 %v7911_v36, %v7032_v23 }
 0x227   :  { %3889 = vmatpush.bf16.msrb.mxu0 %v6819_v27  ;;  %3913 = vmatpush.bf16.msrb.mxu1 %v6915_v18  ;;  %v6847_v61 = vor.u32 %v7865_v60, %v6846_v12  ;;  %v7851_v27 = vld [vmem:[#allocation7 + $0x1c] sm:$0xf]  ;;  %v6792_v18 = vld [vmem:[#allocation7 + $0x24] sm:$0xf0]  ;;  %v2609_v49 = vsel %vm2577_vm4, %v2472_v37, %v2593_v53 }
 0x228   :  { %vm2576_vm3 = vcmp.ge.f32.partialorder %v2556_v34, 0.0  ;;  %v2592_v46 = vmul.f32 0.01, %v2556_v34  ;;  %3375 = vmatmul.bf16.gmra.mxu2 %v8753_v14  ;;  %3399 = vmatmul.bf16.gmra.mxu3 %v8758_v19  ;;  %v6807_v14 = vor.u32 %v7854_v50, %v6804_v54  ;;  %v6900_v19 = vld [vmem:[#allocation7 + $0xfc] sm:$0xf0]  ;;  %v2474_v50 = vadd.f32 %v9650_v56, %v2445_v1 }
 0x229   :  { %v6903_v7 = vor.u32 %v7878_v47, %v6900_v19  ;;  %3959 = vmatpush.bf16.msrb.mxu3 %v6847_v61  ;;  %v6795_v47 = vor.u32 %v7851_v27, %v6792_v18  ;;  %v2419_v56 = vadd.f32 %v9583_v6, %v9628_v28  ;;  %v6834_v60 = vld [vmem:[#allocation7 + $0x68] sm:$0xf]  ;;  %v7905_v1 = vld [vmem:[#allocation7 + $0x1cc] sm:$0xf]  ;;  %v7859_v27 = vld [vmem:[#allocation7 + $0x58] sm:$0xf0] }
 0x22a   :  { %v2608_v21 = vsel %vm2576_vm3, %v2556_v34, %v2592_v46  ;;  %v9679_v38 = vpop.f32.mrf.mxu0  ;;  %v7020_v46 = vld [vmem:[#allocation7 + $0x1ec] sm:$0xf0]  ;;  %3935 = vmatpush.bf16.msrb.mxu2 %v7035_v35  ;;  %vm2579_vm6 = vcmp.ge.f32.partialorder %v2474_v50, 0.0 }
 0x22b   :  { %v2622_v5 = vpack.c.bf16 %v2608_v21, %v2607_v57  ;;  %v9683_v51 = vpop.f32.mrf.mxu1  ;;  %v2529_v3 = vpop.f32.mrf.mxu2  ;;  %3890 = vmatpush.bf16.msrb.mxu0 %v6807_v14  ;;  %3914 = vmatpush.bf16.msrb.mxu1 %v6903_v7  ;;  %v7023_v54 = vor.u32 %v7908_v29, %v7020_v46  ;;  %v7875_v57 = vld [vmem:[#allocation7 + $0xdc] sm:$0xf]  ;;  %v7848_v21 = vld [vmem:[#allocation7 + $0x4] sm:$0xf]  ;;  %v2503_v14 = vadd.f32 %v9654_v55, %v9640_v63  ;;  %v7862_v55 = vld [vmem:[#allocation7 + $0x70] sm:$0xf0] }
 0x22c   :  { %v2530_v58 = vadd.f32 %v2529_v3, %v2501_v9  ;;  %v2558_v48 = vpop.f32.mrf.mxu3  ;;  %v6888_v9 = vld [vmem:[#allocation7 + $0xe4] sm:$0xf0]  ;;  %v6780_v3 = vld [vmem:[#allocation7 + $0xc] sm:$0xf0]  ;;  %v7872_v7 = vld [vmem:[#allocation7 + $0xc4] sm:$0xf]  ;;  %v6835_v6 = vor.u32 %v7862_v55, %v6834_v60 }
 0x22d   :  { %2630 = vst [vmem:[%s11158_s21 + $0x8] sm:$0xff] %v2622_v5  ;;  %v6891_v5 = vor.u32 %v7875_v57, %v6888_v9  ;;  %v6783_v12 = vor.u32 %v7848_v21, %v6780_v3  ;;  %v7008_v29 = vld [vmem:[#allocation7 + $0x1d4] sm:$0xf0]  ;;  %v6822_v46 = vld [vmem:[#allocation7 + $0x50] sm:$0xf] }
 0x22e   :  { %v2559_v34 = vadd.f32 %v2558_v48, %v2530_v58  ;;  %v6876_v58 = vld [vmem:[#allocation7 + $0xcc] sm:$0xf0]  ;;  %3936 = vmatpush.bf16.msrb.mxu2 %v7023_v54  ;;  %3960 = vmatpush.bf16.msrb.mxu3 %v6835_v6  ;;  %v7011_v18 = vor.u32 %v7905_v1, %v7008_v29  ;;  %v2421_v54 = vadd.f32 %v9606_v0, %v9628_v28  ;;  %v6996_v0 = vld [vmem:[#allocation7 + $0x1bc] sm:$0xf0]  ;;  %v6984_v60 = vld [vmem:[#allocation7 + $0x1a4] sm:$0xf0] }
 0x22f   :  { %3891 = vmatpush.bf16.msrb.mxu0 %v6795_v47  ;;  %3915 = vmatpush.bf16.msrb.mxu1 %v6891_v5  ;;  %v6879_v35 = vor.u32 %v7872_v7, %v6876_v58  ;;  %v6823_v47 = vor.u32 %v7859_v27, %v6822_v46  ;;  %v6798_v55 = vld [vmem:[#allocation7 + $0x20] sm:$0xf]  ;;  %v7853_v1 = vld [vmem:[#allocation7 + $0x28] sm:$0xf0]  ;;  %v2508_v46 = vadd.f32 %v9683_v51, %v9640_v63 }
 0x230   :  { %vm2578_vm5 = vcmp.ge.f32.partialorder %v2559_v34, 0.0  ;;  %v2594_v45 = vmul.f32 0.01, %v2559_v34 }
 0x232   :  { %v2610_v19 = vsel %vm2578_vm5, %v2559_v34, %v2594_v45  ;;  %v9693_v25 = vpop.f32.mrf.mxu0  ;;  %v2595_v34 = vmul.f32 0.01, %v2474_v50  ;;  %v2448_v45 = vadd.f32 %v9588_v10, %v2419_v56  ;;  %3937 = vmatpush.bf16.msrb.mxu2 %v7011_v18  ;;  %v2506_v10 = vadd.f32 %v9665_v43, %v9640_v63  ;;  %3961 = vmatpush.bf16.msrb.mxu3 %v6823_v47  ;;  %v7902_v56 = vld [vmem:[#allocation7 + $0x1b4] sm:$0xf] }
 0x233   :  { %v2623_v48 = vpack.c.bf16 %v2610_v19, %v2609_v49  ;;  %v9697_v36 = vpop.f32.mrf.mxu1  ;;  %v2531_v23 = vpop.f32.mrf.mxu2  ;;  %3892 = vmatpush.bf16.msrb.mxu0 %v6783_v12  ;;  %3916 = vmatpush.bf16.msrb.mxu1 %v6879_v35  ;;  %v6999_v43 = vor.u32 %v7902_v56, %v6996_v0  ;;  %v6799_v35 = vor.u32 %v7853_v1, %v6798_v55  ;;  %v7895_v0 = vld [vmem:[#allocation7 + $0x178] sm:$0xf0] }
 0x234   :  { %v2532_v37 = vadd.f32 %v2531_v23, %v2503_v14  ;;  %v2560_v53 = vpop.f32.mrf.mxu3  ;;  %v2477_v9 = vadd.f32 %v9661_v44, %v2448_v45  ;;  %v2611_v21 = vsel %vm2579_vm6, %v2474_v50, %v2595_v34  ;;  %v2450_v44 = vadd.f32 %v9611_v24, %v2421_v54  ;;  %v7856_v50 = vld [vmem:[#allocation7 + $0x40] sm:$0xf0] }
 0x235   :  { %2631 = vst [vmem:[%s11158_s21 + $0x10] sm:$0xff] %v2623_v48  ;;  %3418 = vmatmul.bf16.gmra.mxu0 %v8764_v32  ;;  %v6810_v48 = vld [vmem:[#allocation7 + $0x38] sm:$0xf]  ;;  %v2511_v55 = vadd.f32 %v9697_v36, %v9640_v63  ;;  %v7246_v36 = vld [vmem:[%s11145_s8 + $0x168] sm:$0xf] }
 0x236   :  { %v2561_v61 = vadd.f32 %v2560_v53, %v2532_v37  ;;  %3826 = vmatmul.bf16.gmra.mxu1 %v8692_v62  ;;  %v2597_v23 = vmul.f32 0.01, %v2477_v9  ;;  %v6811_v37 = vor.u32 %v7856_v50, %v6810_v48  ;;  %v7899_v53 = vld [vmem:[#allocation7 + $0x19c] sm:$0xf]  ;;  %vm2581_vm8 = vcmp.ge.f32.partialorder %v2477_v9, 0.0  ;;  %3938 = vmatpush.bf16.msrb.mxu2 %v6999_v43 }
 0x237   :  { %v2479_v34 = vadd.f32 %v9679_v38, %v2450_v44  ;;  %v6987_v6 = vor.u32 %v7899_v53, %v6984_v60  ;;  %v7062_v48 = vld [vmem:[#allocation7 + $0x230] sm:$0xf]  ;;  %v7919_v44 = vld [vmem:[#allocation7 + $0x238] sm:$0xf0]  ;;  %v6954_v53 = vld [vmem:[#allocation7 + $0x158] sm:$0xf] }
 0x238   :  { %vm2580_vm7 = vcmp.ge.f32.partialorder %v2561_v61, 0.0  ;;  %v2596_v57 = vmul.f32 0.01, %v2561_v61  ;;  %3845 = vmatmul.bf16.vlgmr.msra.gmra.mxu2 %v8664_v17  ;;  %3869 = vmatmul.bf16.vlgmr.msra.gmra.mxu3 %v8701_v16  ;;  %v2613_v29 = vsel %vm2581_vm8, %v2477_v9, %v2597_v23  ;;  %v7850_v9 = vld [vmem:[#allocation7 + $0x10] sm:$0xf0]  ;;  %v7063_v43 = vor.u32 %v7919_v44, %v7062_v48 }
 0x239   :  { %3962 = vmatpush.bf16.msrb.mxu3 %v6811_v37  ;;  %v2599_v18 = vmul.f32 0.01, %v2479_v34  ;;  %vm2583_vm10 = vcmp.ge.f32.partialorder %v2479_v34, 0.0  ;;  %v7892_v60 = vld [vmem:[#allocation7 + $0x160] sm:$0xf0] }
 0x23a   :  { %v2612_v49 = vsel %vm2580_vm7, %v2561_v61, %v2596_v57  ;;  %v9712_v14 = vpop.f32.mrf.mxu0  ;;  %v2424_v61 = vadd.f32 %v9624_v11, %v9628_v28  ;;  %3939 = vmatpush.bf16.msrb.mxu2 %v6987_v6  ;;  %4005 = vmatpush.bf16.msra.mxu1 %v7063_v43  ;;  %v6930_v43 = vld [vmem:[#allocation7 + $0x128] sm:$0xf] }
 0x23b   :  { %v2624_v19 = vpack.c.bf16 %v2612_v49, %v2611_v21  ;;  %v9714_v5 = vpop.f32.mrf.mxu1  ;;  %v2534_v3 = vpop.f32.mrf.mxu2  ;;  %v7896_v49 = vld [vmem:[#allocation7 + $0x184] sm:$0xf]  ;;  %v2615_v37 = vsel %vm2583_vm10, %v2479_v34, %v2599_v18 }
 0x23c   :  { %v2535_v7 = vadd.f32 %v2534_v3, %v2506_v10  ;;  %v2563_v58 = vpop.f32.mrf.mxu3  ;;  %v6786_v3 = vld [vmem:[#allocation7 + $0x8] sm:$0xf]  ;;  %v2453_v11 = vadd.f32 %v9626_v15, %v2424_v61  ;;  %v7050_v61 = vld [vmem:[#allocation7 + $0x218] sm:$0xf] }
 0x23d   :  { %2632 = vst [vmem:[%s11158_s21 + $0x18] sm:$0xff] %v2624_v19  ;;  %3963 = vmatpush.bf16.msrb.mxu3 %v6799_v35  ;;  %v6972_v19 = vld [vmem:[#allocation7 + $0x18c] sm:$0xf0]  ;;  %v6787_v56 = vor.u32 %v7850_v9, %v6786_v3  ;;  %v6955_v35 = vor.u32 %v7892_v60, %v6954_v53 }
 0x23e   :  { %v2564_v12 = vadd.f32 %v2563_v58, %v2535_v7  ;;  %v6975_v51 = vor.u32 %v7896_v49, %v6972_v19  ;;  %v6966_v7 = vld [vmem:[#allocation7 + $0x170] sm:$0xf]  ;;  %v9734_v23 = vadd.f32 %v9693_v25, %v2453_v11  ;;  %v8086_v25 = vld [vmem:[%s11145_s8 + $0xb0] sm:$0xf0]  ;;  %v7038_v49 = vld [vmem:[#allocation7 + $0x200] sm:$0xf] }
 0x23f   :  { %v6967_v15 = vor.u32 %v7895_v0, %v6966_v7  ;;  %v7138_v9 = vld [vmem:[%s11145_s8 + $0x90] sm:$0xf]  ;;  %v8083_v7 = vld [vmem:[%s11145_s8 + $0x98] sm:$0xf0] }
 0x240   :  { %vm2582_vm9 = vcmp.ge.f32.partialorder %v2564_v12, 0.0  ;;  %v2598_v24 = vmul.f32 0.01, %v2564_v12  ;;  %3940 = vmatpush.bf16.msrb.mxu2 %v6975_v51  ;;  %v7913_v51 = vld [vmem:[#allocation7 + $0x208] sm:$0xf0]  ;;  %vm2585_vm12 = vcmp.ge.f32.partialorder %v9734_v23, 0.0 }
 0x241   :  { %3964 = vmatpush.bf16.msrb.mxu3 %v6787_v56  ;;  %3981 = vmatpush.bf16.msra.mxu0 %v6967_v15  ;;  %v7139_v56 = vor.u32 %v8083_v7, %v7138_v9  ;;  %v8107_v0 = vld [vmem:[%s11145_s8 + $0x158] sm:$0xf0] }
 0x242   :  { %v2614_v27 = vsel %vm2582_vm9, %v2564_v12, %v2598_v24  ;;  %v3222_v45 = vpop.f32.mrf.mxu0  ;;  %v2426_v12 = vadd.f32 %v9636_v26, %v9628_v28  ;;  %v7916_v28 = vld [vmem:[#allocation7 + $0x220] sm:$0xf0]  ;;  %v2601_v26 = vmul.f32 0.01, %v9734_v23 }
 0x243   :  { %v2625_v47 = vpack.c.bf16 %v2614_v27, %v2613_v29  ;;  %v3246_v57 = vpop.f32.mrf.mxu1  ;;  %v2536_v38 = vpop.f32.mrf.mxu2  ;;  %v7051_v27 = vor.u32 %v7916_v28, %v7050_v61 }
 0x244   :  { %v9725_v54 = vadd.f32 %v3246_v57, %v3222_v45  ;;  %v2537_v21 = vadd.f32 %v2536_v38, %v2508_v46  ;;  %v2565_v10 = vpop.f32.mrf.mxu3  ;;  %v8110_v57 = vld [vmem:[%s11145_s8 + $0x170] sm:$0xf0]  ;;  %v6942_v38 = vld [vmem:[#allocation7 + $0x140] sm:$0xf]  ;;  %v2455_v19 = vadd.f32 %v9638_v40, %v2426_v12  ;;  %v7234_v40 = vld [vmem:[%s11145_s8 + $0x150] sm:$0xf]  ;;  %v2617_v12 = vsel %vm2585_vm12, %v9734_v23, %v2601_v26 }
 0x245   :  { %2633 = vst [vmem:[%s11158_s21 + $0x20] sm:$0xff] %v2625_v47  ;;  %3423 = vmatmul.bf16.gmra.mxu0 %v8795_v33  ;;  %v7150_v33 = vld [vmem:[%s11145_s8 + $0xa8] sm:$0xf]  ;;  %4006 = vmatpush.bf16.msra.mxu1 %v7051_v27  ;;  %v7235_v15 = vor.u32 %v8107_v0, %v7234_v40  ;;  %v7014_v27 = vld [vmem:[#allocation7 + $0x1d0] sm:$0xf] }
 0x246   :  { %v2566_v58 = vadd.f32 %v2565_v10, %v2537_v21  ;;  %3831 = vmatmul.bf16.gmra.mxu1 %v8722_v42  ;;  %v7151_v24 = vor.u32 %v8086_v25, %v7150_v33  ;;  %3982 = vmatpush.bf16.msra.mxu0 %v6955_v35  ;;  %v7247_v21 = vor.u32 %v8110_v57, %v7246_v36  ;;  %v7889_v10 = vld [vmem:[#allocation7 + $0x148] sm:$0xf0]  ;;  %v7026_v33 = vld [vmem:[#allocation7 + $0x1e8] sm:$0xf]  ;;  %v7222_v36 = vld [vmem:[%s11145_s8 + $0x138] sm:$0xf] }
 0x247   :  { %v6943_v11 = vor.u32 %v7889_v10, %v6942_v38  ;;  %v2484_v48 = vadd.f32 %v9712_v14, %v2455_v19  ;;  %v8104_v57 = vld [vmem:[%s11145_s8 + $0x140] sm:$0xf0] }
 0x248   :  { %vm2584_vm11 = vcmp.ge.f32.partialorder %v2566_v58, 0.0  ;;  %v2600_v50 = vmul.f32 0.01, %v2566_v58  ;;  %3850 = vmatmul.bf16.gmra.mxu2 %v8695_v8  ;;  %3874 = vmatmul.bf16.gmra.mxu3 %v8731_v30  ;;  %v7223_v10 = vor.u32 %v8104_v57, %v7222_v36  ;;  %v7880_v19 = vld [vmem:[#allocation7 + $0x100] sm:$0xf0] }
 0x249   :  { %4709 = vmatpush.bf16.msra.mxu2 %v7151_v24  ;;  %4733 = vmatpush.bf16.msra.mxu3 %v7247_v21  ;;  %v2603_v35 = vmul.f32 0.01, %v2484_v48  ;;  %vm2587_vm14 = vcmp.ge.f32.partialorder %v2484_v48, 0.0 }
 0x24a   :  { %v2616_v6 = vsel %vm2584_vm11, %v2566_v58, %v2600_v50  ;;  %v3224_v1 = vpop.f32.mrf.mxu0  ;;  %v7039_v58 = vor.u32 %v7913_v51, %v7038_v49  ;;  %3983 = vmatpush.bf16.msra.mxu0 %v6943_v11  ;;  %v7886_v50 = vld [vmem:[#allocation7 + $0x130] sm:$0xf0]  ;;  %v6906_v49 = vld [vmem:[#allocation7 + $0xf8] sm:$0xf] }
 0x24b   :  { %v2626_v34 = vpack.c.bf16 %v2616_v6, %v2615_v37  ;;  %v3248_v29 = vpop.f32.mrf.mxu1  ;;  %v2539_v46 = vpop.f32.mrf.mxu2  ;;  %v2513_v37 = vadd.f32 %v9714_v5, %v9640_v63  ;;  %v6931_v60 = vor.u32 %v7886_v50, %v6930_v43  ;;  %v7126_v63 = vld [vmem:[%s11145_s8 + $0x78] sm:$0xf]  ;;  %v8080_v5 = vld [vmem:[%s11145_s8 + $0x80] sm:$0xf0]  ;;  %v2619_v11 = vsel %vm2587_vm14, %v2484_v48, %v2603_v35  ;;  %v7114_v48 = vld [vmem:[%s11145_s8 + $0x60] sm:$0xf] }
 0x24c   :  { %v9750_v45 = vadd.f32 %v3248_v29, %v3224_v1  ;;  %v2540_v18 = vadd.f32 %v2539_v46, %v2511_v55  ;;  %v2568_v47 = vpop.f32.mrf.mxu3  ;;  %4007 = vmatpush.bf16.msra.mxu1 %v7039_v58  ;;  %v7910_v55 = vld [vmem:[#allocation7 + $0x1f0] sm:$0xf0]  ;;  %v7127_v26 = vor.u32 %v8080_v5, %v7126_v63  ;;  %v6918_v29 = vld [vmem:[#allocation7 + $0x110] sm:$0xf]  ;;  %v7883_v46 = vld [vmem:[#allocation7 + $0x118] sm:$0xf0]  ;;  %v6907_v7 = vor.u32 %v7880_v19, %v6906_v49 }
 0x24d   :  { %2634 = vst [vmem:[%s11158_s21 + $0x28] sm:$0xff] %v2626_v34  ;;  %4710 = vmatpush.bf16.msra.mxu2 %v7139_v56  ;;  %4734 = vmatpush.bf16.msra.mxu3 %v7235_v15  ;;  %v7027_v24 = vor.u32 %v7910_v55, %v7026_v33  ;;  %v7904_v58 = vld [vmem:[#allocation7 + $0x1c0] sm:$0xf0]  ;;  %v8077_v33 = vld [vmem:[%s11145_s8 + $0x68] sm:$0xf0] }
 0x24e   :  { %v2569_v3 = vadd.f32 %v2568_v47, %v2540_v18  ;;  %3984 = vmatpush.bf16.msra.mxu0 %v6931_v60  ;;  %v6919_v18 = vor.u32 %v7883_v46, %v6918_v29  ;;  %v7907_v47 = vld [vmem:[#allocation7 + $0x1d8] sm:$0xf0]  ;;  %v7877_v60 = vld [vmem:[#allocation7 + $0xe8] sm:$0xf0]  ;;  %v6990_v55 = vld [vmem:[#allocation7 + $0x1a0] sm:$0xf] }
 0x24f   :  { %v7015_v21 = vor.u32 %v7907_v47, %v7014_v27  ;;  %v8074_v35 = vld [vmem:[%s11145_s8 + $0x50] sm:$0xf0]  ;;  %v6978_v5 = vld [vmem:[#allocation7 + $0x188] sm:$0xf]  ;;  %v8071_v49 = vld [vmem:[%s11145_s8 + $0x38] sm:$0xf0] }
 0x250   :  { %vm2586_vm13 = vcmp.ge.f32.partialorder %v2569_v3, 0.0  ;;  %v2602_v44 = vmul.f32 0.01, %v2569_v3  ;;  %4008 = vmatpush.bf16.msra.mxu1 %v7027_v24  ;;  %v7102_v24 = vld [vmem:[%s11145_s8 + $0x48] sm:$0xf] }
 0x251   :  { %4711 = vmatpush.bf16.msra.mxu2 %v7127_v26  ;;  %4735 = vmatpush.bf16.msra.mxu3 %v7223_v10  ;;  %v7874_v63 = vld [vmem:[#allocation7 + $0xd0] sm:$0xf0] }
 0x252   :  { %v2618_v25 = vsel %vm2586_vm13, %v2569_v3, %v2602_v44  ;;  %v3227_v53 = vpop.f32.mrf.mxu0  ;;  %v7002_v3 = vld [vmem:[#allocation7 + $0x1b8] sm:$0xf]  ;;  %3985 = vmatpush.bf16.msra.mxu0 %v6919_v18  ;;  %v7898_v29 = vld [vmem:[#allocation7 + $0x190] sm:$0xf0] }
 0x253   :  { %v2627_v6 = vpack.c.bf16 %v2618_v25, %v2617_v12  ;;  %v3251_v14 = vpop.f32.mrf.mxu1  ;;  %v2541_v1 = vpop.f32.mrf.mxu2  ;;  %v7003_v44 = vor.u32 %v7904_v58, %v7002_v3  ;;  %v7115_v12 = vor.u32 %v8077_v33, %v7114_v48  ;;  %v6894_v25 = vld [vmem:[#allocation7 + $0xe0] sm:$0xf]  ;;  %v6979_v18 = vor.u32 %v7898_v29, %v6978_v5  ;;  %v7186_v3 = vld [vmem:[%s11145_s8 + $0xf0] sm:$0xf]  ;;  %v7174_v48 = vld [vmem:[%s11145_s8 + $0xd8] sm:$0xf] }
 0x254   :  { %v9779_v61 = vadd.f32 %v3251_v14, %v3227_v53  ;;  %v2542_v28 = vadd.f32 %v2541_v1, %v2513_v37  ;;  %v2570_v34 = vpop.f32.mrf.mxu3  ;;  %4009 = vmatpush.bf16.msra.mxu1 %v7015_v21  ;;  %v8101_v37 = vld [vmem:[%s11145_s8 + $0x128] sm:$0xf0]  ;;  %v6895_v14 = vor.u32 %v7877_v60, %v6894_v25  ;;  %v8098_v21 = vld [vmem:[%s11145_s8 + $0x110] sm:$0xf0] }
 0x255   :  { %2635 = vst [vmem:[%s11158_s21 + $0x30] sm:$0xff] %v2627_v6  ;;  %3893 = vmatmul.bf16.vlgmr.msrb.gmra.mxu0 %v8662_v41  ;;  %v7901_v6 = vld [vmem:[#allocation7 + $0x1a8] sm:$0xf0]  ;;  %4712 = vmatpush.bf16.msra.mxu2 %v7115_v12 }
 0x256   :  { %v2571_v23 = vadd.f32 %v2570_v34, %v2542_v28  ;;  %3917 = vmatmul.bf16.vlgmr.msrb.gmra.mxu1 %v8664_v17  ;;  %3986 = vmatpush.bf16.msra.mxu0 %v6907_v7  ;;  %v6991_v1 = vor.u32 %v7901_v6, %v6990_v55  ;;  %v7103_v28 = vor.u32 %v8074_v35, %v7102_v24  ;;  %v6882_v34 = vld [vmem:[#allocation7 + $0xc8] sm:$0xf]  ;;  %v7066_v6 = vld [vmem:[%s11145_s8] sm:$0xf]  ;;  %v8089_v24 = vld [vmem:[%s11145_s8 + $0xc8] sm:$0xf0] }
 0x257   :  { %v6883_v26 = vor.u32 %v7874_v63, %v6882_v34  ;;  %v7342_v35 = vld [vmem:[%s11145_s8 + $0x228] sm:$0xf]  ;;  %v8085_v5 = vld [vmem:[%s11145_s8 + $0xac] sm:$0xf] }
 0x258   :  { %vm2588_vm15 = vcmp.ge.f32.partialorder %v2571_v23, 0.0  ;;  %v2604_v38 = vmul.f32 0.01, %v2571_v23  ;;  %3855 = vmatmul.bf16.gmra.mxu2 %v8725_v13  ;;  %3879 = vmatmul.bf16.gmra.mxu3 %v8764_v32  ;;  %v8109_v29 = vld [vmem:[%s11145_s8 + $0x16c] sm:$0xf] }
 0x259   :  { %4010 = vmatpush.bf16.msra.mxu1 %v7003_v44  ;;  %4713 = vmatpush.bf16.msra.mxu2 %v7103_v28  ;;  %v8068_v44 = vld [vmem:[%s11145_s8 + $0x20] sm:$0xf0]  ;;  %v8134_v28 = vld [vmem:[%s11145_s8 + $0x230] sm:$0xf0] }
 0x25a   :  { %v2620_v51 = vsel %vm2588_vm15, %v2571_v23, %v2604_v38  ;;  %v3229_v9 = vpop.f32.mrf.mxu0  ;;  %3987 = vmatpush.bf16.msra.mxu0 %v6895_v14  ;;  %v7198_v38 = vld [vmem:[%s11145_s8 + $0x108] sm:$0xf]  ;;  %v8065_v14 = vld [vmem:[%s11145_s8 + $0x8] sm:$0xf0]  ;;  %v7343_v63 = vor.u32 %v8134_v28, %v7342_v35 }
 0x25b   :  { %v2628_v56 = vpack.c.bf16 %v2620_v51, %v2619_v11  ;;  %v3253_v40 = vpop.f32.mrf.mxu1  ;;  %v3270_v0 = vpop.f32.mrf.mxu2  ;;  %v7199_v10 = vor.u32 %v8098_v21, %v7198_v38  ;;  %v8095_v11 = vld [vmem:[%s11145_s8 + $0xf8] sm:$0xf0] }
 0x25c   :  { %v9801_v15 = vadd.f32 %v3253_v40, %v3229_v9  ;;  %v9804_v43 = vadd.f32 %v3270_v0, %v9725_v54  ;;  %v9806_v50 = vpop.f32.mrf.mxu3  ;;  %v7210_v54 = vld [vmem:[%s11145_s8 + $0x120] sm:$0xf]  ;;  %v7187_v51 = vor.u32 %v8095_v11, %v7186_v3  ;;  %v7078_v0 = vld [vmem:[%s11145_s8 + $0x18] sm:$0xf]  ;;  %v8131_v38 = vld [vmem:[%s11145_s8 + $0x218] sm:$0xf0] }
 0x25d   :  { %2636 = vst [vmem:[%s11158_s21 + $0x38] sm:$0xff] %v2628_v56  ;;  %v7211_v53 = vor.u32 %v8101_v37, %v7210_v54  ;;  %4011 = vmatpush.bf16.msra.mxu1 %v6991_v1  ;;  %v7079_v33 = vor.u32 %v8068_v44, %v7078_v0  ;;  %v7162_v1 = vld [vmem:[%s11145_s8 + $0xc0] sm:$0xf]  ;;  %v7318_v0 = vld [vmem:[%s11145_s8 + $0x1f8] sm:$0xf] }
 0x25e   :  { %3988 = vmatpush.bf16.msra.mxu0 %v6883_v26  ;;  %v7163_v34 = vor.u32 %v8089_v24, %v7162_v1  ;;  %v8128_v44 = vld [vmem:[%s11145_s8 + $0x200] sm:$0xf0]  ;;  %v7306_v1 = vld [vmem:[%s11145_s8 + $0x1e0] sm:$0xf] }
 0x25f   :  { %4736 = vmatpush.bf16.msra.mxu3 %v7211_v53  ;;  %v8076_v24 = vld [vmem:[%s11145_s8 + $0x64] sm:$0xf] }
 0x261   :  { %4012 = vmatpush.bf16.msra.mxu1 %v6979_v18  ;;  %v7330_v18 = vld [vmem:[%s11145_s8 + $0x210] sm:$0xf] }
 0x262   :  { %v3232_v23 = vpop.f32.mrf.mxu0  ;;  %4757 = vmatpush.bf16.msrb.mxu0 %v7343_v63 }
 0x263   :  { %v3256_v46 = vpop.f32.mrf.mxu1  ;;  %v3272_v27 = vpop.f32.mrf.mxu2  ;;  %4737 = vmatpush.bf16.msra.mxu3 %v7199_v10  ;;  %v7331_v10 = vor.u32 %v8131_v38, %v7330_v18  ;;  %v8103_v18 = vld [vmem:[%s11145_s8 + $0x13c] sm:$0xf] }
 0x264   :  { %v9829_v47 = vadd.f32 %v3256_v46, %v3232_v23  ;;  %v9832_v36 = vadd.f32 %v3272_v27, %v9750_v45  ;;  %v9834_v57 = vpop.f32.mrf.mxu3  ;;  %v7090_v45 = vld [vmem:[%s11145_s8 + $0x30] sm:$0xf]  ;;  %v7152_v23 = vld [vmem:[%s11145_s8 + $0xb4] sm:$0xf0] }
 0x265   :  { %3898 = vmatmul.bf16.gmra.mxu0 %v8692_v62  ;;  %v7091_v19 = vor.u32 %v8071_v49, %v7090_v45  ;;  %v7155_v26 = vor.u32 %v8085_v5, %v7152_v23  ;;  %v7248_v46 = vld [vmem:[%s11145_s8 + $0x174] sm:$0xf0]  ;;  %v7140_v45 = vld [vmem:[%s11145_s8 + $0x9c] sm:$0xf0] }
 0x266   :  { %3922 = vmatmul.bf16.gmra.mxu1 %v8695_v8  ;;  %v7251_v27 = vor.u32 %v8109_v29, %v7248_v46  ;;  %4758 = vmatpush.bf16.msrb.mxu0 %v7331_v10 }
 0x267   :  { %4714 = vmatpush.bf16.msra.mxu2 %v7091_v19  ;;  %4738 = vmatpush.bf16.msra.mxu3 %v7187_v51 }
 0x268   :  { %3941 = vmatmul.bf16.vlgmr.msrb.gmra.mxu2 %v8701_v16  ;;  %3965 = vmatmul.bf16.vlgmr.msrb.gmra.mxu3 %v8662_v41 }
 0x269   :  { %4781 = vmatpush.bf16.msrb.mxu1 %v7155_v26 }
 0x26a   :  { %v3234_v9 = vpop.f32.mrf.mxu0 }
 0x26b   :  { %v3258_v7 = vpop.f32.mrf.mxu1  ;;  %v3275_v58 = vpop.f32.mrf.mxu2  ;;  %4715 = vmatpush.bf16.msra.mxu2 %v7079_v33  ;;  %v7128_v33 = vld [vmem:[%s11145_s8 + $0x84] sm:$0xf0] }
 0x26c   :  { %v9858_v56 = vadd.f32 %v3258_v7, %v3234_v9  ;;  %v9861_v40 = vadd.f32 %v3275_v58, %v9779_v61  ;;  %v9863_v41 = vpop.f32.mrf.mxu3  ;;  %v8092_v61 = vld [vmem:[%s11145_s8 + $0xe0] sm:$0xf0]  ;;  %v8133_v58 = vld [vmem:[%s11145_s8 + $0x22c] sm:$0xf] }
 0x26d   :  { %v7175_v12 = vor.u32 %v8092_v61, %v7174_v48  ;;  %v8079_v48 = vld [vmem:[%s11145_s8 + $0x7c] sm:$0xf]  ;;  %v7319_v61 = vor.u32 %v8128_v44, %v7318_v0 }
 0x26f   :  { %4739 = vmatpush.bf16.msra.mxu3 %v7175_v12  ;;  %v7131_v12 = vor.u32 %v8079_v48, %v7128_v33  ;;  %4759 = vmatpush.bf16.msrb.mxu0 %v7319_v61 }
 0x272   :  { %v3318_v54 = vpop.f32.mrf.mxu0 }
 0x273   :  { %v3319_v37 = vadd.f32 %v3318_v54, %v9806_v50  ;;  %v3342_v25 = vpop.f32.mrf.mxu1  ;;  %v3277_v53 = vpop.f32.mrf.mxu2  ;;  %4740 = vmatpush.bf16.msra.mxu3 %v7163_v34  ;;  %v8106_v54 = vld [vmem:[%s11145_s8 + $0x154] sm:$0xf]  ;;  %v7116_v34 = vld [vmem:[%s11145_s8 + $0x6c] sm:$0xf0] }
 0x274   :  { %v9879_v60 = vadd.f32 %v3277_v53, %v9801_v15  ;;  %v9881_v55 = vpop.f32.mrf.mxu3  ;;  %v7067_v15 = vor.u32 %v8065_v14, %v7066_v6  ;;  %v7332_v6 = vld [vmem:[%s11145_s8 + $0x21c] sm:$0xf0]  ;;  %v7119_v26 = vor.u32 %v8076_v24, %v7116_v34  ;;  %v8067_v24 = vld [vmem:[%s11145_s8 + $0x1c] sm:$0xf] }
 0x275   :  { %v9892_v50 = vadd.f32 %v3342_v25, %v3319_v37  ;;  %3903 = vmatmul.bf16.gmra.mxu0 %v8722_v42  ;;  %v7236_v37 = vld [vmem:[%s11145_s8 + $0x15c] sm:$0xf0]  ;;  %v8130_v25 = vld [vmem:[%s11145_s8 + $0x214] sm:$0xf] }
 0x276   :  { %3927 = vmatmul.bf16.gmra.mxu1 %v8725_v13  ;;  %4716 = vmatpush.bf16.msra.mxu2 %v7067_v15  ;;  %v7239_v53 = vor.u32 %v8106_v54, %v7236_v37  ;;  %v7335_v14 = vor.u32 %v8130_v25, %v7332_v6  ;;  %v8125_v15 = vld [vmem:[%s11145_s8 + $0x1e8] sm:$0xf0]  ;;  %v7212_v54 = vld [vmem:[%s11145_s8 + $0x12c] sm:$0xf0] }
 0x277   :  { %v7307_v28 = vor.u32 %v8125_v15, %v7306_v1  ;;  %v7308_v6 = vld [vmem:[%s11145_s8 + $0x1ec] sm:$0xf0]  ;;  %v8116_v15 = vld [vmem:[%s11145_s8 + $0x1a0] sm:$0xf0] }
 0x278   :  { %3946 = vmatmul.bf16.gmra.mxu2 %v8731_v30  ;;  %3970 = vmatmul.bf16.gmra.mxu3 %v8692_v62  ;;  %v8082_v62 = vld [vmem:[%s11145_s8 + $0x94] sm:$0xf] }
 0x279   :  { %v7143_v11 = vor.u32 %v8082_v62, %v7140_v45  ;;  %4760 = vmatpush.bf16.msrb.mxu0 %v7307_v28  ;;  %v8073_v62 = vld [vmem:[%s11145_s8 + $0x4c] sm:$0xf] }
 0x27a   :  { %v3320_v21 = vpop.f32.mrf.mxu0  ;;  %4805 = vmatpush.bf16.msrb.mxu2 %v7251_v27 }
 0x27b   :  { %v3321_v49 = vadd.f32 %v3320_v21, %v9834_v57  ;;  %v3344_v19 = vpop.f32.mrf.mxu1  ;;  %v3280_v3 = vpop.f32.mrf.mxu2  ;;  %v7344_v57 = vld [vmem:[%s11145_s8 + $0x234] sm:$0xf0]  ;;  %4782 = vmatpush.bf16.msrb.mxu1 %v7143_v11  ;;  %v8119_v11 = vld [vmem:[%s11145_s8 + $0x1b8] sm:$0xf0] }
 0x27c   :  { %v9933_v51 = vadd.f32 %v3280_v3, %v9829_v47  ;;  %v9935_v9 = vpop.f32.mrf.mxu3  ;;  %v7347_v47 = vor.u32 %v8133_v58, %v7344_v57  ;;  %v7104_v21 = vld [vmem:[%s11145_s8 + $0x54] sm:$0xf0]  ;;  %v7282_v3 = vld [vmem:[%s11145_s8 + $0x1b0] sm:$0xf]  ;;  %v8070_v58 = vld [vmem:[%s11145_s8 + $0x34] sm:$0xf] }
 0x27d   :  { %v9937_v7 = vadd.f32 %v3344_v19, %v3321_v49  ;;  %v7107_v45 = vor.u32 %v8073_v62, %v7104_v21  ;;  %v7320_v49 = vld [vmem:[%s11145_s8 + $0x204] sm:$0xf0]  ;;  %v7283_v0 = vor.u32 %v8119_v11, %v7282_v3 }
 0x27e   :  { %4829 = vmatpush.bf16.msrb.mxu3 %v7347_v47  ;;  %4806 = vmatpush.bf16.msrb.mxu2 %v7239_v53 }
 0x27f   :  { %4783 = vmatpush.bf16.msrb.mxu1 %v7131_v12  ;;  %v8100_v12 = vld [vmem:[%s11145_s8 + $0x124] sm:$0xf] }
 0x280   :  { %v7215_v53 = vor.u32 %v8100_v12, %v7212_v54 }
 0x282   :  { %v3323_v35 = vpop.f32.mrf.mxu0  ;;  %4830 = vmatpush.bf16.msrb.mxu3 %v7335_v14  ;;  %v7270_v14 = vld [vmem:[%s11145_s8 + $0x198] sm:$0xf] }
 0x283   :  { %v3324_v63 = vadd.f32 %v3323_v35, %v9863_v41  ;;  %v3347_v5 = vpop.f32.mrf.mxu1  ;;  %v3282_v23 = vpop.f32.mrf.mxu2  ;;  %v7224_v41 = vld [vmem:[%s11145_s8 + $0x144] sm:$0xf0]  ;;  %4784 = vmatpush.bf16.msrb.mxu1 %v7119_v26  ;;  %v7271_v28 = vor.u32 %v8116_v15, %v7270_v14  ;;  %v7258_v26 = vld [vmem:[%s11145_s8 + $0x180] sm:$0xf] }
 0x284   :  { %v9983_v29 = vadd.f32 %v3282_v23, %v9858_v56  ;;  %v9985_v46 = vpop.f32.mrf.mxu3  ;;  %v7294_v56 = vld [vmem:[%s11145_s8 + $0x1c8] sm:$0xf]  ;;  %v7227_v38 = vor.u32 %v8103_v18, %v7224_v41  ;;  %v8113_v18 = vld [vmem:[%s11145_s8 + $0x188] sm:$0xf0]  ;;  %v8064_v41 = vld [vmem:[%s11145_s8 + $0x4] sm:$0xf] }
 0x285   :  { %v9987_v27 = vadd.f32 %v3347_v5, %v3324_v63  ;;  %3989 = vmatmul.bf16.vlgmr.msra.gmra.mxu0 %v8664_v17  ;;  %v8122_v17 = vld [vmem:[%s11145_s8 + $0x1d0] sm:$0xf0]  ;;  %v7080_v35 = vld [vmem:[%s11145_s8 + $0x24] sm:$0xf0]  ;;  %v8097_v63 = vld [vmem:[%s11145_s8 + $0x10c] sm:$0xf] }
 0x286   :  { %4013 = vmatmul.bf16.vlgmr.msra.gmra.mxu1 %v8701_v16  ;;  %v7295_v10 = vor.u32 %v8122_v17, %v7294_v56  ;;  %v8127_v16 = vld [vmem:[%s11145_s8 + $0x1fc] sm:$0xf]  ;;  %4807 = vmatpush.bf16.msrb.mxu2 %v7227_v38  ;;  %v7083_v34 = vor.u32 %v8067_v24, %v7080_v35  ;;  %v7200_v5 = vld [vmem:[%s11145_s8 + $0x114] sm:$0xf0]  ;;  %v7259_v38 = vor.u32 %v8113_v18, %v7258_v26  ;;  %v7068_v17 = vld [vmem:[%s11145_s8 + $0xc] sm:$0xf0] }
 0x287   :  { %v7323_v19 = vor.u32 %v8127_v16, %v7320_v49  ;;  %4785 = vmatpush.bf16.msrb.mxu1 %v7107_v45  ;;  %v7203_v23 = vor.u32 %v8097_v63, %v7200_v5  ;;  %v7071_v45 = vor.u32 %v8064_v41, %v7068_v17  ;;  %v8121_v49 = vld [vmem:[%s11145_s8 + $0x1cc] sm:$0xf]  ;;  %v7272_v14 = vld [vmem:[%s11145_s8 + $0x1a4] sm:$0xf0]  ;;  %v8088_v5 = vld [vmem:[%s11145_s8 + $0xc4] sm:$0xf] }
 0x288   :  { %3951 = vmatmul.bf16.gmra.mxu2 %v8764_v32  ;;  %3975 = vmatmul.bf16.gmra.mxu3 %v8722_v42  ;;  %v7092_v42 = vld [vmem:[%s11145_s8 + $0x3c] sm:$0xf0]  ;;  %v7260_v18 = vld [vmem:[%s11145_s8 + $0x18c] sm:$0xf0] }
 0x289   :  { %4761 = vmatpush.bf16.msrb.mxu0 %v7295_v10  ;;  %4831 = vmatpush.bf16.msrb.mxu3 %v7323_v19  ;;  %v7095_v33 = vor.u32 %v8070_v58, %v7092_v42  ;;  %v7296_v19 = vld [vmem:[%s11145_s8 + $0x1d4] sm:$0xf0]  ;;  %v8094_v58 = vld [vmem:[%s11145_s8 + $0xf4] sm:$0xf]  ;;  %v7158_v41 = vld [vmem:[%s11145_s8 + $0xb0] sm:$0xf] }
 0x28a   :  { %v3325_v57 = vpop.f32.mrf.mxu0  ;;  %4808 = vmatpush.bf16.msrb.mxu2 %v7215_v53  ;;  %v8091_v53 = vld [vmem:[%s11145_s8 + $0xdc] sm:$0xf] }
 0x28b   :  { %v3326_v47 = vadd.f32 %v3325_v57, %v9881_v55  ;;  %v3349_v44 = vpop.f32.mrf.mxu1  ;;  %v3366_v48 = vpop.f32.mrf.mxu2  ;;  %v8124_v55 = vld [vmem:[%s11145_s8 + $0x1e4] sm:$0xf]  ;;  %4786 = vmatpush.bf16.msrb.mxu1 %v7095_v33  ;;  %v7188_v57 = vld [vmem:[%s11145_s8 + $0xfc] sm:$0xf0] }
 0x28c   :  { %v3390_v61 = vpop.f32.mrf.mxu3  ;;  %v7311_v1 = vor.u32 %v8124_v55, %v7308_v6  ;;  %v7176_v55 = vld [vmem:[%s11145_s8 + $0xe4] sm:$0xf0] }
 0x28d   :  { %v10036_v37 = vadd.f32 %v3349_v44, %v3326_v47  ;;  %v10038_v25 = vadd.f32 %v3390_v61, %v3366_v48  ;;  %4762 = vmatpush.bf16.msrb.mxu0 %v7283_v0  ;;  %v7191_v0 = vor.u32 %v8094_v58, %v7188_v57  ;;  %v7179_v6 = vor.u32 %v8091_v53, %v7176_v55 }
 0x28e   :  { %4832 = vmatpush.bf16.msrb.mxu3 %v7311_v1  ;;  %4809 = vmatpush.bf16.msrb.mxu2 %v7203_v23  ;;  %v7164_v23 = vld [vmem:[%s11145_s8 + $0xcc] sm:$0xf0] }
 0x28f   :  { %4787 = vmatpush.bf16.msrb.mxu1 %v7083_v34 }
 0x291   :  { %4763 = vmatpush.bf16.msrb.mxu0 %v7271_v28 }
 0x292   :  { %v3328_v56 = vpop.f32.mrf.mxu0  ;;  %4810 = vmatpush.bf16.msrb.mxu2 %v7191_v0 }
 0x293   :  { %v3329_v62 = vadd.f32 %v3328_v56, %v9935_v9  ;;  %v3352_v21 = vpop.f32.mrf.mxu1  ;;  %v3368_v10 = vpop.f32.mrf.mxu2  ;;  %v7299_v9 = vor.u32 %v8121_v49, %v7296_v19  ;;  %4788 = vmatpush.bf16.msrb.mxu1 %v7071_v45  ;;  %v8087_v56 = vld [vmem:[%s11145_s8 + $0xb8] sm:$0xf0]  ;;  %v7242_v45 = vld [vmem:[%s11145_s8 + $0x158] sm:$0xf]  ;;  %v8108_v19 = vld [vmem:[%s11145_s8 + $0x160] sm:$0xf0] }
 0x294   :  { %v3392_v16 = vpop.f32.mrf.mxu3  ;;  %v7159_v17 = vor.u32 %v8087_v56, %v7158_v41  ;;  %v7243_v0 = vor.u32 %v8108_v19, %v7242_v45 }
 0x295   :  { %v10083_v3 = vadd.f32 %v3352_v21, %v3329_v62  ;;  %v10085_v11 = vadd.f32 %v3392_v16, %v3368_v10  ;;  %3994 = vmatmul.bf16.gmra.mxu0 %v8695_v8  ;;  %4833 = vmatpush.bf16.msrb.mxu3 %v7299_v9  ;;  %v8118_v8 = vld [vmem:[%s11145_s8 + $0x1b4] sm:$0xf]  ;;  %v8111_v62 = vld [vmem:[%s11145_s8 + $0x178] sm:$0xf0]  ;;  %v8084_v10 = vld [vmem:[%s11145_s8 + $0xa0] sm:$0xf0] }
 0x296   :  { %4018 = vmatmul.bf16.gmra.mxu1 %v8731_v30  ;;  %4764 = vmatpush.bf16.msrb.mxu0 %v7259_v38  ;;  %v7284_v30 = vld [vmem:[%s11145_s8 + $0x1bc] sm:$0xf0] }
 0x297   :  { %v7287_v42 = vor.u32 %v8118_v8, %v7284_v30  ;;  %4811 = vmatpush.bf16.msrb.mxu2 %v7179_v6  ;;  %v8105_v6 = vld [vmem:[%s11145_s8 + $0x148] sm:$0xf0] }
 0x298   :  { %4717 = vmatmul.bf16.vlgmr.msra.gmra.mxu2 %v8878_v22  ;;  %4741 = vmatmul.bf16.vlgmr.msra.gmra.mxu3 %v8880_v31 }
 0x299   :  { %4834 = vmatpush.bf16.msrb.mxu3 %v7287_v42  ;;  %v7350_v42 = vld [vmem:[%s11145_s8 + $0x230] sm:$0xf] }
 0x29a   :  { %v3330_v47 = vpop.f32.mrf.mxu0  ;;  %4853 = vmatpush.bf16.msra.mxu0 %v7159_v17  ;;  %v8132_v17 = vld [vmem:[%s11145_s8 + $0x220] sm:$0xf0] }
 0x29b   :  { %v3331_v44 = vadd.f32 %v3330_v47, %v9985_v46  ;;  %v3354_v48 = vpop.f32.mrf.mxu1  ;;  %v3371_v33 = vpop.f32.mrf.mxu2  ;;  %v8115_v46 = vld [vmem:[%s11145_s8 + $0x19c] sm:$0xf] }
 0x29c   :  { %v3395_v61 = vpop.f32.mrf.mxu3  ;;  %v7275_v15 = vor.u32 %v8115_v46, %v7272_v14  ;;  %v8135_v47 = vld [vmem:[%s11145_s8 + $0x238] sm:$0xf0]  ;;  %v7230_v46 = vld [vmem:[%s11145_s8 + $0x140] sm:$0xf] }
 0x29d   :  { %v10104_v12 = vadd.f32 %v3354_v48, %v3331_v44  ;;  %v10106_v54 = vadd.f32 %v3395_v61, %v3371_v33  ;;  %v7351_v48 = vor.u32 %v8135_v47, %v7350_v42  ;;  %v7134_v33 = vld [vmem:[%s11145_s8 + $0x80] sm:$0xf]  ;;  %v8081_v61 = vld [vmem:[%s11145_s8 + $0x88] sm:$0xf0]  ;;  %v7231_v14 = vor.u32 %v8105_v6, %v7230_v46  ;;  %v8096_v47 = vld [vmem:[%s11145_s8 + $0x100] sm:$0xf0] }
 0x29e   :  { %4835 = vmatpush.bf16.msrb.mxu3 %v7275_v15  ;;  %v7135_v55 = vor.u32 %v8081_v61, %v7134_v33  ;;  %v8078_v15 = vld [vmem:[%s11145_s8 + $0x70] sm:$0xf0]  ;;  %v8129_v46 = vld [vmem:[%s11145_s8 + $0x208] sm:$0xf0] }
 0x2a2   :  { %v3414_v1 = vpop.f32.mrf.mxu0 }
 0x2a3   :  { %v10121_v24 = vadd.f32 %v3414_v1, %v10038_v25  ;;  %v3822_v35 = vpop.f32.mrf.mxu1  ;;  %v3373_v28 = vpop.f32.mrf.mxu2  ;;  %v8112_v25 = vld [vmem:[%s11145_s8 + $0x184] sm:$0xf]  ;;  %v7122_v1 = vld [vmem:[%s11145_s8 + $0x68] sm:$0xf] }
 0x2a4   :  { %v10124_v34 = vadd.f32 %v3822_v35, %v9804_v43  ;;  %v3397_v63 = vpop.f32.mrf.mxu3  ;;  %v7167_v43 = vor.u32 %v8088_v5, %v7164_v23  ;;  %v7263_v38 = vor.u32 %v8112_v25, %v7260_v18  ;;  %v7218_v35 = vld [vmem:[%s11145_s8 + $0x128] sm:$0xf]  ;;  %v8102_v5 = vld [vmem:[%s11145_s8 + $0x130] sm:$0xf0] }
 0x2a5   :  { %v10135_v26 = vadd.f32 %v3397_v63, %v3373_v28  ;;  %3999 = vmatmul.bf16.gmra.mxu0 %v8725_v13  ;;  %v7254_v13 = vld [vmem:[%s11145_s8 + $0x170] sm:$0xf]  ;;  %v7123_v63 = vor.u32 %v8078_v15, %v7122_v1  ;;  %v7219_v18 = vor.u32 %v8102_v5, %v7218_v35  ;;  %v8126_v1 = vld [vmem:[%s11145_s8 + $0x1f0] sm:$0xf0]  ;;  %v7086_v35 = vld [vmem:[%s11145_s8 + $0x20] sm:$0xf] }
 0x2a6   :  { %4023 = vmatmul.bf16.gmra.mxu1 %v8764_v32  ;;  %4812 = vmatpush.bf16.msrb.mxu2 %v7167_v43  ;;  %v7255_v21 = vor.u32 %v8111_v62, %v7254_v13  ;;  %v7146_v32 = vld [vmem:[%s11145_s8 + $0x98] sm:$0xf] }
 0x2a7   :  { %4836 = vmatpush.bf16.msrb.mxu3 %v7263_v38  ;;  %v7147_v49 = vor.u32 %v8084_v10, %v7146_v32  ;;  %v7338_v38 = vld [vmem:[%s11145_s8 + $0x218] sm:$0xf]  ;;  %v8075_v32 = vld [vmem:[%s11145_s8 + $0x58] sm:$0xf0] }
 0x2a8   :  { %4722 = vmatmul.bf16.gmra.mxu2 %v8918_v59  ;;  %4746 = vmatmul.bf16.gmra.mxu3 %v8920_v52  ;;  %v7339_v62 = vor.u32 %v8132_v17, %v7338_v38  ;;  %v8066_v38 = vld [vmem:[%s11145_s8 + $0x10] sm:$0xf0]  ;;  %v7170_v17 = vld [vmem:[%s11145_s8 + $0xc8] sm:$0xf] }
 0x2a9   :  { %4877 = vmatpush.bf16.msra.mxu1 %v7255_v21  ;;  %4854 = vmatpush.bf16.msra.mxu0 %v7147_v49  ;;  %v7110_v21 = vld [vmem:[%s11145_s8 + $0x50] sm:$0xf]  ;;  %v8099_v49 = vld [vmem:[%s11145_s8 + $0x118] sm:$0xf0] }
 0x2aa   :  { %v3416_v16 = vpop.f32.mrf.mxu0  ;;  %4901 = vmatpush.bf16.msra.mxu2 %v7351_v48  ;;  %v7111_v45 = vor.u32 %v8075_v32, %v7110_v21 }
 0x2ab   :  { %v10169_v9 = vadd.f32 %v3416_v16, %v10085_v11  ;;  %v3824_v58 = vpop.f32.mrf.mxu1  ;;  %v3376_v57 = vpop.f32.mrf.mxu2  ;;  %v7438_v11 = vld [vmem:[%s11144_s7 + $0xa8] sm:$0xf]  ;;  %v7206_v16 = vld [vmem:[%s11145_s8 + $0x110] sm:$0xf] }
 0x2ac   :  { %v10172_v8 = vadd.f32 %v3824_v58, %v9832_v36  ;;  %v3400_v30 = vpop.f32.mrf.mxu3  ;;  %v8014_v36 = vld [vmem:[%s11144_s7 + $0xb0] sm:$0xf0]  ;;  %v7207_v19 = vor.u32 %v8099_v49, %v7206_v16  ;;  %v7098_v58 = vld [vmem:[%s11145_s8 + $0x38] sm:$0xf] }
 0x2ad   :  { %v10183_v44 = vadd.f32 %v3400_v30, %v3376_v57  ;;  %4878 = vmatpush.bf16.msra.mxu1 %v7243_v0  ;;  %v7439_v53 = vor.u32 %v8014_v36, %v7438_v11  ;;  %4855 = vmatpush.bf16.msra.mxu0 %v7135_v55  ;;  %v8072_v57 = vld [vmem:[%s11145_s8 + $0x40] sm:$0xf0]  ;;  %v7194_v0 = vld [vmem:[%s11145_s8 + $0xf8] sm:$0xf]  ;;  %v7326_v55 = vld [vmem:[%s11145_s8 + $0x200] sm:$0xf] }
 0x2ae   :  { %4902 = vmatpush.bf16.msra.mxu2 %v7339_v62  ;;  %v7099_v42 = vor.u32 %v8072_v57, %v7098_v58  ;;  %v7195_v33 = vor.u32 %v8096_v47, %v7194_v0  ;;  %v7327_v6 = vor.u32 %v8129_v46, %v7326_v55  ;;  %v7302_v58 = vld [vmem:[%s11145_s8 + $0x1d0] sm:$0xf]  ;;  %v7390_v0 = vld [vmem:[%s11144_s7 + $0x48] sm:$0xf] }
 0x2af   :  { %5309 = vmatpush.bf16.msra.mxu3 %v7439_v53 }
 0x2b1   :  { %4879 = vmatpush.bf16.msra.mxu1 %v7231_v14  ;;  %4856 = vmatpush.bf16.msra.mxu0 %v7123_v63  ;;  %v7314_v14 = vld [vmem:[%s11145_s8 + $0x1e8] sm:$0xf]  ;;  %v7182_v63 = vld [vmem:[%s11145_s8 + $0xe0] sm:$0xf] }
 0x2b2   :  { %v3419_v28 = vpop.f32.mrf.mxu0  ;;  %4903 = vmatpush.bf16.msra.mxu2 %v7327_v6  ;;  %v7315_v5 = vor.u32 %v8126_v1, %v7314_v14  ;;  %v8120_v14 = vld [vmem:[%s11145_s8 + $0x1c0] sm:$0xf0] }
 0x2b3   :  { %v10213_v23 = vadd.f32 %v3419_v28, %v10106_v54  ;;  %v3827_v25 = vpop.f32.mrf.mxu1  ;;  %v3378_v43 = vpop.f32.mrf.mxu2  ;;  %v7426_v54 = vld [vmem:[%s11144_s7 + $0x90] sm:$0xf]  ;;  %v8069_v28 = vld [vmem:[%s11145_s8 + $0x28] sm:$0xf0] }
 0x2b4   :  { %v10216_v41 = vadd.f32 %v3827_v25, %v9861_v40  ;;  %v3402_v56 = vpop.f32.mrf.mxu3  ;;  %v8011_v40 = vld [vmem:[%s11144_s7 + $0x98] sm:$0xf0]  ;;  %v7087_v25 = vor.u32 %v8069_v28, %v7086_v35  ;;  %v7278_v35 = vld [vmem:[%s11145_s8 + $0x1a0] sm:$0xf]  ;;  %v8117_v28 = vld [vmem:[%s11145_s8 + $0x1a8] sm:$0xf0] }
 0x2b5   :  { %v10227_v13 = vadd.f32 %v3402_v56, %v3378_v43  ;;  %4765 = vmatmul.bf16.vlgmr.msrb.gmra.mxu0 %v9064_v39  ;;  %v7427_v10 = vor.u32 %v8011_v40, %v7426_v54  ;;  %4880 = vmatpush.bf16.msra.mxu1 %v7219_v18  ;;  %v8093_v43 = vld [vmem:[%s11145_s8 + $0xe8] sm:$0xf0]  ;;  %v7074_v56 = vld [vmem:[%s11145_s8 + $0x8] sm:$0xf]  ;;  %v8090_v40 = vld [vmem:[%s11145_s8 + $0xd0] sm:$0xf0] }
 0x2b6   :  { %4789 = vmatmul.bf16.vlgmr.msrb.gmra.mxu1 %v8878_v22  ;;  %4857 = vmatpush.bf16.msra.mxu0 %v7111_v45  ;;  %v7183_v18 = vor.u32 %v8093_v43, %v7182_v63  ;;  %v7075_v62 = vor.u32 %v8066_v38, %v7074_v56  ;;  %v7171_v45 = vor.u32 %v8090_v40, %v7170_v17  ;;  %v7366_v63 = vld [vmem:[%s11144_s7 + $0x18] sm:$0xf]  ;;  %v7354_v40 = vld [vmem:[%s11144_s7] sm:$0xf] }
 0x2b7   :  { %5310 = vmatpush.bf16.msra.mxu3 %v7427_v10  ;;  %4904 = vmatpush.bf16.msra.mxu2 %v7315_v5  ;;  %v7279_v5 = vor.u32 %v8117_v28, %v7278_v35  ;;  %v8013_v28 = vld [vmem:[%s11144_s7 + $0xac] sm:$0xf] }
 0x2b8   :  { %4727 = vmatmul.bf16.gmra.mxu2 %v8994_v20  ;;  %4751 = vmatmul.bf16.gmra.mxu3 %v8996_v2 }
 0x2b9   :  { %4881 = vmatpush.bf16.msra.mxu1 %v7207_v19  ;;  %v7402_v19 = vld [vmem:[%s11144_s7 + $0x60] sm:$0xf] }
 0x2ba   :  { %v3421_v30 = vpop.f32.mrf.mxu0  ;;  %4858 = vmatpush.bf16.msra.mxu0 %v7099_v42 }
 0x2bb   :  { %v10261_v11 = vadd.f32 %v3421_v30, %v10135_v26  ;;  %v3829_v48 = vpop.f32.mrf.mxu1  ;;  %v10263_v36 = vpop.f32.mrf.mxu2  ;;  %v7414_v26 = vld [vmem:[%s11144_s7 + $0x78] sm:$0xf]  ;;  %v8002_v30 = vld [vmem:[%s11144_s7 + $0x50] sm:$0xf0] }
 0x2bc   :  { %v10266_v61 = vadd.f32 %v3829_v48, %v9879_v60  ;;  %v10268_v53 = vpop.f32.mrf.mxu3  ;;  %v8008_v60 = vld [vmem:[%s11144_s7 + $0x80] sm:$0xf0]  ;;  %v7391_v47 = vor.u32 %v8002_v30, %v7390_v0  ;;  %v7630_v0 = vld [vmem:[%s11144_s7 + $0x228] sm:$0xf]  ;;  %v8062_v30 = vld [vmem:[%s11144_s7 + $0x230] sm:$0xf0] }
 0x2bd   :  { %v7415_v15 = vor.u32 %v8008_v60, %v7414_v26  ;;  %4882 = vmatpush.bf16.msra.mxu1 %v7195_v33  ;;  %v7290_v60 = vld [vmem:[%s11145_s8 + $0x1b8] sm:$0xf] }
 0x2be   :  { %4859 = vmatpush.bf16.msra.mxu0 %v7087_v25  ;;  %v7291_v1 = vor.u32 %v8120_v14, %v7290_v60  ;;  %v7996_v25 = vld [vmem:[%s11144_s7 + $0x20] sm:$0xf0] }
 0x2bf   :  { %5311 = vmatpush.bf16.msra.mxu3 %v7415_v15 }
 0x2c1   :  { %4883 = vmatpush.bf16.msra.mxu1 %v7183_v18  ;;  %v7367_v18 = vor.u32 %v7996_v25, %v7366_v63  ;;  %v7440_v63 = vld [vmem:[%s11144_s7 + $0xb4] sm:$0xf0] }
 0x2c2   :  { %v3424_v54 = vpop.f32.mrf.mxu0  ;;  %4860 = vmatpush.bf16.msra.mxu0 %v7075_v62  ;;  %v8114_v62 = vld [vmem:[%s11145_s8 + $0x190] sm:$0xf0]  ;;  %v7443_v25 = vor.u32 %v8013_v28, %v7440_v63 }
 0x2c3   :  { %v10313_v21 = vadd.f32 %v3424_v54, %v10183_v44  ;;  %v3832_v32 = vpop.f32.mrf.mxu1  ;;  %v10315_v10 = vpop.f32.mrf.mxu2  ;;  %v8005_v44 = vld [vmem:[%s11144_s7 + $0x68] sm:$0xf0]  ;;  %v7266_v54 = vld [vmem:[%s11145_s8 + $0x188] sm:$0xf]  ;;  %v8010_v63 = vld [vmem:[%s11144_s7 + $0x94] sm:$0xf] }
 0x2c4   :  { %v10318_v16 = vadd.f32 %v3832_v32, %v9933_v51  ;;  %v10320_v49 = vpop.f32.mrf.mxu3  ;;  %v7403_v57 = vor.u32 %v8005_v44, %v7402_v19  ;;  %v8123_v51 = vld [vmem:[%s11145_s8 + $0x1d8] sm:$0xf0]  ;;  %v7993_v19 = vld [vmem:[%s11144_s7 + $0x8] sm:$0xf0]  ;;  %v7534_v44 = vld [vmem:[%s11144_s7 + $0x168] sm:$0xf] }
 0x2c5   :  { %4770 = vmatmul.bf16.gmra.mxu0 %v9158_v4  ;;  %v7303_v42 = vor.u32 %v8123_v51, %v7302_v58  ;;  %4884 = vmatpush.bf16.msra.mxu1 %v7171_v45  ;;  %v11191_v32 = vld [vmem:[#allocation16_spill] sm:$0xff]  ;;  %v7267_v45 = vor.u32 %v8114_v62, %v7266_v54  ;;  %v8038_v58 = vld [vmem:[%s11144_s7 + $0x170] sm:$0xf0]  ;;  %v8032_v62 = vld [vmem:[%s11144_s7 + $0x140] sm:$0xf0]  ;;  %s11192_s8 = sld [smem:[#allocation23_spill]] }
 0x2c6   :  { %4794 = vmatmul.bf16.gmra.mxu1 %v8918_v59  ;;  %5312 = vmatpush.bf16.msra.mxu3 %v7403_v57  ;;  %v7355_v57 = vor.u32 %v7993_v19, %v7354_v40  ;;  %v7535_v51 = vor.u32 %v8038_v58, %v7534_v44  ;;  %v7510_v54 = vld [vmem:[%s11144_s7 + $0x138] sm:$0xf]  ;;  %v8056_v44 = vld [vmem:[%s11144_s7 + $0x200] sm:$0xf0]  ;;  %v3847_v58 = vadd.f32 %v10263_v36, %v10124_v34  ;;  %v7594_v34 = vld [vmem:[%s11144_s7 + $0x1e0] sm:$0xf] }
 0x2c7   :  { %4905 = vmatpush.bf16.msra.mxu2 %v7303_v42  ;;  %v7631_v42 = vor.u32 %v8062_v30, %v7630_v0  ;;  %v7606_v19 = vld [vmem:[%s11144_s7 + $0x1f8] sm:$0xf]  ;;  %v7498_v0 = vld [vmem:[%s11144_s7 + $0x120] sm:$0xf]  ;;  %v8029_v30 = vld [vmem:[%s11144_s7 + $0x128] sm:$0xf0] }
 0x2c8   :  { %4813 = vmatmul.bf16.vlgmr.msrb.gmra.mxu2 %v8880_v31  ;;  %4837 = vmatmul.bf16.vlgmr.msrb.gmra.mxu3 %v9064_v39 }
 0x2c9   :  { %5333 = vmatpush.bf16.msrb.mxu0 %v7535_v51  ;;  %5357 = vmatpush.bf16.msrb.mxu1 %v7631_v42  ;;  %v7607_v51 = vor.u32 %v8056_v44, %v7606_v19  ;;  %v7499_v42 = vor.u32 %v8029_v30, %v7498_v0  ;;  %v7474_v0 = vld [vmem:[%s11144_s7 + $0xf0] sm:$0xf]  ;;  %v8023_v30 = vld [vmem:[%s11144_s7 + $0xf8] sm:$0xf0] }
 0x2ca   :  { %v3426_v48 = vpop.f32.mrf.mxu0  ;;  %5313 = vmatpush.bf16.msra.mxu3 %v7391_v47  ;;  %v7522_v47 = vld [vmem:[%s11144_s7 + $0x150] sm:$0xf] }
 0x2cb   :  { %v10345_v33 = vadd.f32 %v3426_v48, %v10227_v13  ;;  %v3834_v55 = vpop.f32.mrf.mxu1  ;;  %v10347_v46 = vpop.f32.mrf.mxu2  ;;  %v7378_v13 = vld [vmem:[%s11144_s7 + $0x30] sm:$0xf]  ;;  %4906 = vmatpush.bf16.msra.mxu2 %v7291_v1  ;;  %v8035_v48 = vld [vmem:[%s11144_s7 + $0x158] sm:$0xf0] }
 0x2cc   :  { %v10350_v26 = vadd.f32 %v3834_v55, %v9983_v29  ;;  %v10352_v6 = vpop.f32.mrf.mxu3  ;;  %v7999_v29 = vld [vmem:[%s11144_s7 + $0x38] sm:$0xf0]  ;;  %v7618_v55 = vld [vmem:[%s11144_s7 + $0x210] sm:$0xf]  ;;  %v7523_v14 = vor.u32 %v8035_v48, %v7522_v47  ;;  %v8053_v47 = vld [vmem:[%s11144_s7 + $0x1e8] sm:$0xf0] }
 0x2cd   :  { %v7379_v15 = vor.u32 %v7999_v29, %v7378_v13  ;;  %v8059_v13 = vld [vmem:[%s11144_s7 + $0x218] sm:$0xf0] }
 0x2ce   :  { %5334 = vmatpush.bf16.msrb.mxu0 %v7523_v14  ;;  %v7595_v14 = vor.u32 %v8053_v47, %v7594_v34  ;;  %v7570_v34 = vld [vmem:[%s11144_s7 + $0x1b0] sm:$0xf] }
 0x2cf   :  { %5314 = vmatpush.bf16.msra.mxu3 %v7379_v15  ;;  %4907 = vmatpush.bf16.msra.mxu2 %v7279_v5  ;;  %v7619_v15 = vor.u32 %v8059_v13, %v7618_v55  ;;  %v8037_v5 = vld [vmem:[%s11144_s7 + $0x16c] sm:$0xf]  ;;  %v3871_v13 = vadd.f32 %v10268_v53, %v3847_v58 }
 0x2d1   :  { %5358 = vmatpush.bf16.msrb.mxu1 %v7619_v15 }
 0x2d2   :  { %v10378_v43 = vpop.f32.mrf.mxu0 }
 0x2d3   :  { %v10380_v56 = vpop.f32.mrf.mxu1  ;;  %v10382_v38 = vpop.f32.mrf.mxu2  ;;  %5315 = vmatpush.bf16.msra.mxu3 %v7367_v18  ;;  %4908 = vmatpush.bf16.msra.mxu2 %v7267_v45  ;;  %v7536_v18 = vld [vmem:[%s11144_s7 + $0x174] sm:$0xf0]  ;;  %v7511_v45 = vor.u32 %v8032_v62, %v7510_v54  ;;  %v3895_v53 = vadd.f32 %v10378_v43, %v9892_v50  ;;  %v7524_v54 = vld [vmem:[%s11144_s7 + $0x15c] sm:$0xf0]  ;;  %v7486_v62 = vld [vmem:[%s11144_s7 + $0x108] sm:$0xf] }
 0x2d4   :  { %v10384_v17 = vpop.f32.mrf.mxu3  ;;  %v7539_v40 = vor.u32 %v8037_v5, %v7536_v18  ;;  %v7428_v5 = vld [vmem:[%s11144_s7 + $0x9c] sm:$0xf0]  ;;  %v7582_v50 = vld [vmem:[%s11144_s7 + $0x1c8] sm:$0xf]  ;;  %v8050_v43 = vld [vmem:[%s11144_s7 + $0x1d0] sm:$0xf0] }
 0x2d5   :  { %4775 = vmatmul.bf16.gmra.mxu0 %v11191_v32  ;;  %5359 = vmatpush.bf16.msrb.mxu1 %v7607_v51  ;;  %v7431_v18 = vor.u32 %v8010_v63, %v7428_v5  ;;  %v7583_v58 = vor.u32 %v8050_v43, %v7582_v50  ;;  %v3849_v51 = vadd.f32 %v10315_v10, %v10172_v8  ;;  %v7416_v43 = vld [vmem:[%s11144_s7 + $0x84] sm:$0xf0] }
 0x2d6   :  { %4799 = vmatmul.bf16.gmra.mxu1 %v8994_v20  ;;  %5335 = vmatpush.bf16.msrb.mxu0 %v7511_v45  ;;  %v8026_v45 = vld [vmem:[%s11144_s7 + $0x110] sm:$0xf0]  ;;  %v7475_v10 = vor.u32 %v8023_v30, %v7474_v0 }
 0x2d7   :  { %5316 = vmatpush.bf16.msra.mxu3 %v7355_v57  ;;  %v10463_v57 = vld [vmem:[%s11192_s8] sm:$0x7]  ;;  %5381 = vmatpush.bf16.msrb.mxu2 %v7443_v25  ;;  %v8034_v25 = vld [vmem:[%s11144_s7 + $0x154] sm:$0xf]  ;;  %v7487_v44 = vor.u32 %v8026_v45, %v7486_v62  ;;  %v8020_v62 = vld [vmem:[%s11144_s7 + $0xe0] sm:$0xf0] }
 0x2d8   :  { %4818 = vmatmul.bf16.gmra.mxu2 %v8920_v52  ;;  %4842 = vmatmul.bf16.gmra.mxu3 %v9158_v4  ;;  %v10485_v15 = vperm.slane %v10463_v57, 0  ;;  %v10535_v8 = vperm.slane %v10463_v57, 1 }
 0x2d9   :  { %5360 = vmatpush.bf16.msrb.mxu1 %v7595_v14  ;;  %v8047_v14 = vld [vmem:[%s11144_s7 + $0x1b8] sm:$0xf0] }
 0x2da   :  { %v10423_v60 = vpop.f32.mrf.mxu0  ;;  %5336 = vmatpush.bf16.msrb.mxu0 %v7499_v42  ;;  %v4037_v19 = vadd.f32 %v10485_v15, %v3871_v13  ;;  %v3919_v42 = vadd.f32 %v10380_v56, %v3895_v53  ;;  %v7571_v5 = vor.u32 %v8047_v14, %v7570_v34  ;;  %v3873_v53 = vadd.f32 %v10320_v49, %v3849_v51  ;;  %v8007_v49 = vld [vmem:[%s11144_s7 + $0x7c] sm:$0xf] }
 0x2db   :  { %v10428_v1 = vpop.f32.mrf.mxu1  ;;  %v10430_v29 = vpop.f32.mrf.mxu2  ;;  %5405 = vmatpush.bf16.msrb.mxu3 %v7539_v40  ;;  %v7527_v40 = vor.u32 %v8034_v25, %v7524_v54  ;;  %5382 = vmatpush.bf16.msrb.mxu2 %v7431_v18  ;;  %v7462_v54 = vld [vmem:[%s11144_s7 + $0xd8] sm:$0xf]  ;;  %v3897_v45 = vadd.f32 %v10423_v60, %v9937_v7  ;;  %v7419_v51 = vor.u32 %v8007_v49, %v7416_v43  ;;  %v7512_v7 = vld [vmem:[%s11144_s7 + $0x144] sm:$0xf0]  ;;  %v8044_v60 = vld [vmem:[%s11144_s7 + $0x1a0] sm:$0xf0] }
 0x2dc   :  { %v10432_v35 = vpop.f32.mrf.mxu3  ;;  %vm4055_vm0 = vcmp.ge.f32.partialorder %v4037_v19, 0.0  ;;  %v4073_v25 = vmul.f32 0.01, %v4037_v19  ;;  %v4040_v14 = vadd.f32 %v10485_v15, %v3873_v53 }
 0x2dd   :  { %5361 = vmatpush.bf16.msrb.mxu1 %v7583_v58  ;;  %v7463_v58 = vor.u32 %v8020_v62, %v7462_v54 }
 0x2de   :  { %5337 = vmatpush.bf16.msrb.mxu0 %v7487_v44  ;;  %v8031_v44 = vld [vmem:[%s11144_s7 + $0x13c] sm:$0xf]  ;;  %vm4058_vm2 = vcmp.ge.f32.partialorder %v4040_v14, 0.0 }
 0x2df   :  { %5406 = vmatpush.bf16.msrb.mxu3 %v7527_v40  ;;  %v7558_v40 = vld [vmem:[%s11144_s7 + $0x198] sm:$0xf]  ;;  %v7515_v30 = vor.u32 %v8031_v44, %v7512_v7  ;;  %5383 = vmatpush.bf16.msrb.mxu2 %v7419_v51  ;;  %v7500_v7 = vld [vmem:[%s11144_s7 + $0x12c] sm:$0xf0] }
 0x2e0   :  { %v7559_v34 = vor.u32 %v8044_v60, %v7558_v40  ;;  %v4076_v60 = vmul.f32 0.01, %v4040_v14 }
 0x2e1   :  { %5362 = vmatpush.bf16.msrb.mxu1 %v7571_v5  ;;  %v8017_v5 = vld [vmem:[%s11144_s7 + $0xc8] sm:$0xf0] }
 0x2e2   :  { %v10474_v36 = vpop.f32.mrf.mxu0  ;;  %5338 = vmatpush.bf16.msrb.mxu0 %v7475_v10  ;;  %v3852_v10 = vadd.f32 %v10347_v46, %v10216_v41  ;;  %v8041_v46 = vld [vmem:[%s11144_s7 + $0x188] sm:$0xf0] }
 0x2e3   :  { %v10479_v48 = vpop.f32.mrf.mxu1  ;;  %v10481_v55 = vpop.f32.mrf.mxu2  ;;  %5407 = vmatpush.bf16.msrb.mxu3 %v7515_v30 }
 0x2e4   :  { %v10487_v28 = vpop.f32.mrf.mxu3 }
 0x2e5   :  { %4861 = vmatmul.bf16.vlgmr.msra.gmra.mxu0 %v8878_v22  ;;  %5363 = vmatpush.bf16.msrb.mxu1 %v7559_v34  ;;  %v8001_v34 = vld [vmem:[%s11144_s7 + $0x4c] sm:$0xf] }
 0x2e6   :  { %4885 = vmatmul.bf16.vlgmr.msra.gmra.mxu1 %v8880_v31  ;;  %5339 = vmatpush.bf16.msrb.mxu0 %v7463_v58  ;;  %v3876_v58 = vadd.f32 %v10352_v6, %v3852_v10  ;;  %v3854_v10 = vadd.f32 %v10382_v38, %v10266_v61  ;;  %v7488_v61 = vld [vmem:[%s11144_s7 + $0x114] sm:$0xf0]  ;;  %v4094_v38 = vsel %vm4058_vm2, %v4040_v14, %v4076_v60  ;;  %v7380_v14 = vld [vmem:[%s11144_s7 + $0x3c] sm:$0xf0] }
 0x2e8   :  { %4823 = vmatmul.bf16.gmra.mxu2 %v8996_v2  ;;  %4847 = vmatmul.bf16.gmra.mxu3 %v11191_v32 }
 0x2ea   :  { %v10532_v47 = vpop.f32.mrf.mxu0 }
 0x2eb   :  { %v10540_v13 = vpop.f32.mrf.mxu1  ;;  %v3942_v63 = vpop.f32.mrf.mxu2 }
 0x2ec   :  { %v3943_v18 = vadd.f32 %v3942_v63, %v3919_v42  ;;  %v10542_v56 = vpop.f32.mrf.mxu3  ;;  %v4091_v42 = vsel %vm4055_vm0, %v4037_v19, %v4073_v25  ;;  %v7450_v63 = vld [vmem:[%s11144_s7 + $0xc0] sm:$0xf]  ;;  %v3921_v19 = vadd.f32 %v10428_v1, %v3897_v45  ;;  %v8004_v1 = vld [vmem:[%s11144_s7 + $0x64] sm:$0xf]  ;;  %v7404_v45 = vld [vmem:[%s11144_s7 + $0x6c] sm:$0xf0] }
 0x2ed   :  { %v7451_v41 = vor.u32 %v8017_v5, %v7450_v63  ;;  %v7407_v51 = vor.u32 %v8004_v1, %v7404_v45  ;;  %v11194_v63 = vld [vmem:[#allocation13_spill] sm:$0xff]  ;;  %v8025_v5 = vld [vmem:[%s11144_s7 + $0x10c] sm:$0xf]  ;;  %v3857_v1 = vadd.f32 %v10430_v29, %v10318_v16 }
 0x2ee   :  { %v4038_v50 = vadd.f32 %v10535_v8, %v3943_v18  ;;  %v7546_v18 = vld [vmem:[%s11144_s7 + $0x180] sm:$0xf] }
 0x2ef   :  { %v7547_v49 = vor.u32 %v8041_v46, %v7546_v18  ;;  %5340 = vmatpush.bf16.msrb.mxu0 %v7451_v41  ;;  %5384 = vmatpush.bf16.msrb.mxu2 %v7407_v51  ;;  %v4043_v18 = vadd.f32 %v10485_v15, %v3876_v58  ;;  %v7491_v46 = vor.u32 %v8025_v5, %v7488_v61  ;;  %v7476_v29 = vld [vmem:[%s11144_s7 + $0xfc] sm:$0xf0] }
 0x2f0   :  { %vm4056_vm1 = vcmp.ge.f32.partialorder %v4038_v50, 0.0  ;;  %v4074_v0 = vmul.f32 0.01, %v4038_v50  ;;  %v3902_v51 = vadd.f32 %v10532_v47, %v10036_v37  ;;  %v7368_v37 = vld [vmem:[%s11144_s7 + $0x24] sm:$0xf0] }
 0x2f1   :  { %5364 = vmatpush.bf16.msrb.mxu1 %v7547_v49  ;;  %v4079_v58 = vmul.f32 0.01, %v4043_v18  ;;  %vm4061_vm4 = vcmp.ge.f32.partialorder %v4043_v18, 0.0  ;;  %v8019_v47 = vld [vmem:[%s11144_s7 + $0xdc] sm:$0xf] }
 0x2f2   :  { %v4092_v25 = vsel %vm4056_vm1, %v4038_v50, %v4074_v0  ;;  %v10586_v53 = vpop.f32.mrf.mxu0  ;;  %v8028_v50 = vld [vmem:[%s11144_s7 + $0x124] sm:$0xf]  ;;  %v3900_v0 = vadd.f32 %v10474_v36, %v9987_v27 }
 0x2f3   :  { %v4109_v54 = vpack.c.bf16 %v4092_v25, %v4091_v42  ;;  %v10591_v62 = vpop.f32.mrf.mxu1  ;;  %v3944_v40 = vpop.f32.mrf.mxu2  ;;  %v7503_v6 = vor.u32 %v8028_v50, %v7500_v7  ;;  %v7392_v42 = vld [vmem:[%s11144_s7 + $0x54] sm:$0xf0] }
 0x2f4   :  { %v3945_v43 = vadd.f32 %v3944_v40, %v3921_v19  ;;  %v10593_v44 = vpop.f32.mrf.mxu3  ;;  %v7395_v27 = vor.u32 %v8001_v34, %v7392_v42  ;;  %v3924_v19 = vadd.f32 %v10479_v48, %v3900_v0  ;;  %v7998_v48 = vld [vmem:[%s11144_s7 + $0x34] sm:$0xf]  ;;  %v7995_v34 = vld [vmem:[%s11144_s7 + $0x1c] sm:$0xf]  ;;  %v4097_v42 = vsel %vm4061_vm4, %v4043_v18, %v4079_v58 }
 0x2f5   :  { %4121 = vst [vmem:[%s11193_s11] sm:$0xff] %v4109_v54  ;;  %4866 = vmatmul.bf16.gmra.mxu0 %v8918_v59  ;;  %5408 = vmatpush.bf16.msrb.mxu3 %v7503_v6  ;;  %v3878_v54 = vadd.f32 %v10384_v17, %v3854_v10  ;;  %v8022_v17 = vld [vmem:[%s11144_s7 + $0xf4] sm:$0xf]  ;;  %v7383_v16 = vor.u32 %v7998_v48, %v7380_v14  ;;  %v7452_v14 = vld [vmem:[%s11144_s7 + $0xcc] sm:$0xf0] }
 0x2f6   :  { %v4041_v30 = vadd.f32 %v10535_v8, %v3945_v43  ;;  %4890 = vmatmul.bf16.gmra.mxu1 %v8920_v52  ;;  %5385 = vmatpush.bf16.msrb.mxu2 %v7395_v27  ;;  %v7479_v60 = vor.u32 %v8022_v17, %v7476_v29  ;;  %v3967_v10 = vadd.f32 %v10542_v56, %v10121_v24  ;;  %v8061_v17 = vld [vmem:[%s11144_s7 + $0x22c] sm:$0xf] }
 0x2f7   :  { %v4046_v0 = vadd.f32 %v10485_v15, %v3878_v54  ;;  %v3926_v27 = vadd.f32 %v10540_v13, %v3902_v51  ;;  %v7371_v18 = vor.u32 %v7995_v34, %v7368_v37  ;;  %v7992_v13 = vld [vmem:[%s11144_s7 + $0x4] sm:$0xf]  ;;  %v3905_v58 = vadd.f32 %v10586_v53, %v10083_v3  ;;  %v7446_v51 = vld [vmem:[%s11144_s7 + $0xb0] sm:$0xf] }
 0x2f8   :  { %vm4059_vm3 = vcmp.ge.f32.partialorder %v4041_v30, 0.0  ;;  %v4077_v36 = vmul.f32 0.01, %v4041_v30  ;;  %4909 = vmatmul.bf16.vlgmr.msra.gmra.mxu2 %v9064_v39  ;;  %5317 = vmatmul.bf16.vlgmr.msra.gmra.mxu3 %v11194_v63  ;;  %v3969_v34 = vadd.f32 %v10593_v44, %v10169_v9  ;;  %v7620_v9 = vld [vmem:[%s11144_s7 + $0x21c] sm:$0xf0] }
 0x2f9   :  { %5409 = vmatpush.bf16.msrb.mxu3 %v7491_v46  ;;  %v4082_v24 = vmul.f32 0.01, %v4046_v0  ;;  %vm4064_vm6 = vcmp.ge.f32.partialorder %v4046_v0, 0.0  ;;  %v7434_v44 = vld [vmem:[%s11144_s7 + $0x98] sm:$0xf] }
 0x2fa   :  { %v4095_v25 = vsel %vm4059_vm3, %v4041_v30, %v4077_v36  ;;  %v10634_v41 = vpop.f32.mrf.mxu0  ;;  %5386 = vmatpush.bf16.msrb.mxu2 %v7383_v16  ;;  %v3881_v30 = vadd.f32 %v10432_v35, %v3857_v1  ;;  %v7464_v35 = vld [vmem:[%s11144_s7 + $0xe4] sm:$0xf0]  ;;  %v7356_v1 = vld [vmem:[%s11144_s7 + $0xc] sm:$0xf0] }
 0x2fb   :  { %v4111_v40 = vpack.c.bf16 %v4095_v25, %v4094_v38  ;;  %v10637_v49 = vpop.f32.mrf.mxu1  ;;  %v3947_v43 = vpop.f32.mrf.mxu2  ;;  %v7467_v61 = vor.u32 %v8019_v47, %v7464_v35  ;;  %v10679_v25 = vperm.slane %v10463_v57, 2  ;;  %v8016_v57 = vld [vmem:[%s11144_s7 + $0xc4] sm:$0xf]  ;;  %v7359_v48 = vor.u32 %v7992_v13, %v7356_v1  ;;  %v7608_v13 = vld [vmem:[%s11144_s7 + $0x204] sm:$0xf0] }
 0x2fc   :  { %v3948_v45 = vadd.f32 %v3947_v43, %v3924_v19  ;;  %v10641_v50 = vpop.f32.mrf.mxu3  ;;  %v10682_v54 = vadd.f32 %v10485_v15, %v3881_v30  ;;  %v7455_v29 = vor.u32 %v8016_v57, %v7452_v14  ;;  %v3859_v30 = vadd.f32 %v10481_v55, %v10350_v26  ;;  %v8012_v35 = vld [vmem:[%s11144_s7 + $0xa0] sm:$0xf0]  ;;  %v7542_v57 = vld [vmem:[%s11144_s7 + $0x170] sm:$0xf]  ;;  %v7422_v14 = vld [vmem:[%s11144_s7 + $0x80] sm:$0xf] }
 0x2fd   :  { %4123 = vst [vmem:[%s11193_s11 + $0xc] sm:$0xff] %v4111_v40  ;;  %5410 = vmatpush.bf16.msrb.mxu3 %v7479_v60  ;;  %v4100_v37 = vsel %vm4064_vm6, %v4046_v0, %v4082_v24  ;;  %v3929_v26 = vadd.f32 %v10591_v62, %v3905_v58 }
 0x2fe   :  { %v4044_v7 = vadd.f32 %v10535_v8, %v3948_v45  ;;  %5387 = vmatpush.bf16.msrb.mxu2 %v7371_v18  ;;  %vm4067_vm9 = vcmp.ge.f32.partialorder %v10682_v54, 0.0 }
 0x300   :  { %vm4062_vm5 = vcmp.ge.f32.partialorder %v4044_v7, 0.0  ;;  %v4080_v6 = vmul.f32 0.01, %v4044_v7 }
 0x301   :  { %5411 = vmatpush.bf16.msrb.mxu3 %v7467_v61  ;;  %v3883_v61 = vadd.f32 %v10487_v28, %v3859_v30  ;;  %v3907_v28 = vadd.f32 %v10634_v41, %v10104_v12 }
 0x302   :  { %v4098_v36 = vsel %vm4062_vm5, %v4044_v7, %v4080_v6  ;;  %v3990_v5 = vpop.f32.mrf.mxu0  ;;  %v8015_v7 = vld [vmem:[%s11144_s7 + $0xb8] sm:$0xf0]  ;;  %5388 = vmatpush.bf16.msrb.mxu2 %v7359_v48 }
 0x303   :  { %v4113_v56 = vpack.c.bf16 %v4098_v36, %v4097_v42  ;;  %v3991_v38 = vadd.f32 %v3990_v5, %v3967_v10  ;;  %v4014_v19 = vpop.f32.mrf.mxu1  ;;  %v3949_v46 = vpop.f32.mrf.mxu2  ;;  %v7447_v60 = vor.u32 %v8015_v7, %v7446_v51  ;;  %v8058_v10 = vld [vmem:[%s11144_s7 + $0x214] sm:$0xf]  ;;  %v4052_v58 = vadd.f32 %v10485_v15, %v3883_v61  ;;  %v8052_v7 = vld [vmem:[%s11144_s7 + $0x1e4] sm:$0xf]  ;;  %v7596_v15 = vld [vmem:[%s11144_s7 + $0x1ec] sm:$0xf0] }
 0x304   :  { %v3950_v40 = vadd.f32 %v3949_v46, %v3926_v27  ;;  %v10684_v43 = vpop.f32.mrf.mxu3  ;;  %v7623_v18 = vor.u32 %v8058_v10, %v7620_v9 }
 0x305   :  { %4125 = vst [vmem:[%s11193_s11 + $0x18] sm:$0xff] %v4113_v56  ;;  %v4015_v45 = vadd.f32 %v4014_v19, %v3991_v38  ;;  %4871 = vmatmul.bf16.gmra.mxu0 %v8994_v20  ;;  %v7632_v20 = vld [vmem:[%s11144_s7 + $0x234] sm:$0xf0]  ;;  %5412 = vmatpush.bf16.msrb.mxu3 %v7455_v29  ;;  %v7435_v19 = vor.u32 %v8012_v35, %v7434_v44  ;;  %v4088_v10 = vmul.f32 0.01, %v4052_v58  ;;  %vm4070_vm12 = vcmp.ge.f32.partialorder %v4052_v58, 0.0 }
 0x306   :  { %v4047_v16 = vadd.f32 %v10535_v8, %v3950_v40  ;;  %4895 = vmatmul.bf16.gmra.mxu1 %v8996_v2  ;;  %v7635_v53 = vor.u32 %v8061_v17, %v7632_v20  ;;  %v4085_v2 = vmul.f32 0.01, %v10682_v54  ;;  %v8055_v40 = vld [vmem:[%s11144_s7 + $0x1fc] sm:$0xf]  ;;  %v8009_v17 = vld [vmem:[%s11144_s7 + $0x88] sm:$0xf0]  ;;  %v3972_v20 = vadd.f32 %v10641_v50, %v10213_v23 }
 0x307   :  { %v4039_v3 = vadd.f32 %v10679_v25, %v4015_v45  ;;  %5453 = vmatpush.bf16.msra.mxu1 %v7447_v60  ;;  %v8039_v45 = vld [vmem:[%s11144_s7 + $0x178] sm:$0xf0]  ;;  %v7611_v48 = vor.u32 %v8055_v40, %v7608_v13  ;;  %v7423_v29 = vor.u32 %v8009_v17, %v7422_v14  ;;  %v7410_v23 = vld [vmem:[%s11144_s7 + $0x68] sm:$0xf]  ;;  %v8006_v50 = vld [vmem:[%s11144_s7 + $0x70] sm:$0xf0] }
 0x308   :  { %vm4065_vm7 = vcmp.ge.f32.partialorder %v4047_v16, 0.0  ;;  %v4083_v6 = vmul.f32 0.01, %v4047_v16  ;;  %4914 = vmatmul.bf16.gmra.mxu2 %v9158_v4  ;;  %5322 = vmatmul.bf16.gmra.mxu3 %v8878_v22  ;;  %v7543_v41 = vor.u32 %v8039_v45, %v7542_v57  ;;  %v11195_v44 = vld [vmem:[#allocation14_spill] sm:$0xff]  ;;  %v8060_v13 = vld [vmem:[%s11144_s7 + $0x220] sm:$0xf0] }
 0x309   :  { %vm4057_vm8 = vcmp.ge.f32.partialorder %v4039_v3, 0.0  ;;  %v4075_v42 = vmul.f32 0.01, %v4039_v3  ;;  %5429 = vmatpush.bf16.msra.mxu0 %v7635_v53  ;;  %v3931_v53 = vadd.f32 %v10637_v49, %v3907_v28  ;;  %v8049_v35 = vld [vmem:[%s11144_s7 + $0x1cc] sm:$0xf]  ;;  %v3974_v28 = vadd.f32 %v10684_v43, %v10261_v11 }
 0x30a   :  { %v4101_v55 = vsel %vm4065_vm7, %v4047_v16, %v4083_v6  ;;  %v3992_v47 = vpop.f32.mrf.mxu0  ;;  %5477 = vmatpush.bf16.msra.mxu2 %v7543_v41  ;;  %v7518_v45 = vld [vmem:[%s11144_s7 + $0x140] sm:$0xf]  ;;  %v8033_v41 = vld [vmem:[%s11144_s7 + $0x148] sm:$0xf0]  ;;  %v7398_v11 = vld [vmem:[%s11144_s7 + $0x50] sm:$0xf] }
 0x30b   :  { %v4093_v27 = vsel %vm4057_vm8, %v4039_v3, %v4075_v42  ;;  %v4115_v0 = vpack.c.bf16 %v4101_v55, %v4100_v37  ;;  %v3993_v36 = vadd.f32 %v3992_v47, %v3969_v34  ;;  %v4016_v62 = vpop.f32.mrf.mxu1  ;;  %v3952_v5 = vpop.f32.mrf.mxu2  ;;  %5454 = vmatpush.bf16.msra.mxu1 %v7435_v19  ;;  %v4103_v3 = vsel %vm4067_vm9, %v10682_v54, %v4085_v2  ;;  %v7626_v19 = vld [vmem:[%s11144_s7 + $0x218] sm:$0xf]  ;;  %v8003_v43 = vld [vmem:[%s11144_s7 + $0x58] sm:$0xf0] }
 0x30c   :  { %v4110_v24 = vpack.c.bf16 %v4093_v27, %v4093_v27  ;;  %v3953_v56 = vadd.f32 %v3952_v5, %v3929_v26  ;;  %v10741_v38 = vpop.f32.mrf.mxu3  ;;  %v7599_v42 = vor.u32 %v8052_v7, %v7596_v15  ;;  %v7411_v47 = vor.u32 %v8006_v50, %v7410_v23  ;;  %v7584_v27 = vld [vmem:[%s11144_s7 + $0x1d4] sm:$0xf0]  ;;  %v8063_v5 = vld [vmem:[%s11144_s7 + $0x238] sm:$0xf0]  ;;  %v8057_v7 = vld [vmem:[%s11144_s7 + $0x208] sm:$0xf0] }
 0x30d   :  { %4127 = vst [vmem:[%s11193_s11 + $0x24] sm:$0xff] %v4115_v0  ;;  %v4017_v46 = vadd.f32 %v4016_v62, %v3993_v36  ;;  %5430 = vmatpush.bf16.msra.mxu0 %v7623_v18  ;;  %v11196_v36 = vld [vmem:[#allocation15_spill] sm:$0xff]  ;;  %v7587_v18 = vor.u32 %v8049_v35, %v7584_v27  ;;  %v7627_v57 = vor.u32 %v8060_v13, %v7626_v19  ;;  %v7572_v23 = vld [vmem:[%s11144_s7 + $0x1bc] sm:$0xf0]  ;;  %v7386_v50 = vld [vmem:[%s11144_s7 + $0x38] sm:$0xf] }
 0x30e   :  { %4122 = vst [vmem:[%s11193_s11 + $0x8] sm:$0xf] %v4110_v24  ;;  %v4050_v1 = vadd.f32 %v10535_v8, %v3953_v56  ;;  %v7638_v62 = vld [vmem:[%s11144_s7 + $0x230] sm:$0xf]  ;;  %v7530_v56 = vld [vmem:[%s11144_s7 + $0x158] sm:$0xf] }
 0x30f   :  { %v4042_v12 = vadd.f32 %v10679_v25, %v4017_v46  ;;  %5455 = vmatpush.bf16.msra.mxu1 %v7423_v29  ;;  %v7639_v24 = vor.u32 %v8063_v5, %v7638_v62  ;;  %v8043_v35 = vld [vmem:[%s11144_s7 + $0x19c] sm:$0xf]  ;;  %v7560_v27 = vld [vmem:[%s11144_s7 + $0x1a4] sm:$0xf0]  ;;  %v7997_v5 = vld [vmem:[%s11144_s7 + $0x28] sm:$0xf0] }
 0x310   :  { %vm4068_vm10 = vcmp.ge.f32.partialorder %v4050_v1, 0.0  ;;  %v4086_v16 = vmul.f32 0.01, %v4050_v1  ;;  %v7563_v62 = vor.u32 %v8043_v35, %v7560_v27  ;;  %v8040_v19 = vld [vmem:[%s11144_s7 + $0x184] sm:$0xf] }
 0x311   :  { %vm4060_vm11 = vcmp.ge.f32.partialorder %v4042_v12, 0.0  ;;  %v4078_v51 = vmul.f32 0.01, %v4042_v12  ;;  %5431 = vmatpush.bf16.msra.mxu0 %v7611_v48  ;;  %5501 = vmatpush.bf16.msra.mxu3 %v7639_v24  ;;  %v3977_v24 = vadd.f32 %v10741_v38, %v10313_v21  ;;  %v7548_v13 = vld [vmem:[%s11144_s7 + $0x18c] sm:$0xf0] }
 0x312   :  { %v4104_v60 = vsel %vm4068_vm10, %v4050_v1, %v4086_v16  ;;  %v3995_v30 = vpop.f32.mrf.mxu0  ;;  %v8045_v35 = vld [vmem:[%s11144_s7 + $0x1a8] sm:$0xf0] }
 0x313   :  { %v4096_v6 = vsel %vm4060_vm11, %v4042_v12, %v4078_v51  ;;  %v4117_v54 = vpack.c.bf16 %v4104_v60, %v4103_v3  ;;  %v3996_v2 = vadd.f32 %v3995_v30, %v3972_v20  ;;  %v4019_v49 = vpop.f32.mrf.mxu1  ;;  %v3954_v34 = vpop.f32.mrf.mxu2  ;;  %5456 = vmatpush.bf16.msra.mxu1 %v7411_v47  ;;  %v7519_v20 = vor.u32 %v8033_v41, %v7518_v45  ;;  %v7614_v51 = vld [vmem:[%s11144_s7 + $0x200] sm:$0xf]  ;;  %v8046_v3 = vld [vmem:[%s11144_s7 + $0x1b4] sm:$0xf] }
 0x314   :  { %v4112_v37 = vpack.c.bf16 %v4096_v6, %v4096_v6  ;;  %v3955_v26 = vadd.f32 %v3954_v34, %v3931_v53  ;;  %v10789_v55 = vpop.f32.mrf.mxu3  ;;  %v7399_v30 = vor.u32 %v8003_v43, %v7398_v11  ;;  %v7615_v15 = vor.u32 %v8057_v7, %v7614_v51  ;;  %v8000_v6 = vld [vmem:[%s11144_s7 + $0x40] sm:$0xf0]  ;;  %v7506_v34 = vld [vmem:[%s11144_s7 + $0x128] sm:$0xf]  ;;  %v8054_v47 = vld [vmem:[%s11144_s7 + $0x1f0] sm:$0xf0] }
 0x315   :  { %4129 = vst [vmem:[%s11193_s11 + $0x30] sm:$0xff] %v4117_v54  ;;  %v4020_v9 = vadd.f32 %v4019_v49, %v3996_v2  ;;  %5341 = vmatmul.bf16.vlgmr.msrb.gmra.mxu0 %v11195_v44  ;;  %5502 = vmatpush.bf16.msra.mxu3 %v7627_v57  ;;  %v7575_v49 = vor.u32 %v8046_v3, %v7572_v23  ;;  %v7362_v11 = vld [vmem:[%s11144_s7 + $0x8] sm:$0xf]  ;;  %v7994_v43 = vld [vmem:[%s11144_s7 + $0x10] sm:$0xf0] }
 0x316   :  { %4124 = vst [vmem:[%s11193_s11 + $0x14] sm:$0xf] %v4112_v37  ;;  %v4053_v0 = vadd.f32 %v10535_v8, %v3955_v26  ;;  %5365 = vmatmul.bf16.vlgmr.msrb.gmra.mxu1 %v11196_v36  ;;  %5432 = vmatpush.bf16.msra.mxu0 %v7599_v42  ;;  %v8036_v8 = vld [vmem:[%s11144_s7 + $0x160] sm:$0xf0]  ;;  %v8030_v42 = vld [vmem:[%s11144_s7 + $0x130] sm:$0xf0]  ;;  %v7551_v45 = vor.u32 %v8040_v19, %v7548_v13 }
 0x317   :  { %v4045_v61 = vadd.f32 %v10679_v25, %v4020_v9  ;;  %v7531_v40 = vor.u32 %v8036_v8, %v7530_v56  ;;  %5457 = vmatpush.bf16.msra.mxu1 %v7399_v30  ;;  %v7507_v37 = vor.u32 %v8030_v42, %v7506_v34  ;;  %v7602_v26 = vld [vmem:[%s11144_s7 + $0x1e8] sm:$0xf]  ;;  %v7363_v51 = vor.u32 %v7994_v43, %v7362_v11  ;;  %v7578_v3 = vld [vmem:[%s11144_s7 + $0x1b8] sm:$0xf] }
 0x318   :  { %vm4071_vm13 = vcmp.ge.f32.partialorder %v4053_v0, 0.0  ;;  %v4089_v46 = vmul.f32 0.01, %v4053_v0  ;;  %4919 = vmatmul.bf16.gmra.mxu2 %v11191_v32  ;;  %5327 = vmatmul.bf16.gmra.mxu3 %v8918_v59  ;;  %v4106_v32 = vsel %vm4070_vm12, %v4052_v58, %v4088_v10  ;;  %v7387_v10 = vor.u32 %v8000_v6, %v7386_v50 }
 0x319   :  { %vm4063_vm14 = vcmp.ge.f32.partialorder %v4045_v61, 0.0  ;;  %v4081_v1 = vmul.f32 0.01, %v4045_v61  ;;  %5478 = vmatpush.bf16.msra.mxu2 %v7531_v40  ;;  %5503 = vmatpush.bf16.msra.mxu3 %v7615_v15  ;;  %v7603_v8 = vor.u32 %v8054_v47, %v7602_v26 }
 0x31a   :  { %v4107_v48 = vsel %vm4071_vm13, %v4053_v0, %v4089_v46  ;;  %v3997_v12 = vpop.f32.mrf.mxu0  ;;  %5433 = vmatpush.bf16.msra.mxu0 %v7587_v18  ;;  %v7374_v0 = vld [vmem:[%s11144_s7 + $0x20] sm:$0xf]  ;;  %v7494_v18 = vld [vmem:[%s11144_s7 + $0x110] sm:$0xf] }
 0x31b   :  { %v4099_v14 = vsel %vm4063_vm14, %v4045_v61, %v4081_v1  ;;  %v4119_v17 = vpack.c.bf16 %v4107_v48, %v4106_v32  ;;  %v3998_v16 = vadd.f32 %v3997_v12, %v3974_v28  ;;  %v4021_v58 = vpop.f32.mrf.mxu1  ;;  %v4718_v29 = vpop.f32.mrf.mxu2  ;;  %v8027_v61 = vld [vmem:[%s11144_s7 + $0x118] sm:$0xf0]  ;;  %5458 = vmatpush.bf16.msra.mxu1 %v7387_v10  ;;  %v7375_v38 = vor.u32 %v7997_v5, %v7374_v0  ;;  %v7590_v32 = vld [vmem:[%s11144_s7 + $0x1d0] sm:$0xf] }
 0x31c   :  { %v4114_v53 = vpack.c.bf16 %v4099_v14, %v4099_v14  ;;  %v4742_v60 = vpop.f32.mrf.mxu3  ;;  %v7495_v40 = vor.u32 %v8027_v61, %v7494_v18  ;;  %v8051_v48 = vld [vmem:[%s11144_s7 + $0x1d8] sm:$0xf0] }
 0x31d   :  { %4131 = vst [vmem:[%s11193_s11 + $0x3c] sm:$0xff] %v4119_v17  ;;  %v4022_v54 = vadd.f32 %v4021_v58, %v3998_v16  ;;  %v10863_v2 = vadd.f32 %v4742_v60, %v4718_v29  ;;  %5479 = vmatpush.bf16.msra.mxu2 %v7519_v20  ;;  %5504 = vmatpush.bf16.msra.mxu3 %v7603_v8  ;;  %v7482_v58 = vld [vmem:[%s11144_s7 + $0xf8] sm:$0xf]  ;;  %v8024_v29 = vld [vmem:[%s11144_s7 + $0x100] sm:$0xf0] }
 0x31e   :  { %4126 = vst [vmem:[%s11193_s11 + $0x20] sm:$0xf] %v4114_v53  ;;  %5434 = vmatpush.bf16.msra.mxu0 %v7575_v49  ;;  %v7591_v16 = vor.u32 %v8051_v48, %v7590_v32  ;;  %v7483_v7 = vor.u32 %v8024_v29, %v7482_v58  ;;  %v8048_v53 = vld [vmem:[%s11144_s7 + $0x1c0] sm:$0xf0]  ;;  %v3979_v60 = vadd.f32 %v10789_v55, %v10345_v33  ;;  %v7470_v33 = vld [vmem:[%s11144_s7 + $0xe0] sm:$0xf] }
 0x31f   :  { %v4048_v9 = vadd.f32 %v10679_v25, %v4022_v54  ;;  %5459 = vmatpush.bf16.msra.mxu1 %v7375_v38  ;;  %v7579_v15 = vor.u32 %v8048_v53, %v7578_v3  ;;  %v8021_v55 = vld [vmem:[%s11144_s7 + $0xe8] sm:$0xf0] }
 0x320   :  { %v7471_v47 = vor.u32 %v8021_v55, %v7470_v33 }
 0x321   :  { %vm4066_vm15 = vcmp.ge.f32.partialorder %v4048_v9, 0.0  ;;  %v4084_v56 = vmul.f32 0.01, %v4048_v9  ;;  %5480 = vmatpush.bf16.msra.mxu2 %v7507_v37  ;;  %5505 = vmatpush.bf16.msra.mxu3 %v7591_v16 }
 0x322   :  { %v4000_v46 = vpop.f32.mrf.mxu0  ;;  %5435 = vmatpush.bf16.msra.mxu0 %v7563_v62 }
 0x323   :  { %v4102_v28 = vsel %vm4066_vm15, %v4048_v9, %v4084_v56  ;;  %v4001_v1 = vadd.f32 %v4000_v46, %v3977_v24  ;;  %v4024_v57 = vpop.f32.mrf.mxu1  ;;  %v4720_v21 = vpop.f32.mrf.mxu2  ;;  %5460 = vmatpush.bf16.msra.mxu1 %v7363_v51  ;;  %v7566_v9 = vld [vmem:[%s11144_s7 + $0x1a0] sm:$0xf]  ;;  %v7458_v24 = vld [vmem:[%s11144_s7 + $0xc8] sm:$0xf]  ;;  %v8018_v56 = vld [vmem:[%s11144_s7 + $0xd0] sm:$0xf0] }
 0x324   :  { %v4116_v12 = vpack.c.bf16 %v4102_v28, %v4102_v28  ;;  %v4744_v41 = vpop.f32.mrf.mxu3  ;;  %v7567_v27 = vor.u32 %v8045_v35, %v7566_v9  ;;  %v7459_v46 = vor.u32 %v8018_v56, %v7458_v24 }
 0x325   :  { %v4025_v14 = vadd.f32 %v4024_v57, %v4001_v1  ;;  %v10919_v17 = vadd.f32 %v4744_v41, %v4720_v21  ;;  %5346 = vmatmul.bf16.gmra.mxu0 %v8880_v31  ;;  %5481 = vmatpush.bf16.msra.mxu2 %v7495_v40  ;;  %v7554_v40 = vld [vmem:[%s11144_s7 + $0x188] sm:$0xf] }
 0x326   :  { %4128 = vst [vmem:[%s11193_s11 + $0x2c] sm:$0xf] %v4116_v12  ;;  %5370 = vmatmul.bf16.gmra.mxu1 %v9064_v39  ;;  %5436 = vmatpush.bf16.msra.mxu0 %v7551_v45 }
 0x327   :  { %v4051_v20 = vadd.f32 %v10679_v25, %v4025_v14  ;;  %5506 = vmatpush.bf16.msra.mxu3 %v7579_v15 }
 0x328   :  { %5389 = vmatmul.bf16.vlgmr.msrb.gmra.mxu2 %v11194_v63  ;;  %5413 = vmatmul.bf16.vlgmr.msrb.gmra.mxu3 %v11195_v44 }
 0x329   :  { %vm4069_vm0 = vcmp.ge.f32.partialorder %v4051_v20, 0.0  ;;  %v4087_v30 = vmul.f32 0.01, %v4051_v20  ;;  %5482 = vmatpush.bf16.msra.mxu2 %v7483_v7 }
 0x32a   :  { %v4002_v23 = vpop.f32.mrf.mxu0 }
 0x32b   :  { %v4105_v50 = vsel %vm4069_vm0, %v4051_v20, %v4087_v30  ;;  %v4003_v6 = vadd.f32 %v4002_v23, %v3979_v60  ;;  %v4026_v54 = vpop.f32.mrf.mxu1  ;;  %v4723_v49 = vpop.f32.mrf.mxu2  ;;  %5507 = vmatpush.bf16.msra.mxu3 %v7567_v27 }
 0x32c   :  { %v4118_v34 = vpack.c.bf16 %v4105_v50, %v4105_v50  ;;  %v4747_v42 = vpop.f32.mrf.mxu3 }
 0x32d   :  { %v4027_v10 = vadd.f32 %v4026_v54, %v4003_v6  ;;  %v4748_v37 = vadd.f32 %v4747_v42, %v4723_v49  ;;  %5483 = vmatpush.bf16.msra.mxu2 %v7471_v47 }
 0x32e   :  { %4130 = vst [vmem:[%s11193_s11 + $0x38] sm:$0xf] %v4118_v34 }
 0x32f   :  { %v4054_v26 = vadd.f32 %v10679_v25, %v4027_v10 }
 0x331   :  { %vm4072_vm1 = vcmp.ge.f32.partialorder %v4054_v26, 0.0  ;;  %v4090_v0 = vmul.f32 0.01, %v4054_v26  ;;  %5484 = vmatpush.bf16.msra.mxu2 %v7459_v46 }
 0x332   :  { %v4766_v62 = vpop.f32.mrf.mxu0 }
 0x333   :  { %v4108_v5 = vsel %vm4072_vm1, %v4054_v26, %v4090_v0  ;;  %v10960_v18 = vadd.f32 %v4766_v62, %v10863_v2  ;;  %v4790_v25 = vpop.f32.mrf.mxu1  ;;  %v4725_v61 = vpop.f32.mrf.mxu2  ;;  %v8042_v2 = vld [vmem:[%s11144_s7 + $0x190] sm:$0xf0] }
 0x334   :  { %v4120_v8 = vpack.c.bf16 %v4108_v5, %v4108_v5  ;;  %v4749_v19 = vpop.f32.mrf.mxu3  ;;  %v7555_v28 = vor.u32 %v8042_v2, %v7554_v40 }
 0x335   :  { %v4750_v13 = vadd.f32 %v4749_v19, %v4725_v61  ;;  %5351 = vmatmul.bf16.gmra.mxu0 %v8920_v52 }
 0x336   :  { %4132 = vst [vmem:[%s11193_s11 + $0x44] sm:$0xf] %v4120_v8  ;;  %5375 = vmatmul.bf16.gmra.mxu1 %v9158_v4  ;;  %5508 = vmatpush.bf16.msra.mxu3 %v7555_v28 }
 0x338   :  { %5394 = vmatmul.bf16.gmra.mxu2 %v8878_v22  ;;  %5418 = vmatmul.bf16.gmra.mxu3 %v8880_v31 }
 0x33a   :  { %v4768_v1 = vpop.f32.mrf.mxu0 }
 0x33b   :  { %v10982_v57 = vadd.f32 %v4768_v1, %v10919_v17  ;;  %v4792_v21 = vpop.f32.mrf.mxu1  ;;  %v4728_v38 = vpop.f32.mrf.mxu2 }
 0x33c   :  { %v4752_v45 = vpop.f32.mrf.mxu3 }
 0x33d   :  { %v4753_v32 = vadd.f32 %v4752_v45, %v4728_v38 }
 0x342   :  { %v4771_v48 = vpop.f32.mrf.mxu0 }
 0x343   :  { %v10984_v12 = vadd.f32 %v4771_v48, %v4748_v37  ;;  %v4795_v41 = vpop.f32.mrf.mxu1  ;;  %v4730_v11 = vpop.f32.mrf.mxu2 }
 0x344   :  { %v4754_v43 = vpop.f32.mrf.mxu3 }
 0x345   :  { %v4755_v14 = vadd.f32 %v4754_v43, %v4730_v11  ;;  %5437 = vmatmul.bf16.vlgmr.msra.gmra.mxu0 %v11196_v36 }
 0x346   :  { %5461 = vmatmul.bf16.vlgmr.msra.gmra.mxu1 %v11194_v63 }
 0x348   :  { %5399 = vmatmul.bf16.gmra.mxu2 %v8918_v59  ;;  %5423 = vmatmul.bf16.gmra.mxu3 %v8920_v52 }
 0x34a   :  { %v4773_v17 = vpop.f32.mrf.mxu0 }
 0x34b   :  { %v10990_v16 = vadd.f32 %v4773_v17, %v4750_v13  ;;  %v4797_v58 = vpop.f32.mrf.mxu1  ;;  %v4814_v29 = vpop.f32.mrf.mxu2 }
 0x34c   :  { %v4815_v20 = vadd.f32 %v4814_v29, %v4790_v25  ;;  %v4838_v51 = vpop.f32.mrf.mxu3 }
 0x34e   :  { %v10992_v7 = vadd.f32 %v4838_v51, %v4815_v20 }
 0x352   :  { %v4776_v3 = vpop.f32.mrf.mxu0 }
 0x353   :  { %v10994_v53 = vadd.f32 %v4776_v3, %v4753_v32  ;;  %v4800_v60 = vpop.f32.mrf.mxu1  ;;  %v4816_v30 = vpop.f32.mrf.mxu2 }
 0x354   :  { %v4817_v15 = vadd.f32 %v4816_v30, %v4792_v21  ;;  %v4840_v63 = vpop.f32.mrf.mxu3 }
 0x355   :  { %5442 = vmatmul.bf16.gmra.mxu0 %v9064_v39 }
 0x356   :  { %v10997_v23 = vadd.f32 %v4840_v63, %v4817_v15  ;;  %5466 = vmatmul.bf16.gmra.mxu1 %v8878_v22 }
 0x358   :  { %5485 = vmatmul.bf16.vlgmr.msra.gmra.mxu2 %v11195_v44  ;;  %5509 = vmatmul.bf16.vlgmr.msra.gmra.mxu3 %v11196_v36 }
 0x35a   :  { %v4778_v50 = vpop.f32.mrf.mxu0 }
 0x35b   :  { %v11002_v6 = vadd.f32 %v4778_v50, %v4755_v14  ;;  %v4802_v54 = vpop.f32.mrf.mxu1  ;;  %v4819_v49 = vpop.f32.mrf.mxu2 }
 0x35c   :  { %v4820_v34 = vadd.f32 %v4819_v49, %v4795_v41  ;;  %v4843_v42 = vpop.f32.mrf.mxu3 }
 0x35e   :  { %v11004_v10 = vadd.f32 %v4843_v42, %v4820_v34 }
 0x362   :  { %v4862_v37 = vpop.f32.mrf.mxu0 }
 0x363   :  { %v4886_v33 = vpop.f32.mrf.mxu1  ;;  %v4821_v55 = vpop.f32.mrf.mxu2 }
 0x364   :  { %v4887_v26 = vadd.f32 %v4886_v33, %v4862_v37  ;;  %v4822_v47 = vadd.f32 %v4821_v55, %v4797_v58  ;;  %v4845_v9 = vpop.f32.mrf.mxu3 }
 0x365   :  { %5447 = vmatmul.bf16.gmra.mxu0 %v9158_v4 }
 0x366   :  { %v11007_v22 = vadd.f32 %v4845_v9, %v4822_v47  ;;  %5471 = vmatmul.bf16.gmra.mxu1 %v8918_v59 }
 0x368   :  { %5490 = vmatmul.bf16.gmra.mxu2 %v8880_v31  ;;  %5514 = vmatmul.bf16.gmra.mxu3 %v9064_v39 }
 0x36a   :  { %v4864_v44 = vpop.f32.mrf.mxu0 }
 0x36b   :  { %v4888_v36 = vpop.f32.mrf.mxu1  ;;  %v4824_v35 = vpop.f32.mrf.mxu2 }
 0x36c   :  { %v4889_v27 = vadd.f32 %v4888_v36, %v4864_v44  ;;  %v4825_v0 = vadd.f32 %v4824_v35, %v4800_v60  ;;  %v4848_v62 = vpop.f32.mrf.mxu3 }
 0x36e   :  { %v11012_v5 = vadd.f32 %v4848_v62, %v4825_v0 }
 0x372   :  { %v4867_v25 = vpop.f32.mrf.mxu0 }
 0x373   :  { %v4891_v61 = vpop.f32.mrf.mxu1  ;;  %v4826_v24 = vpop.f32.mrf.mxu2 }
 0x374   :  { %v4892_v56 = vadd.f32 %v4891_v61, %v4867_v25  ;;  %v4827_v8 = vadd.f32 %v4826_v24, %v4802_v54  ;;  %v4850_v19 = vpop.f32.mrf.mxu3 }
 0x376   :  { %v11014_v46 = vadd.f32 %v4850_v19, %v4827_v8 }
 0x378   :  { %5495 = vmatmul.bf16.gmra.mxu2 %v8920_v52  ;;  %5519 = vmatmul.bf16.gmra.mxu3 %v9158_v4 }
 0x37a   :  { %v4869_v31 = vpop.f32.mrf.mxu0 }
 0x37b   :  { %v4893_v59 = vpop.f32.mrf.mxu1  ;;  %v4910_v39 = vpop.f32.mrf.mxu2 }
 0x37c   :  { %v4894_v40 = vadd.f32 %v4893_v59, %v4869_v31  ;;  %v11018_v2 = vadd.f32 %v4910_v39, %v4887_v26  ;;  %v5318_v13 = vpop.f32.mrf.mxu3 }
 0x37d   :  { %v5319_v28 = vadd.f32 %v5318_v13, %v10960_v18 }
 0x382   :  { %v4872_v1 = vpop.f32.mrf.mxu0 }
 0x383   :  { %v4896_v21 = vpop.f32.mrf.mxu1  ;;  %v4912_v38 = vpop.f32.mrf.mxu2 }
 0x384   :  { %v4897_v45 = vadd.f32 %v4896_v21, %v4872_v1  ;;  %v11021_v32 = vadd.f32 %v4912_v38, %v4889_v27  ;;  %v5320_v48 = vpop.f32.mrf.mxu3  ;;  %v11049_v27 = vld [vmem:[%s11197_s5] sm:$0x7] }
 0x385   :  { %v5321_v52 = vadd.f32 %v5320_v48, %v10982_v57  ;;  %v11054_v61 = vperm.slane %v11049_v27, 0  ;;  %v11059_v31 = vperm.slane %v11049_v27, 1 }
 0x38a   :  { %v4874_v41 = vpop.f32.mrf.mxu0 }
 0x38b   :  { %v4898_v4 = vpop.f32.mrf.mxu1  ;;  %v4915_v11 = vpop.f32.mrf.mxu2 }
 0x38c   :  { %v4899_v43 = vadd.f32 %v4898_v4, %v4874_v41  ;;  %v11024_v14 = vadd.f32 %v4915_v11, %v4892_v56  ;;  %v5323_v17 = vpop.f32.mrf.mxu3 }
 0x38d   :  { %v5324_v58 = vadd.f32 %v5323_v17, %v10984_v12 }
 0x392   :  { %v5342_v29 = vpop.f32.mrf.mxu0 }
 0x393   :  { %v5366_v18 = vpop.f32.mrf.mxu1  ;;  %v4917_v20 = vpop.f32.mrf.mxu2  ;;  %v5343_v35 = vadd.f32 %v5342_v29, %v5319_v28 }
 0x394   :  { %v11027_v51 = vadd.f32 %v4917_v20, %v4894_v40  ;;  %v5325_v3 = vpop.f32.mrf.mxu3 }
 0x395   :  { %v11030_v60 = vadd.f32 %v5325_v3, %v10990_v16  ;;  %v5367_v25 = vadd.f32 %v5366_v18, %v5343_v35 }
 0x397   :  { %v5533_v8 = vadd.f32 %v11054_v61, %v5367_v25 }
 0x399   :  { %v5569_v21 = vmul.f32 0.01, %v5533_v8  ;;  %vm5551_vm2 = vcmp.ge.f32.partialorder %v5533_v8, 0.0 }
 0x39a   :  { %v5344_v30 = vpop.f32.mrf.mxu0 }
 0x39b   :  { %v5368_v57 = vpop.f32.mrf.mxu1  ;;  %v4920_v15 = vpop.f32.mrf.mxu2  ;;  %v5345_v56 = vadd.f32 %v5344_v30, %v5321_v52  ;;  %v5587_v52 = vsel %vm5551_vm2, %v5533_v8, %v5569_v21 }
 0x39c   :  { %v11032_v63 = vadd.f32 %v4920_v15, %v4897_v45  ;;  %v5328_v50 = vpop.f32.mrf.mxu3 }
 0x39d   :  { %v11035_v54 = vadd.f32 %v5328_v50, %v10994_v53  ;;  %v5369_v28 = vadd.f32 %v5368_v57, %v5345_v56 }
 0x39f   :  { %v5536_v48 = vadd.f32 %v11054_v61, %v5369_v28 }
 0x3a1   :  { %v5572_v20 = vmul.f32 0.01, %v5536_v48  ;;  %vm5554_vm4 = vcmp.ge.f32.partialorder %v5536_v48, 0.0 }
 0x3a2   :  { %v5347_v49 = vpop.f32.mrf.mxu0 }
 0x3a3   :  { %v4922_v12 = vpop.f32.mrf.mxu2  ;;  %v5371_v37 = vpop.f32.mrf.mxu1  ;;  %v5348_v41 = vadd.f32 %v5347_v49, %v5324_v58  ;;  %v5590_v50 = vsel %vm5554_vm4, %v5536_v48, %v5572_v20 }
 0x3a4   :  { %v11037_v34 = vadd.f32 %v4922_v12, %v4899_v43  ;;  %v5330_v42 = vpop.f32.mrf.mxu3 }
 0x3a5   :  { %v11040_v33 = vadd.f32 %v5330_v42, %v11002_v6  ;;  %v5372_v3 = vadd.f32 %v5371_v37, %v5348_v41 }
 0x3a7   :  { %v5539_v49 = vadd.f32 %v11054_v61, %v5372_v3 }
 0x3a9   :  { %v5575_v37 = vmul.f32 0.01, %v5539_v49  ;;  %vm5557_vm6 = vcmp.ge.f32.partialorder %v5539_v49, 0.0 }
 0x3aa   :  { %v5349_v16 = vpop.f32.mrf.mxu0 }
 0x3ab   :  { %v5390_v55 = vpop.f32.mrf.mxu2  ;;  %v5373_v47 = vpop.f32.mrf.mxu1  ;;  %v5350_v12 = vadd.f32 %v5349_v16, %v11030_v60 }
 0x3ac   :  { %v5414_v26 = vpop.f32.mrf.mxu3  ;;  %v5391_v24 = vadd.f32 %v5390_v55, %v10992_v7 }
 0x3ae   :  { %v5415_v19 = vadd.f32 %v5414_v26, %v5391_v24 }
 0x3b2   :  { %v11042_v9 = vpop.f32.mrf.mxu0 }
 0x3b3   :  { %v5392_v44 = vpop.f32.mrf.mxu2  ;;  %v11044_v53 = vpop.f32.mrf.mxu1  ;;  %v5353_v16 = vadd.f32 %v11042_v9, %v11035_v54  ;;  %v11087_v54 = vperm.slane %v11049_v27, 2 }
 0x3b4   :  { %v5416_v36 = vpop.f32.mrf.mxu3  ;;  %v5393_v38 = vadd.f32 %v5392_v44, %v10997_v23 }
 0x3b6   :  { %v5417_v4 = vadd.f32 %v5416_v36, %v5393_v38 }
 0x3ba   :  { %v11051_v0 = vpop.f32.mrf.mxu0 }
 0x3bb   :  { %v5395_v6 = vpop.f32.mrf.mxu2  ;;  %v11061_v39 = vpop.f32.mrf.mxu1 }
 0x3bc   :  { %v5419_v62 = vpop.f32.mrf.mxu3  ;;  %v5396_v30 = vadd.f32 %v5395_v6, %v11004_v10  ;;  %v5374_v6 = vadd.f32 %v5373_v47, %v5350_v12 }
 0x3be   :  { %v5420_v42 = vadd.f32 %v5419_v62, %v5396_v30  ;;  %v5593_v62 = vsel %vm5557_vm6, %v5539_v49, %v5575_v37  ;;  %v5542_v8 = vadd.f32 %v11054_v61, %v5374_v6 }
 0x3c0   :  { %v5578_v9 = vmul.f32 0.01, %v5542_v8  ;;  %vm5560_vm8 = vcmp.ge.f32.partialorder %v5542_v8, 0.0 }
 0x3c2   :  { %v5438_v59 = vpop.f32.mrf.mxu0  ;;  %v5596_v41 = vsel %vm5560_vm8, %v5542_v8, %v5578_v9 }
 0x3c3   :  { %v5439_v40 = vadd.f32 %v5438_v59, %v5415_v19  ;;  %v5397_v13 = vpop.f32.mrf.mxu2  ;;  %v5462_v57 = vpop.f32.mrf.mxu1 }
 0x3c4   :  { %v5421_v1 = vpop.f32.mrf.mxu3  ;;  %v5398_v25 = vadd.f32 %v5397_v13, %v11007_v22  ;;  %v5377_v13 = vadd.f32 %v11044_v53, %v5353_v16 }
 0x3c5   :  { %v5534_v45 = vadd.f32 %v11059_v31, %v5439_v40  ;;  %v5463_v40 = vadd.f32 %v5462_v57, %v11018_v2 }
 0x3c6   :  { %v5422_v19 = vadd.f32 %v5421_v1, %v5398_v25  ;;  %v5545_v53 = vadd.f32 %v11054_v61, %v5377_v13 }
 0x3c7   :  { %vm5552_vm3 = vcmp.ge.f32.partialorder %v5534_v45, 0.0  ;;  %v5570_v7 = vmul.f32 0.01, %v5534_v45 }
 0x3c8   :  { %v5581_v30 = vmul.f32 0.01, %v5545_v53  ;;  %vm5563_vm11 = vcmp.ge.f32.partialorder %v5545_v53, 0.0 }
 0x3c9   :  { %v5588_v11 = vsel %vm5552_vm3, %v5534_v45, %v5570_v7 }
 0x3ca   :  { %v5605_v43 = vpack.c.bf16 %v5588_v11, %v5587_v52  ;;  %v5440_v17 = vpop.f32.mrf.mxu0 }
 0x3cb   :  { %v5441_v29 = vadd.f32 %v5440_v17, %v5417_v4  ;;  %v5400_v18 = vpop.f32.mrf.mxu2  ;;  %v5464_v56 = vpop.f32.mrf.mxu1  ;;  %v5355_v4 = vadd.f32 %v11051_v0, %v11040_v33 }
 0x3cc   :  { %5617 = vst [vmem:[%s11198_s2] sm:$0xff] %v5605_v43  ;;  %v5424_v23 = vpop.f32.mrf.mxu3  ;;  %v5401_v1 = vadd.f32 %v5400_v18, %v11012_v5  ;;  %v5465_v17 = vadd.f32 %v5464_v56, %v11021_v32 }
 0x3cd   :  { %v5537_v15 = vadd.f32 %v11059_v31, %v5441_v29  ;;  %v5379_v33 = vadd.f32 %v11061_v39, %v5355_v4 }
 0x3ce   :  { %v5425_v11 = vadd.f32 %v5424_v23, %v5401_v1 }
 0x3cf   :  { %vm5555_vm5 = vcmp.ge.f32.partialorder %v5537_v15, 0.0  ;;  %v5573_v58 = vmul.f32 0.01, %v5537_v15 }
 0x3d1   :  { %v5591_v55 = vsel %vm5555_vm5, %v5537_v15, %v5573_v58 }
 0x3d2   :  { %v5607_v26 = vpack.c.bf16 %v5591_v55, %v5590_v50  ;;  %v5443_v44 = vpop.f32.mrf.mxu0  ;;  %v5548_v55 = vadd.f32 %v11054_v61, %v5379_v33 }
 0x3d3   :  { %v5444_v36 = vadd.f32 %v5443_v44, %v5420_v42  ;;  %v5402_v35 = vpop.f32.mrf.mxu2  ;;  %v5467_v27 = vpop.f32.mrf.mxu1  ;;  %v5599_v42 = vsel %vm5563_vm11, %v5545_v53, %v5581_v30 }
 0x3d4   :  { %5619 = vst [vmem:[%s11198_s2 + $0xc] sm:$0xff] %v5607_v26  ;;  %v5426_v10 = vpop.f32.mrf.mxu3  ;;  %v5403_v0 = vadd.f32 %v5402_v35, %v11014_v46  ;;  %v5468_v46 = vadd.f32 %v5467_v27, %v11024_v14  ;;  %v5584_v16 = vmul.f32 0.01, %v5548_v55  ;;  %vm5566_vm14 = vcmp.ge.f32.partialorder %v5548_v55, 0.0 }
 0x3d5   :  { %v5540_v24 = vadd.f32 %v11059_v31, %v5444_v36 }
 0x3d6   :  { %v5427_v26 = vadd.f32 %v5426_v10, %v5403_v0 }
 0x3d7   :  { %vm5558_vm7 = vcmp.ge.f32.partialorder %v5540_v24, 0.0  ;;  %v5576_v60 = vmul.f32 0.01, %v5540_v24 }
 0x3d9   :  { %v5594_v59 = vsel %vm5558_vm7, %v5540_v24, %v5576_v60 }
 0x3da   :  { %v5609_v28 = vpack.c.bf16 %v5594_v59, %v5593_v62  ;;  %v5445_v47 = vpop.f32.mrf.mxu0 }
 0x3db   :  { %v5446_v21 = vadd.f32 %v5445_v47, %v5422_v19  ;;  %v5486_v22 = vpop.f32.mrf.mxu2  ;;  %v5469_v37 = vpop.f32.mrf.mxu1  ;;  %v5602_v19 = vsel %vm5566_vm14, %v5548_v55, %v5584_v16 }
 0x3dc   :  { %5621 = vst [vmem:[%s11198_s2 + $0x18] sm:$0xff] %v5609_v28  ;;  %v5487_v38 = vadd.f32 %v5486_v22, %v5463_v40  ;;  %v5510_v45 = vpop.f32.mrf.mxu3  ;;  %v5470_v40 = vadd.f32 %v5469_v37, %v11027_v51 }
 0x3dd   :  { %v5543_v2 = vadd.f32 %v11059_v31, %v5446_v21 }
 0x3de   :  { %v5511_v7 = vadd.f32 %v5510_v45, %v5487_v38 }
 0x3df   :  { %vm5561_vm9 = vcmp.ge.f32.partialorder %v5543_v2, 0.0  ;;  %v5579_v48 = vmul.f32 0.01, %v5543_v2 }
 0x3e0   :  { %v5535_v52 = vadd.f32 %v11087_v54, %v5511_v7 }
 0x3e1   :  { %v5597_v43 = vsel %vm5561_vm9, %v5543_v2, %v5579_v48 }
 0x3e2   :  { %v5611_v5 = vpack.c.bf16 %v5597_v43, %v5596_v41  ;;  %vm5553_vm10 = vcmp.ge.f32.partialorder %v5535_v52, 0.0  ;;  %v5571_v29 = vmul.f32 0.01, %v5535_v52  ;;  %v5448_v18 = vpop.f32.mrf.mxu0 }
 0x3e3   :  { %v5449_v20 = vadd.f32 %v5448_v18, %v5425_v11  ;;  %v5488_v3 = vpop.f32.mrf.mxu2  ;;  %v5472_v38 = vpop.f32.mrf.mxu1 }
 0x3e4   :  { %5623 = vst [vmem:[%s11198_s2 + $0x24] sm:$0xff] %v5611_v5  ;;  %v5589_v57 = vsel %vm5553_vm10, %v5535_v52, %v5571_v29  ;;  %v5489_v15 = vadd.f32 %v5488_v3, %v5465_v17  ;;  %v5512_v58 = vpop.f32.mrf.mxu3  ;;  %v5473_v1 = vadd.f32 %v5472_v38, %v11032_v63 }
 0x3e5   :  { %v5606_v23 = vpack.c.bf16 %v5589_v57, %v5589_v57  ;;  %v5546_v32 = vadd.f32 %v11059_v31, %v5449_v20 }
 0x3e6   :  { %v5513_v50 = vadd.f32 %v5512_v58, %v5489_v15 }
 0x3e7   :  { %5618 = vst [vmem:[%s11198_s2 + $0x8] sm:$0xf] %v5606_v23  ;;  %vm5564_vm12 = vcmp.ge.f32.partialorder %v5546_v32, 0.0  ;;  %v5582_v49 = vmul.f32 0.01, %v5546_v32 }
 0x3e8   :  { %v5538_v12 = vadd.f32 %v11087_v54, %v5513_v50 }
 0x3e9   :  { %v5600_v39 = vsel %vm5564_vm12, %v5546_v32, %v5582_v49 }
 0x3ea   :  { %v5613_v44 = vpack.c.bf16 %v5600_v39, %v5599_v42  ;;  %vm5556_vm13 = vcmp.ge.f32.partialorder %v5538_v12, 0.0  ;;  %v5574_v36 = vmul.f32 0.01, %v5538_v12  ;;  %v5450_v35 = vpop.f32.mrf.mxu0 }
 0x3eb   :  { %v5451_v6 = vadd.f32 %v5450_v35, %v5427_v26  ;;  %v5491_v25 = vpop.f32.mrf.mxu2  ;;  %v5474_v11 = vpop.f32.mrf.mxu1 }
 0x3ec   :  { %5625 = vst [vmem:[%s11198_s2 + $0x30] sm:$0xff] %v5613_v44  ;;  %v5592_v24 = vsel %vm5556_vm13, %v5538_v12, %v5574_v36  ;;  %v5492_v56 = vadd.f32 %v5491_v25, %v5468_v46  ;;  %v5515_v60 = vpop.f32.mrf.mxu3  ;;  %v5475_v43 = vadd.f32 %v5474_v11, %v11037_v34 }
 0x3ed   :  { %v5608_v61 = vpack.c.bf16 %v5592_v24, %v5592_v24  ;;  %v5549_v10 = vadd.f32 %v11059_v31, %v5451_v6 }
 0x3ee   :  { %v5516_v14 = vadd.f32 %v5515_v60, %v5492_v56 }
 0x3ef   :  { %5620 = vst [vmem:[%s11198_s2 + $0x14] sm:$0xf] %v5608_v61  ;;  %vm5567_vm15 = vcmp.ge.f32.partialorder %v5549_v10, 0.0  ;;  %v5585_v62 = vmul.f32 0.01, %v5549_v10 }
 0x3f0   :  { %v5541_v8 = vadd.f32 %v11087_v54, %v5516_v14 }
 0x3f1   :  { %v5603_v59 = vsel %vm5567_vm15, %v5549_v10, %v5585_v62 }
 0x3f2   :  { %v5615_v28 = vpack.c.bf16 %v5603_v59, %v5602_v19  ;;  %vm5559_vm0 = vcmp.ge.f32.partialorder %v5541_v8, 0.0  ;;  %v5577_v47 = vmul.f32 0.01, %v5541_v8 }
 0x3f3   :  { %v5493_v21 = vpop.f32.mrf.mxu2 }
 0x3f4   :  { %5627 = vst [vmem:[%s11198_s2 + $0x3c] sm:$0xff] %v5615_v28  ;;  %v5595_v31 = vsel %vm5559_vm0, %v5541_v8, %v5577_v47  ;;  %v5494_v22 = vadd.f32 %v5493_v21, %v5470_v40  ;;  %v5517_v13 = vpop.f32.mrf.mxu3 }
 0x3f5   :  { %v5610_v45 = vpack.c.bf16 %v5595_v31, %v5595_v31 }
 0x3f6   :  { %v5518_v9 = vadd.f32 %v5517_v13, %v5494_v22 }
 0x3f7   :  { %5622 = vst [vmem:[%s11198_s2 + $0x20] sm:$0xf] %v5610_v45 }
 0x3f8   :  { %v5544_v51 = vadd.f32 %v11087_v54, %v5518_v9 }
 0x3fa   :  { %vm5562_vm1 = vcmp.ge.f32.partialorder %v5544_v51, 0.0  ;;  %v5580_v2 = vmul.f32 0.01, %v5544_v51 }
 0x3fb   :  { %v5496_v7 = vpop.f32.mrf.mxu2 }
 0x3fc   :  { %v5598_v48 = vsel %vm5562_vm1, %v5544_v51, %v5580_v2  ;;  %v5497_v53 = vadd.f32 %v5496_v7, %v5473_v1  ;;  %v5520_v52 = vpop.f32.mrf.mxu3 }
 0x3fd   :  { %v5612_v41 = vpack.c.bf16 %v5598_v48, %v5598_v48 }
 0x3fe   :  { %v5521_v4 = vadd.f32 %v5520_v52, %v5497_v53 }
 0x3ff   :  { %5624 = vst [vmem:[%s11198_s2 + $0x2c] sm:$0xf] %v5612_v41 }
 0x400   :  { %v5547_v27 = vadd.f32 %v11087_v54, %v5521_v4 }
 0x402   :  { %vm5565_vm2 = vcmp.ge.f32.partialorder %v5547_v27, 0.0  ;;  %v5583_v17 = vmul.f32 0.01, %v5547_v27 }
 0x403   :  { %v5498_v63 = vpop.f32.mrf.mxu2 }
 0x404   :  { %v5601_v5 = vsel %vm5565_vm2, %v5547_v27, %v5583_v17  ;;  %v5499_v29 = vadd.f32 %v5498_v63, %v5475_v43  ;;  %v5522_v20 = vpop.f32.mrf.mxu3 }
 0x405   :  { %v5614_v18 = vpack.c.bf16 %v5601_v5, %v5601_v5 }
 0x406   :  { %v5523_v3 = vadd.f32 %v5522_v20, %v5499_v29 }
 0x407   :  { %5626 = vst [vmem:[%s11198_s2 + $0x38] sm:$0xf] %v5614_v18 }
 0x408   :  { %v5550_v30 = vadd.f32 %v11087_v54, %v5523_v3 }
 0x40a   :  { %vm5568_vm3 = vcmp.ge.f32.partialorder %v5550_v30, 0.0  ;;  %v5586_v57 = vmul.f32 0.01, %v5550_v30 }
 0x40c   :  { %v5604_v15 = vsel %vm5568_vm3, %v5550_v30, %v5586_v57 }
 0x40d   :  { %v5616_v58 = vpack.c.bf16 %v5604_v15, %v5604_v15 }
 0x40f   :  { %5628 = vst [vmem:[%s11198_s2 + $0x44] sm:$0xf] %v5616_v58 }
 0x410   :  { %5653 = vsyncpa [#allocation3], 1 }
 0x411   :  { %5654 = vsyncpa [#allocation5], 1 }
 0x412   :  { %5655 = vsyncpa [#allocation8], 1 }

</bundles_post_ra>
